<compile_context>
chip_gen: v5e
topology: v5e:2x2
jax: 0.10.0
libtpu: 0.0.40
codegen_flags: <defaults>
</compile_context>

<pallas_src>
import jax
import jax.numpy as jnp
from jax.experimental import pallas as pl
from jax.experimental.pallas import tpu as pltpu

MOMENTUM = 0.999
TEMPERATURE = 0.07


# --------------------------------------------------------------------------
# Small version-compat shims (keep the script runnable on slightly older jax).
# --------------------------------------------------------------------------
def _compiler_params(**kwargs):
    cls = getattr(pltpu, "CompilerParams", None)
    if cls is None:  # older jax releases
        cls = getattr(pltpu, "TPUCompilerParams")
    return cls(**kwargs)


if hasattr(pltpu, "MemorySpace"):
    _SMEM_SPACE = pltpu.MemorySpace.SMEM
elif hasattr(pltpu, "TPUMemorySpace"):
    _SMEM_SPACE = pltpu.TPUMemorySpace.SMEM
else:  # very old: pltpu.SMEM is the enum value
    _SMEM_SPACE = pltpu.SMEM


def _pick_block(n, candidates=(512, 256, 128)):
    """Largest reduction tile (multiple of 128) that divides n, else full n."""
    for c in candidates:
        if n % c == 0:
            return c
    return n


# --------------------------------------------------------------------------
# Shared fc-head + L2 normalize epilogue (runs once, at the last K step).
# --------------------------------------------------------------------------
def _mlp_head_and_normalize(acc, bf, w1, b1, w2, b2):
    h = jnp.maximum(acc + bf, 0.0)  # feature-extractor ReLU
    h = jnp.dot(h.astype(jnp.bfloat16), w1.astype(jnp.bfloat16),
                preferred_element_type=jnp.float32) + b1
    h = jnp.maximum(h, 0.0)
    z = jnp.dot(h.astype(jnp.bfloat16), w2.astype(jnp.bfloat16),
                preferred_element_type=jnp.float32) + b2
    # torch.nn.functional.normalize(z, dim=1) with eps=1e-12, kept in f32.
    nsq = jnp.sum(z * z, axis=-1, keepdims=True)
    return z * jax.lax.rsqrt(jnp.maximum(nsq, 1e-24))


# --------------------------------------------------------------------------
# Query encoder: first matmul tiled over in_features with VMEM accumulator.
# --------------------------------------------------------------------------
def _q_encoder_kernel(x_ref, wf_ref, bf_ref, w1_ref, b1_ref, w2_ref, b2_ref,
                      out_ref, acc_ref):
    kk = pl.program_id(1)

    @pl.when(kk == 0)
    def _init():
        acc_ref[...] = jnp.zeros_like(acc_ref)

    acc_ref[...] += jnp.dot(
        x_ref[...], wf_ref[...].astype(jnp.bfloat16),
        preferred_element_type=jnp.float32)

    @pl.when(kk == pl.num_programs(1) - 1)
    def _finalize():
        out_ref[...] = _mlp_head_and_normalize(
            acc_ref[...], bf_ref[...], w1_ref[...], b1_ref[...],
            w2_ref[...], b2_ref[...])


def encoder_q_forward(x, params):
    wf, bf, w1, b1, w2, b2 = params
    B, F = x.shape
    Dm = wf.shape[1]
    D = w2.shape[1]
    bk = _pick_block(F)
    bm = B  # TODO(synk): tile the batch dim too once B is large.
    grid = (B // bm, F // bk)
    return pl.pallas_call(
        _q_encoder_kernel,
        out_shape=jax.ShapeDtypeStruct((B, D), jnp.float32),
        grid=grid,
        in_specs=[
            pl.BlockSpec((bm, bk), lambda i, kk: (i, kk)),
            pl.BlockSpec((bk, Dm), lambda i, kk: (kk, 0)),
            pl.BlockSpec((1, Dm), lambda i, kk: (0, 0)),
            pl.BlockSpec((Dm, Dm), lambda i, kk: (0, 0)),
            pl.BlockSpec((1, Dm), lambda i, kk: (0, 0)),
            pl.BlockSpec((Dm, D), lambda i, kk: (0, 0)),
            pl.BlockSpec((1, D), lambda i, kk: (0, 0)),
        ],
        out_specs=pl.BlockSpec((bm, D), lambda i, kk: (i, 0)),
        scratch_shapes=[pltpu.VMEM((bm, Dm), jnp.float32)],
        compiler_params=_compiler_params(
            dimension_semantics=("parallel", "arbitrary"),
            vmem_limit_bytes=32 * 1024 * 1024),
    )(x, wf, bf, w1, b1, w2, b2)


# --------------------------------------------------------------------------
# Key encoder with the momentum update fused in:
#   pk_new = m*pk + (1-m)*pq computed in VMEM, used for the matmuls, and
#   written out as additional outputs (new key-encoder parameters).
# --------------------------------------------------------------------------
def _k_encoder_kernel(xk_ref, wfq_ref, wfk_ref, bfq_ref, bfk_ref,
                      w1q_ref, w1k_ref, b1q_ref, b1k_ref,
                      w2q_ref, w2k_ref, b2q_ref, b2k_ref,
                      k_out_ref, wfk_o_ref, bfk_o_ref, w1k_o_ref,
                      b1k_o_ref, w2k_o_ref, b2k_o_ref, acc_ref):
    kk = pl.program_id(0)
    m = MOMENTUM

    # Fused momentum update of this first-layer weight tile.
    wfk_new = wfk_ref[...] * m + wfq_ref[...] * (1.0 - m)
    wfk_o_ref[...] = wfk_new

    @pl.when(kk == 0)
    def _init():
        acc_ref[...] = jnp.zeros_like(acc_ref)

    acc_ref[...] += jnp.dot(
        xk_ref[...], wfk_new.astype(jnp.bfloat16),
        preferred_element_type=jnp.float32)

    @pl.when(kk == pl.num_programs(0) - 1)
    def _finalize():
        bfk_new = bfk_ref[...] * m + bfq_ref[...] * (1.0 - m)
        w1k_new = w1k_ref[...] * m + w1q_ref[...] * (1.0 - m)
        b1k_new = b1k_ref[...] * m + b1q_ref[...] * (1.0 - m)
        w2k_new = w2k_ref[...] * m + w2q_ref[...] * (1.0 - m)
        b2k_new = b2k_ref[...] * m + b2q_ref[...] * (1.0 - m)
        bfk_o_ref[...] = bfk_new
        w1k_o_ref[...] = w1k_new
        b1k_o_ref[...] = b1k_new
        w2k_o_ref[...] = w2k_new
        b2k_o_ref[...] = b2k_new
        k_out_ref[...] = _mlp_head_and_normalize(
            acc_ref[...], bfk_new, w1k_new, b1k_new, w2k_new, b2k_new)


def encoder_k_forward(x_k, params_q, params_k):
    wfq, bfq, w1q, b1q, w2q, b2q = params_q
    wfk, bfk, w1k, b1k, w2k, b2k = params_k
    B, F = x_k.shape
    Dm = wfq.shape[1]
    D = w2q.shape[1]
    bk = _pick_block(F)
    grid = (F // bk,)

    def _full(shape):
        return pl.BlockSpec(shape, lambda kk: (0,) * len(shape))

    outs = pl.pallas_call(
        _k_encoder_kernel,
        out_shape=(
            jax.ShapeDtypeStruct((B, D), jnp.float32),
            jax.ShapeDtypeStruct(wfk.shape, wfk.dtype),
            jax.ShapeDtypeStruct(bfk.shape, bfk.dtype),
            jax.ShapeDtypeStruct(w1k.shape, w1k.dtype),
            jax.ShapeDtypeStruct(b1k.shape, b1k.dtype),
            jax.ShapeDtypeStruct(w2k.shape, w2k.dtype),
            jax.ShapeDtypeStruct(b2k.shape, b2k.dtype),
        ),
        grid=grid,
        in_specs=[
            pl.BlockSpec((B, bk), lambda kk: (0, kk)),    # x_k tile
            pl.BlockSpec((bk, Dm), lambda kk: (kk, 0)),   # wf_q tile
            pl.BlockSpec((bk, Dm), lambda kk: (kk, 0)),   # wf_k tile
            _full((1, Dm)), _full((1, Dm)),               # bf_q, bf_k
            _full((Dm, Dm)), _full((Dm, Dm)),             # w1_q, w1_k
            _full((1, Dm)), _full((1, Dm)),               # b1_q, b1_k
            _full((Dm, D)), _full((Dm, D)),               # w2_q, w2_k
            _full((1, D)), _full((1, D)),                 # b2_q, b2_k
        ],
        out_specs=(
            pl.BlockSpec((B, D), lambda kk: (0, 0)),      # k features
            pl.BlockSpec((bk, Dm), lambda kk: (kk, 0)),   # wf_k_new tile
            _full((1, Dm)),
            _full((Dm, Dm)),
            _full((1, Dm)),
            _full((Dm, D)),
            _full((1, D)),
        ),
        scratch_shapes=[pltpu.VMEM((B, Dm), jnp.float32)],
        compiler_params=_compiler_params(
            dimension_semantics=("arbitrary",),
            vmem_limit_bytes=32 * 1024 * 1024),
    )(x_k, wfq, wfk, bfq, bfk, w1q, w1k, b1q, b1k, w2q, w2k, b2q, b2k)
    k_feat = outs[0]
    new_params_k = tuple(outs[1:])
    return k_feat, new_params_k


# --------------------------------------------------------------------------
# Contrastive head: single lane-dense (B, 1 + queue_size) logits output.
# queue_state rows: row 0 = dummy, row 1+j = PyTorch queue[:, j].
# --------------------------------------------------------------------------
def _moco_head_kernel(q_ref, k_ref, queue_ref, logits_ref):
    inv_t = 1.0 / TEMPERATURE
    q = q_ref[...]
    l_pos = jnp.sum(q * k_ref[...], axis=-1, keepdims=True)          # (B, 1) f32
    l_all = jax.lax.dot_general(                                      # (B, 1+K)
        q.astype(jnp.bfloat16), queue_ref[...].astype(jnp.bfloat16),
        dimension_numbers=(((1,), (1,)), ((), ())),
        preferred_element_type=jnp.float32)
    col = jax.lax.broadcasted_iota(jnp.int32, l_all.shape, 1)
    l_pos_b = jnp.broadcast_to(l_pos, l_all.shape)
    logits_ref[...] = jnp.where(col == 0, l_pos_b, l_all) * inv_t


def moco_head(q, k, queue_state):
    B, D = q.shape
    n_rows = queue_state.shape[0]  # 1 + queue_size
    return pl.pallas_call(
        _moco_head_kernel,
        out_shape=jax.ShapeDtypeStruct((B, n_rows), jnp.float32),
        grid=(1,),
        in_specs=[
            pl.BlockSpec((B, D), lambda i: (0, 0)),
            pl.BlockSpec((B, D), lambda i: (0, 0)),
            pl.BlockSpec((n_rows, D), lambda i: (0, 0)),
        ],
        out_specs=pl.BlockSpec((B, n_rows), lambda i: (0, 0)),
        compiler_params=_compiler_params(
            dimension_semantics=("arbitrary",),
            vmem_limit_bytes=32 * 1024 * 1024),
    )(q, k, queue_state)


# --------------------------------------------------------------------------
# In-place dequeue_and_enqueue: only the B new key rows are DMA'd into the
# aliased queue buffer (no full-queue copy).
# --------------------------------------------------------------------------
def _enqueue_kernel(k_ref, ptr_ref, queue_in_ref, queue_out_ref, copy_sem):
    del queue_in_ref  # same buffer as queue_out_ref (input_output_aliases)
    start = ptr_ref[0] + 1  # +1 skips the dummy row at index 0
    copy = pltpu.make_async_copy(
        k_ref, queue_out_ref.at[pl.ds(start, k_ref.shape[0]), :], copy_sem)
    copy.start()
    copy.wait()


def enqueue(keys, queue_state, queue_ptr):
    B, D = keys.shape
    return pl.pallas_call(
        _enqueue_kernel,
        out_shape=jax.ShapeDtypeStruct(queue_state.shape, queue_state.dtype),
        grid=(1,),
        in_specs=[
            pl.BlockSpec((B, D), lambda i: (0, 0)),           # new keys -> VMEM
            pl.BlockSpec(memory_space=_SMEM_SPACE),           # queue_ptr scalar
            pl.BlockSpec(memory_space=pl.ANY),                # queue state (aliased)
        ],
        out_specs=pl.BlockSpec(memory_space=pl.ANY),
        scratch_shapes=[pltpu.SemaphoreType.DMA],
        input_output_aliases={2: 0},
        compiler_params=_compiler_params(
            dimension_semantics=("arbitrary",), has_side_effects=True),
    )(keys, queue_ptr, queue_state)


# --------------------------------------------------------------------------
# Full MoCoV0.forward (mlp=True, simple_shuffle=False, vali=False).
# --------------------------------------------------------------------------
def moco_forward(im_q, im_k, params_q, params_k, queue_state, queue_ptr):
    B = im_q.shape[0]
    x_q = im_q.reshape(B, -1).astype(jnp.bfloat16)  # like torch.flatten, bf16 for MXU
    x_k = im_k.reshape(B, -1).astype(jnp.bfloat16)

    # q = normalize(encoder_q(im_q), dim=1)
    q = encoder_q_forward(x_q, params_q)

    # with torch.no_grad(): momentum update fused into the key encoder
    k, params_k_new = encoder_k_forward(x_k, params_q, params_k)

    # logits = cat([l_pos, l_neg], 1) / T   (single fused lane-dense output)
    logits = moco_head(q, k, queue_state)
    labels = jnp.zeros((B,), dtype=jnp.int32)  # TODO(synk): torch uses int64 labels.

    # dequeue_and_enqueue: in-place write of B rows, ptr = (ptr+B) % queue_size
    new_queue_state = enqueue(k, queue_state, queue_ptr)
    queue_size = queue_state.shape[0] - 1
    new_ptr = (queue_ptr + B) % queue_size
    return logits, labels, new_queue_state, params_k_new, new_ptr


# donate key params + queue so the momentum / enqueue updates reuse the buffers.
moco_step = jax.jit(moco_forward, donate_argnums=(3, 4))


# --------------------------------------------------------------------------
# Parameter construction (deterministic, synthetic).
# --------------------------------------------------------------------------
def init_params(key, in_features, dim_mlp, dim):
    ks = jax.random.split(key, 6)
    wf = jax.random.normal(ks[0], (in_features, dim_mlp), jnp.float32) * 0.02
    bf = jax.random.normal(ks[1], (1, dim_mlp), jnp.float32) * 0.02
    w1 = jax.random.normal(ks[2], (dim_mlp, dim_mlp), jnp.float32) * 0.02
    b1 = jax.random.normal(ks[3], (1, dim_mlp), jnp.float32) * 0.02
    w2 = jax.random.normal(ks[4], (dim_mlp, dim), jnp.float32) * 0.02
    b2 = jax.random.normal(ks[5], (1, dim), jnp.float32) * 0.02
    return (wf, bf, w1, b1, w2, b2)


if __name__ == "__main__":
    B, C, H, W = 8, 4, 16, 16            # in_features = 1024
    DIM_MLP, DIM, QUEUE_SIZE = 256, 128, 1024

    root = jax.random.PRNGKey(0)
    k_imq, k_imk, k_params, k_queue = jax.random.split(root, 4)

    im_q = jax.random.normal(k_imq, (B, C, H, W), jnp.float32)
    im_k = jax.random.normal(k_imk, (B, C, H, W), jnp.float32)

    params_q = init_params(k_params, C * H * W, DIM_MLP, DIM)
    params_k = tuple(p.copy() for p in params_q)  # __init__ copies q -> k

    # queue = normalize(randn(dim, queue_size), dim=0), stored transposed with
    # a leading dummy row: queue_state[1 + j] == queue[:, j].
    qraw = jax.random.normal(k_queue, (QUEUE_SIZE, DIM), jnp.float32)
    qraw = qraw / jnp.maximum(
        jnp.sqrt(jnp.sum(qraw * qraw, axis=1, keepdims=True)), 1e-12)
    queue_state = jnp.concatenate([jnp.zeros((1, DIM), jnp.float32), qraw], axis=0)
    queue_ptr = jnp.zeros((1,), jnp.int32)

    logits, labels, new_queue_state, new_params_k, new_ptr = moco_step(
        im_q, im_k, params_q, params_k, queue_state, queue_ptr)
    jax.block_until_ready((logits, labels, new_queue_state, new_params_k, new_ptr))

    assert logits.shape == (B, 1 + QUEUE_SIZE)
    assert labels.shape == (B,)
    assert new_queue_state.shape == (1 + QUEUE_SIZE, DIM)
    assert int(new_ptr[0]) == B % QUEUE_SIZE
    assert bool(jnp.all(jnp.isfinite(logits)))
    # freshly enqueued keys are unit-norm rows
    key_norms = jnp.sqrt(jnp.sum(new_queue_state[1:1 + B] ** 2, axis=1))
    assert bool(jnp.all(jnp.abs(key_norms - 1.0) < 1e-2))
    print("KERNEL_OK")
</pallas_src>

<mosaic_0001>
module attributes {stable_mosaic.version = 11 : i64} {
  func.func @_q_encoder_kernel(%arg0: i32, %arg1: i32, %arg2: memref<8x512xbf16, #tpu.memory_space<vmem>>, %arg3: memref<512x256xf32, #tpu.memory_space<vmem>>, %arg4: memref<1x256xf32, #tpu.memory_space<vmem>>, %arg5: memref<256x256xf32, #tpu.memory_space<vmem>>, %arg6: memref<1x256xf32, #tpu.memory_space<vmem>>, %arg7: memref<256x128xf32, #tpu.memory_space<vmem>>, %arg8: memref<1x128xf32, #tpu.memory_space<vmem>>, %arg9: memref<8x128xf32, #tpu.memory_space<vmem>>, %arg10: memref<8x256xf32, #tpu.memory_space<vmem>>) attributes {dimension_semantics = [#tpu.dimension_semantics<parallel>, #tpu.dimension_semantics<arbitrary>], iteration_bounds = array<i64: 1, 2>, scalar_prefetch = 0 : i64, scratch_operands = 1 : i64, tpu.core_type = #tpu.core_type<tc>, window_params = [{transform_indices = @transform_0, window_bounds = array<i64: 8, 512>}, {transform_indices = @transform_1, window_bounds = array<i64: 512, 256>}, {pipeline_mode = #tpu.pipeline_mode<synchronous>, transform_indices = @transform_2, window_bounds = array<i64: 1, 256>}, {pipeline_mode = #tpu.pipeline_mode<synchronous>, transform_indices = @transform_3, window_bounds = array<i64: 256, 256>}, {pipeline_mode = #tpu.pipeline_mode<synchronous>, transform_indices = @transform_4, window_bounds = array<i64: 1, 256>}, {pipeline_mode = #tpu.pipeline_mode<synchronous>, transform_indices = @transform_5, window_bounds = array<i64: 256, 128>}, {pipeline_mode = #tpu.pipeline_mode<synchronous>, transform_indices = @transform_6, window_bounds = array<i64: 1, 128>}, {transform_indices = @transform_7, window_bounds = array<i64: 8, 128>}]} {
    %c0_i32 = arith.constant 0 : i32
    %0 = arith.cmpi eq, %arg1, %c0_i32 : i32
    %1 = arith.extui %0 : i1 to i32
    %c0_i32_0 = arith.constant 0 : i32
    %2 = arith.cmpi ne, %1, %c0_i32_0 : i32
    scf.if %2 {
      %cst_9 = arith.constant 0.000000e+00 : f32
      %13 = vector.broadcast %cst_9 : f32 to vector<8x256xf32>
      %c0_10 = arith.constant 0 : index
      %c0_11 = arith.constant 0 : index
      %14 = vector.load %arg10[%c0_10, %c0_11] : memref<8x256xf32, #tpu.memory_space<vmem>>, vector<8x256xf32>
      tpu.vector_store %arg10[%c0_10, %c0_11], %13 {strides = array<i32>} : memref<8x256xf32, #tpu.memory_space<vmem>>, vector<8x256xf32>,
    } else {
    }
    %c0 = arith.constant 0 : index
    %c0_1 = arith.constant 0 : index
    %3 = vector.load %arg10[%c0, %c0_1] : memref<8x256xf32, #tpu.memory_space<vmem>>, vector<8x256xf32>
    %c0_2 = arith.constant 0 : index
    %c0_3 = arith.constant 0 : index
    %4 = vector.load %arg2[%c0_2, %c0_3] : memref<8x512xbf16, #tpu.memory_space<vmem>>, vector<8x512xbf16>
    %c0_4 = arith.constant 0 : index
    %c0_5 = arith.constant 0 : index
    %5 = vector.load %arg3[%c0_4, %c0_5] : memref<512x256xf32, #tpu.memory_space<vmem>>, vector<512x256xf32>
    %6 = arith.truncf %5 : vector<512x256xf32> to vector<512x256xbf16>
    %cst = arith.constant dense<0.000000e+00> : vector<8x256xf32>
    %7 = tpu.matmul %4, %6, %cst {dimension_numbers = #tpu.dot_dimension_numbers<[1], [0], [0], [1], [0, 0, 1, 1], [], []>} : vector<8x512xbf16>, vector<512x256xbf16>, vector<8x256xf32> -> vector<8x256xf32>
    %8 = arith.addf %3, %7 : vector<8x256xf32>
    %c0_6 = arith.constant 0 : index
    %c0_7 = arith.constant 0 : index
    %9 = vector.load %arg10[%c0_6, %c0_7] : memref<8x256xf32, #tpu.memory_space<vmem>>, vector<8x256xf32>
    tpu.vector_store %arg10[%c0_6, %c0_7], %8 {strides = array<i32>} : memref<8x256xf32, #tpu.memory_space<vmem>>, vector<8x256xf32>,
    %c1_i32 = arith.constant 1 : i32
    %10 = arith.cmpi eq, %arg1, %c1_i32 : i32
    %11 = arith.extui %10 : i1 to i32
    %c0_i32_8 = arith.constant 0 : i32
    %12 = arith.cmpi ne, %11, %c0_i32_8 : i32
    scf.if %12 {
      %c0_9 = arith.constant 0 : index
      %c0_10 = arith.constant 0 : index
      %13 = vector.load %arg10[%c0_9, %c0_10] : memref<8x256xf32, #tpu.memory_space<vmem>>, vector<8x256xf32>
      %c0_11 = arith.constant 0 : index
      %c0_12 = arith.constant 0 : index
      %14 = vector.load %arg4[%c0_11, %c0_12] : memref<1x256xf32, #tpu.memory_space<vmem>>, vector<1x256xf32>
      %c0_13 = arith.constant 0 : index
      %c0_14 = arith.constant 0 : index
      %15 = vector.load %arg5[%c0_13, %c0_14] : memref<256x256xf32, #tpu.memory_space<vmem>>, vector<256x256xf32>
      %c0_15 = arith.constant 0 : index
      %c0_16 = arith.constant 0 : index
      %16 = vector.load %arg6[%c0_15, %c0_16] : memref<1x256xf32, #tpu.memory_space<vmem>>, vector<1x256xf32>
      %c0_17 = arith.constant 0 : index
      %c0_18 = arith.constant 0 : index
      %17 = vector.load %arg7[%c0_17, %c0_18] : memref<256x128xf32, #tpu.memory_space<vmem>>, vector<256x128xf32>
      %c0_19 = arith.constant 0 : index
      %c0_20 = arith.constant 0 : index
      %18 = vector.load %arg8[%c0_19, %c0_20] : memref<1x128xf32, #tpu.memory_space<vmem>>, vector<1x128xf32>
      %19 = vector.broadcast %14 : vector<1x256xf32> to vector<8x256xf32>
      %20 = arith.addf %13, %19 : vector<8x256xf32>
      %cst_21 = arith.constant 0.000000e+00 : f32
      %21 = vector.broadcast %cst_21 : f32 to vector<8x256xf32>
      %22 = arith.maximumf %20, %21 : vector<8x256xf32>
      %23 = arith.truncf %22 : vector<8x256xf32> to vector<8x256xbf16>
      %24 = arith.truncf %15 : vector<256x256xf32> to vector<256x256xbf16>
      %cst_22 = arith.constant dense<0.000000e+00> : vector<8x256xf32>
      %25 = tpu.matmul %23, %24, %cst_22 {dimension_numbers = #tpu.dot_dimension_numbers<[1], [0], [0], [1], [0, 0, 1, 1], [], []>} : vector<8x256xbf16>, vector<256x256xbf16>, vector<8x256xf32> -> vector<8x256xf32>
      %26 = vector.broadcast %16 : vector<1x256xf32> to vector<8x256xf32>
      %27 = arith.addf %25, %26 : vector<8x256xf32>
      %cst_23 = arith.constant 0.000000e+00 : f32
      %28 = vector.broadcast %cst_23 : f32 to vector<8x256xf32>
      %29 = arith.maximumf %27, %28 : vector<8x256xf32>
      %30 = arith.truncf %29 : vector<8x256xf32> to vector<8x256xbf16>
      %31 = arith.truncf %17 : vector<256x128xf32> to vector<256x128xbf16>
      %cst_24 = arith.constant dense<0.000000e+00> : vector<8x128xf32>
      %32 = tpu.matmul %30, %31, %cst_24 {dimension_numbers = #tpu.dot_dimension_numbers<[1], [0], [0], [1], [0, 0, 1, 1], [], []>} : vector<8x256xbf16>, vector<256x128xbf16>, vector<8x128xf32> -> vector<8x128xf32>
      %33 = vector.broadcast %18 : vector<1x128xf32> to vector<8x128xf32>
      %34 = arith.addf %32, %33 : vector<8x128xf32>
      %35 = arith.mulf %34, %34 : vector<8x128xf32>
      %cst_25 = arith.constant dense<0.000000e+00> : vector<8xf32>
      %36 = vector.multi_reduction <add>, %35, %cst_25 [1] : vector<8x128xf32> to vector<8xf32>
      %37 = vector.shape_cast %36 : vector<8xf32> to vector<8x1xf32>
      %cst_26 = arith.constant 1.000000e-24 : f32
      %38 = vector.broadcast %cst_26 : f32 to vector<8x1xf32>
      %39 = arith.maximumf %37, %38 : vector<8x1xf32>
      %40 = math.rsqrt %39 : vector<8x1xf32>
      %41 = vector.broadcast %40 : vector<8x1xf32> to vector<8x128xf32>
      %42 = arith.mulf %34, %41 : vector<8x128xf32>
      %c0_27 = arith.constant 0 : index
      %c0_28 = arith.constant 0 : index
      %43 = vector.load %arg9[%c0_27, %c0_28] : memref<8x128xf32, #tpu.memory_space<vmem>>, vector<8x128xf32>
      tpu.vector_store %arg9[%c0_27, %c0_28], %42 {strides = array<i32>} : memref<8x128xf32, #tpu.memory_space<vmem>>, vector<8x128xf32>,
    } else {
    }
    return
  }
  func.func @transform_0(%arg0: i32, %arg1: i32) -> (i32, i32) {
    %c0_i32 = arith.constant 0 : i32
    return %arg0, %arg1 : i32, i32
  }
  func.func @transform_1(%arg0: i32, %arg1: i32) -> (i32, i32) {
    %c0_i32 = arith.constant 0 : i32
    %c0_i32_0 = arith.constant 0 : i32
    return %arg1, %c0_i32 : i32, i32
  }
  func.func @transform_2(%arg0: i32, %arg1: i32) -> (i32, i32) {
    %c0_i32 = arith.constant 0 : i32
    %c0_i32_0 = arith.constant 0 : i32
    %c0_i32_1 = arith.constant 0 : i32
    return %c0_i32, %c0_i32_0 : i32, i32
  }
  func.func @transform_3(%arg0: i32, %arg1: i32) -> (i32, i32) {
    %c0_i32 = arith.constant 0 : i32
    %c0_i32_0 = arith.constant 0 : i32
    %c0_i32_1 = arith.constant 0 : i32
    return %c0_i32, %c0_i32_0 : i32, i32
  }
  func.func @transform_4(%arg0: i32, %arg1: i32) -> (i32, i32) {
    %c0_i32 = arith.constant 0 : i32
    %c0_i32_0 = arith.constant 0 : i32
    %c0_i32_1 = arith.constant 0 : i32
    return %c0_i32, %c0_i32_0 : i32, i32
  }
  func.func @transform_5(%arg0: i32, %arg1: i32) -> (i32, i32) {
    %c0_i32 = arith.constant 0 : i32
    %c0_i32_0 = arith.constant 0 : i32
    %c0_i32_1 = arith.constant 0 : i32
    return %c0_i32, %c0_i32_0 : i32, i32
  }
  func.func @transform_6(%arg0: i32, %arg1: i32) -> (i32, i32) {
    %c0_i32 = arith.constant 0 : i32
    %c0_i32_0 = arith.constant 0 : i32
    %c0_i32_1 = arith.constant 0 : i32
    return %c0_i32, %c0_i32_0 : i32, i32
  }
  func.func @transform_7(%arg0: i32, %arg1: i32) -> (i32, i32) {
    %c0_i32 = arith.constant 0 : i32
    %c0_i32_0 = arith.constant 0 : i32
    return %arg0, %c0_i32 : i32, i32
  }
}

module attributes {stable_mosaic.version = 11 : i64} {
  func.func @_k_encoder_kernel(%arg0: i32, %arg1: memref<8x512xbf16, #tpu.memory_space<vmem>>, %arg2: memref<512x256xf32, #tpu.memory_space<vmem>>, %arg3: memref<512x256xf32, #tpu.memory_space<vmem>>, %arg4: memref<1x256xf32, #tpu.memory_space<vmem>>, %arg5: memref<1x256xf32, #tpu.memory_space<vmem>>, %arg6: memref<256x256xf32, #tpu.memory_space<vmem>>, %arg7: memref<256x256xf32, #tpu.memory_space<vmem>>, %arg8: memref<1x256xf32, #tpu.memory_space<vmem>>, %arg9: memref<1x256xf32, #tpu.memory_space<vmem>>, %arg10: memref<256x128xf32, #tpu.memory_space<vmem>>, %arg11: memref<256x128xf32, #tpu.memory_space<vmem>>, %arg12: memref<1x128xf32, #tpu.memory_space<vmem>>, %arg13: memref<1x128xf32, #tpu.memory_space<vmem>>, %arg14: memref<8x128xf32, #tpu.memory_space<vmem>>, %arg15: memref<512x256xf32, #tpu.memory_space<vmem>>, %arg16: memref<1x256xf32, #tpu.memory_space<vmem>>, %arg17: memref<256x256xf32, #tpu.memory_space<vmem>>, %arg18: memref<1x256xf32, #tpu.memory_space<vmem>>, %arg19: memref<256x128xf32, #tpu.memory_space<vmem>>, %arg20: memref<1x128xf32, #tpu.memory_space<vmem>>, %arg21: memref<8x256xf32, #tpu.memory_space<vmem>>) attributes {dimension_semantics = [#tpu.dimension_semantics<arbitrary>], iteration_bounds = array<i64: 2>, scalar_prefetch = 0 : i64, scratch_operands = 1 : i64, tpu.core_type = #tpu.core_type<tc>, window_params = [{transform_indices = @transform_0, window_bounds = array<i64: 8, 512>}, {transform_indices = @transform_1, window_bounds = array<i64: 512, 256>}, {transform_indices = @transform_2, window_bounds = array<i64: 512, 256>}, {pipeline_mode = #tpu.pipeline_mode<synchronous>, transform_indices = @transform_3, window_bounds = array<i64: 1, 256>}, {pipeline_mode = #tpu.pipeline_mode<synchronous>, transform_indices = @transform_4, window_bounds = array<i64: 1, 256>}, {pipeline_mode = #tpu.pipeline_mode<synchronous>, transform_indices = @transform_5, window_bounds = array<i64: 256, 256>}, {pipeline_mode = #tpu.pipeline_mode<synchronous>, transform_indices = @transform_6, window_bounds = array<i64: 256, 256>}, {pipeline_mode = #tpu.pipeline_mode<synchronous>, transform_indices = @transform_7, window_bounds = array<i64: 1, 256>}, {pipeline_mode = #tpu.pipeline_mode<synchronous>, transform_indices = @transform_8, window_bounds = array<i64: 1, 256>}, {pipeline_mode = #tpu.pipeline_mode<synchronous>, transform_indices = @transform_9, window_bounds = array<i64: 256, 128>}, {pipeline_mode = #tpu.pipeline_mode<synchronous>, transform_indices = @transform_10, window_bounds = array<i64: 256, 128>}, {pipeline_mode = #tpu.pipeline_mode<synchronous>, transform_indices = @transform_11, window_bounds = array<i64: 1, 128>}, {pipeline_mode = #tpu.pipeline_mode<synchronous>, transform_indices = @transform_12, window_bounds = array<i64: 1, 128>}, {pipeline_mode = #tpu.pipeline_mode<synchronous>, transform_indices = @transform_13, window_bounds = array<i64: 8, 128>}, {transform_indices = @transform_14, window_bounds = array<i64: 512, 256>}, {pipeline_mode = #tpu.pipeline_mode<synchronous>, transform_indices = @transform_15, window_bounds = array<i64: 1, 256>}, {pipeline_mode = #tpu.pipeline_mode<synchronous>, transform_indices = @transform_16, window_bounds = array<i64: 256, 256>}, {pipeline_mode = #tpu.pipeline_mode<synchronous>, transform_indices = @transform_17, window_bounds = array<i64: 1, 256>}, {pipeline_mode = #tpu.pipeline_mode<synchronous>, transform_indices = @transform_18, window_bounds = array<i64: 256, 128>}, {pipeline_mode = #tpu.pipeline_mode<synchronous>, transform_indices = @transform_19, window_bounds = array<i64: 1, 128>}]} {
    %c0 = arith.constant 0 : index
    %c0_0 = arith.constant 0 : index
    %0 = vector.load %arg3[%c0, %c0_0] : memref<512x256xf32, #tpu.memory_space<vmem>>, vector<512x256xf32>
    %cst = arith.constant 9.990000e-01 : f32
    %1 = vector.broadcast %cst : f32 to vector<512x256xf32>
    %2 = arith.mulf %0, %1 : vector<512x256xf32>
    %c0_1 = arith.constant 0 : index
    %c0_2 = arith.constant 0 : index
    %3 = vector.load %arg2[%c0_1, %c0_2] : memref<512x256xf32, #tpu.memory_space<vmem>>, vector<512x256xf32>
    %cst_3 = arith.constant 1.000000e-03 : f32
    %4 = vector.broadcast %cst_3 : f32 to vector<512x256xf32>
    %5 = arith.mulf %3, %4 : vector<512x256xf32>
    %6 = arith.addf %2, %5 : vector<512x256xf32>
    %c0_4 = arith.constant 0 : index
    %c0_5 = arith.constant 0 : index
    %7 = vector.load %arg15[%c0_4, %c0_5] : memref<512x256xf32, #tpu.memory_space<vmem>>, vector<512x256xf32>
    tpu.vector_store %arg15[%c0_4, %c0_5], %6 {strides = array<i32>} : memref<512x256xf32, #tpu.memory_space<vmem>>, vector<512x256xf32>,
    %c0_i32 = arith.constant 0 : i32
    %8 = arith.cmpi eq, %arg0, %c0_i32 : i32
    %9 = arith.extui %8 : i1 to i32
    %c0_i32_6 = arith.constant 0 : i32
    %10 = arith.cmpi ne, %9, %c0_i32_6 : i32
    scf.if %10 {
      %cst_15 = arith.constant 0.000000e+00 : f32
      %20 = vector.broadcast %cst_15 : f32 to vector<8x256xf32>
      %c0_16 = arith.constant 0 : index
      %c0_17 = arith.constant 0 : index
      %21 = vector.load %arg21[%c0_16, %c0_17] : memref<8x256xf32, #tpu.memory_space<vmem>>, vector<8x256xf32>
      tpu.vector_store %arg21[%c0_16, %c0_17], %20 {strides = array<i32>} : memref<8x256xf32, #tpu.memory_space<vmem>>, vector<8x256xf32>,
    } else {
    }
    %c0_7 = arith.constant 0 : index
    %c0_8 = arith.constant 0 : index
    %11 = vector.load %arg21[%c0_7, %c0_8] : memref<8x256xf32, #tpu.memory_space<vmem>>, vector<8x256xf32>
    %c0_9 = arith.constant 0 : index
    %c0_10 = arith.constant 0 : index
    %12 = vector.load %arg1[%c0_9, %c0_10] : memref<8x512xbf16, #tpu.memory_space<vmem>>, vector<8x512xbf16>
    %13 = arith.truncf %6 : vector<512x256xf32> to vector<512x256xbf16>
    %cst_11 = arith.constant dense<0.000000e+00> : vector<8x256xf32>
    %14 = tpu.matmul %12, %13, %cst_11 {dimension_numbers = #tpu.dot_dimension_numbers<[1], [0], [0], [1], [0, 0, 1, 1], [], []>} : vector<8x512xbf16>, vector<512x256xbf16>, vector<8x256xf32> -> vector<8x256xf32>
    %15 = arith.addf %11, %14 : vector<8x256xf32>
    %c0_12 = arith.constant 0 : index
    %c0_13 = arith.constant 0 : index
    %16 = vector.load %arg21[%c0_12, %c0_13] : memref<8x256xf32, #tpu.memory_space<vmem>>, vector<8x256xf32>
    tpu.vector_store %arg21[%c0_12, %c0_13], %15 {strides = array<i32>} : memref<8x256xf32, #tpu.memory_space<vmem>>, vector<8x256xf32>,
    %c1_i32 = arith.constant 1 : i32
    %17 = arith.cmpi eq, %arg0, %c1_i32 : i32
    %18 = arith.extui %17 : i1 to i32
    %c0_i32_14 = arith.constant 0 : i32
    %19 = arith.cmpi ne, %18, %c0_i32_14 : i32
    scf.if %19 {
      %c0_15 = arith.constant 0 : index
      %c0_16 = arith.constant 0 : index
      %20 = vector.load %arg5[%c0_15, %c0_16] : memref<1x256xf32, #tpu.memory_space<vmem>>, vector<1x256xf32>
      %cst_17 = arith.constant 9.990000e-01 : f32
      %21 = vector.broadcast %cst_17 : f32 to vector<1x256xf32>
      %22 = arith.mulf %20, %21 : vector<1x256xf32>
      %c0_18 = arith.constant 0 : index
      %c0_19 = arith.constant 0 : index
      %23 = vector.load %arg4[%c0_18, %c0_19] : memref<1x256xf32, #tpu.memory_space<vmem>>, vector<1x256xf32>
      %cst_20 = arith.constant 1.000000e-03 : f32
      %24 = vector.broadcast %cst_20 : f32 to vector<1x256xf32>
      %25 = arith.mulf %23, %24 : vector<1x256xf32>
      %26 = arith.addf %22, %25 : vector<1x256xf32>
      %c0_21 = arith.constant 0 : index
      %c0_22 = arith.constant 0 : index
      %27 = vector.load %arg7[%c0_21, %c0_22] : memref<256x256xf32, #tpu.memory_space<vmem>>, vector<256x256xf32>
      %cst_23 = arith.constant 9.990000e-01 : f32
      %28 = vector.broadcast %cst_23 : f32 to vector<256x256xf32>
      %29 = arith.mulf %27, %28 : vector<256x256xf32>
      %c0_24 = arith.constant 0 : index
      %c0_25 = arith.constant 0 : index
      %30 = vector.load %arg6[%c0_24, %c0_25] : memref<256x256xf32, #tpu.memory_space<vmem>>, vector<256x256xf32>
      %cst_26 = arith.constant 1.000000e-03 : f32
      %31 = vector.broadcast %cst_26 : f32 to vector<256x256xf32>
      %32 = arith.mulf %30, %31 : vector<256x256xf32>
      %33 = arith.addf %29, %32 : vector<256x256xf32>
      %c0_27 = arith.constant 0 : index
      %c0_28 = arith.constant 0 : index
      %34 = vector.load %arg9[%c0_27, %c0_28] : memref<1x256xf32, #tpu.memory_space<vmem>>, vector<1x256xf32>
      %cst_29 = arith.constant 9.990000e-01 : f32
      %35 = vector.broadcast %cst_29 : f32 to vector<1x256xf32>
      %36 = arith.mulf %34, %35 : vector<1x256xf32>
      %c0_30 = arith.constant 0 : index
      %c0_31 = arith.constant 0 : index
      %37 = vector.load %arg8[%c0_30, %c0_31] : memref<1x256xf32, #tpu.memory_space<vmem>>, vector<1x256xf32>
      %cst_32 = arith.constant 1.000000e-03 : f32
      %38 = vector.broadcast %cst_32 : f32 to vector<1x256xf32>
      %39 = arith.mulf %37, %38 : vector<1x256xf32>
      %40 = arith.addf %36, %39 : vector<1x256xf32>
      %c0_33 = arith.constant 0 : index
      %c0_34 = arith.constant 0 : index
      %41 = vector.load %arg11[%c0_33, %c0_34] : memref<256x128xf32, #tpu.memory_space<vmem>>, vector<256x128xf32>
      %cst_35 = arith.constant 9.990000e-01 : f32
      %42 = vector.broadcast %cst_35 : f32 to vector<256x128xf32>
      %43 = arith.mulf %41, %42 : vector<256x128xf32>
      %c0_36 = arith.constant 0 : index
      %c0_37 = arith.constant 0 : index
      %44 = vector.load %arg10[%c0_36, %c0_37] : memref<256x128xf32, #tpu.memory_space<vmem>>, vector<256x128xf32>
      %cst_38 = arith.constant 1.000000e-03 : f32
      %45 = vector.broadcast %cst_38 : f32 to vector<256x128xf32>
      %46 = arith.mulf %44, %45 : vector<256x128xf32>
      %47 = arith.addf %43, %46 : vector<256x128xf32>
      %c0_39 = arith.constant 0 : index
      %c0_40 = arith.constant 0 : index
      %48 = vector.load %arg13[%c0_39, %c0_40] : memref<1x128xf32, #tpu.memory_space<vmem>>, vector<1x128xf32>
      %cst_41 = arith.constant 9.990000e-01 : f32
      %49 = vector.broadcast %cst_41 : f32 to vector<1x128xf32>
      %50 = arith.mulf %48, %49 : vector<1x128xf32>
      %c0_42 = arith.constant 0 : index
      %c0_43 = arith.constant 0 : index
      %51 = vector.load %arg12[%c0_42, %c0_43] : memref<1x128xf32, #tpu.memory_space<vmem>>, vector<1x128xf32>
      %cst_44 = arith.constant 1.000000e-03 : f32
      %52 = vector.broadcast %cst_44 : f32 to vector<1x128xf32>
      %53 = arith.mulf %51, %52 : vector<1x128xf32>
      %54 = arith.addf %50, %53 : vector<1x128xf32>
      %c0_45 = arith.constant 0 : index
      %c0_46 = arith.constant 0 : index
      %55 = vector.load %arg16[%c0_45, %c0_46] : memref<1x256xf32, #tpu.memory_space<vmem>>, vector<1x256xf32>
      tpu.vector_store %arg16[%c0_45, %c0_46], %26 {strides = array<i32>} : memref<1x256xf32, #tpu.memory_space<vmem>>, vector<1x256xf32>,
      %c0_47 = arith.constant 0 : index
      %c0_48 = arith.constant 0 : index
      %56 = vector.load %arg17[%c0_47, %c0_48] : memref<256x256xf32, #tpu.memory_space<vmem>>, vector<256x256xf32>
      tpu.vector_store %arg17[%c0_47, %c0_48], %33 {strides = array<i32>} : memref<256x256xf32, #tpu.memory_space<vmem>>, vector<256x256xf32>,
      %c0_49 = arith.constant 0 : index
      %c0_50 = arith.constant 0 : index
      %57 = vector.load %arg18[%c0_49, %c0_50] : memref<1x256xf32, #tpu.memory_space<vmem>>, vector<1x256xf32>
      tpu.vector_store %arg18[%c0_49, %c0_50], %40 {strides = array<i32>} : memref<1x256xf32, #tpu.memory_space<vmem>>, vector<1x256xf32>,
      %c0_51 = arith.constant 0 : index
      %c0_52 = arith.constant 0 : index
      %58 = vector.load %arg19[%c0_51, %c0_52] : memref<256x128xf32, #tpu.memory_space<vmem>>, vector<256x128xf32>
      tpu.vector_store %arg19[%c0_51, %c0_52], %47 {strides = array<i32>} : memref<256x128xf32, #tpu.memory_space<vmem>>, vector<256x128xf32>,
      %c0_53 = arith.constant 0 : index
      %c0_54 = arith.constant 0 : index
      %59 = vector.load %arg20[%c0_53, %c0_54] : memref<1x128xf32, #tpu.memory_space<vmem>>, vector<1x128xf32>
      tpu.vector_store %arg20[%c0_53, %c0_54], %54 {strides = array<i32>} : memref<1x128xf32, #tpu.memory_space<vmem>>, vector<1x128xf32>,
      %c0_55 = arith.constant 0 : index
      %c0_56 = arith.constant 0 : index
      %60 = vector.load %arg21[%c0_55, %c0_56] : memref<8x256xf32, #tpu.memory_space<vmem>>, vector<8x256xf32>
      %61 = vector.broadcast %26 : vector<1x256xf32> to vector<8x256xf32>
      %62 = arith.addf %60, %61 : vector<8x256xf32>
      %cst_57 = arith.constant 0.000000e+00 : f32
      %63 = vector.broadcast %cst_57 : f32 to vector<8x256xf32>
      %64 = arith.maximumf %62, %63 : vector<8x256xf32>
      %65 = arith.truncf %64 : vector<8x256xf32> to vector<8x256xbf16>
      %66 = arith.truncf %33 : vector<256x256xf32> to vector<256x256xbf16>
      %cst_58 = arith.constant dense<0.000000e+00> : vector<8x256xf32>
      %67 = tpu.matmul %65, %66, %cst_58 {dimension_numbers = #tpu.dot_dimension_numbers<[1], [0], [0], [1], [0, 0, 1, 1], [], []>} : vector<8x256xbf16>, vector<256x256xbf16>, vector<8x256xf32> -> vector<8x256xf32>
      %68 = vector.broadcast %40 : vector<1x256xf32> to vector<8x256xf32>
      %69 = arith.addf %67, %68 : vector<8x256xf32>
      %cst_59 = arith.constant 0.000000e+00 : f32
      %70 = vector.broadcast %cst_59 : f32 to vector<8x256xf32>
      %71 = arith.maximumf %69, %70 : vector<8x256xf32>
      %72 = arith.truncf %71 : vector<8x256xf32> to vector<8x256xbf16>
      %73 = arith.truncf %47 : vector<256x128xf32> to vector<256x128xbf16>
      %cst_60 = arith.constant dense<0.000000e+00> : vector<8x128xf32>
      %74 = tpu.matmul %72, %73, %cst_60 {dimension_numbers = #tpu.dot_dimension_numbers<[1], [0], [0], [1], [0, 0, 1, 1], [], []>} : vector<8x256xbf16>, vector<256x128xbf16>, vector<8x128xf32> -> vector<8x128xf32>
      %75 = vector.broadcast %54 : vector<1x128xf32> to vector<8x128xf32>
      %76 = arith.addf %74, %75 : vector<8x128xf32>
      %77 = arith.mulf %76, %76 : vector<8x128xf32>
      %cst_61 = arith.constant dense<0.000000e+00> : vector<8xf32>
      %78 = vector.multi_reduction <add>, %77, %cst_61 [1] : vector<8x128xf32> to vector<8xf32>
      %79 = vector.shape_cast %78 : vector<8xf32> to vector<8x1xf32>
      %cst_62 = arith.constant 1.000000e-24 : f32
      %80 = vector.broadcast %cst_62 : f32 to vector<8x1xf32>
      %81 = arith.maximumf %79, %80 : vector<8x1xf32>
      %82 = math.rsqrt %81 : vector<8x1xf32>
      %83 = vector.broadcast %82 : vector<8x1xf32> to vector<8x128xf32>
      %84 = arith.mulf %76, %83 : vector<8x128xf32>
      %c0_63 = arith.constant 0 : index
      %c0_64 = arith.constant 0 : index
      %85 = vector.load %arg14[%c0_63, %c0_64] : memref<8x128xf32, #tpu.memory_space<vmem>>, vector<8x128xf32>
      tpu.vector_store %arg14[%c0_63, %c0_64], %84 {strides = array<i32>} : memref<8x128xf32, #tpu.memory_space<vmem>>, vector<8x128xf32>,
    } else {
    }
    return
  }
  func.func @transform_0(%arg0: i32) -> (i32, i32) {
    %c0_i32 = arith.constant 0 : i32
    %c0_i32_0 = arith.constant 0 : i32
    return %c0_i32, %arg0 : i32, i32
  }
  func.func @transform_1(%arg0: i32) -> (i32, i32) {
    %c0_i32 = arith.constant 0 : i32
    %c0_i32_0 = arith.constant 0 : i32
    return %arg0, %c0_i32 : i32, i32
  }
  func.func @transform_2(%arg0: i32) -> (i32, i32) {
    %c0_i32 = arith.constant 0 : i32
    %c0_i32_0 = arith.constant 0 : i32
    return %arg0, %c0_i32 : i32, i32
  }
  func.func @transform_3(%arg0: i32) -> (i32, i32) {
    %c0_i32 = arith.constant 0 : i32
    %c0_i32_0 = arith.constant 0 : i32
    %c0_i32_1 = arith.constant 0 : i32
    return %c0_i32, %c0_i32_0 : i32, i32
  }
  func.func @transform_4(%arg0: i32) -> (i32, i32) {
    %c0_i32 = arith.constant 0 : i32
    %c0_i32_0 = arith.constant 0 : i32
    %c0_i32_1 = arith.constant 0 : i32
    return %c0_i32, %c0_i32_0 : i32, i32
  }
  func.func @transform_5(%arg0: i32) -> (i32, i32) {
    %c0_i32 = arith.constant 0 : i32
    %c0_i32_0 = arith.constant 0 : i32
    %c0_i32_1 = arith.constant 0 : i32
    return %c0_i32, %c0_i32_0 : i32, i32
  }
  func.func @transform_6(%arg0: i32) -> (i32, i32) {
    %c0_i32 = arith.constant 0 : i32
    %c0_i32_0 = arith.constant 0 : i32
    %c0_i32_1 = arith.constant 0 : i32
    return %c0_i32, %c0_i32_0 : i32, i32
  }
  func.func @transform_7(%arg0: i32) -> (i32, i32) {
    %c0_i32 = arith.constant 0 : i32
    %c0_i32_0 = arith.constant 0 : i32
    %c0_i32_1 = arith.constant 0 : i32
    return %c0_i32, %c0_i32_0 : i32, i32
  }
  func.func @transform_8(%arg0: i32) -> (i32, i32) {
    %c0_i32 = arith.constant 0 : i32
    %c0_i32_0 = arith.constant 0 : i32
    %c0_i32_1 = arith.constant 0 : i32
    return %c0_i32, %c0_i32_0 : i32, i32
  }
  func.func @transform_9(%arg0: i32) -> (i32, i32) {
    %c0_i32 = arith.constant 0 : i32
    %c0_i32_0 = arith.constant 0 : i32
    %c0_i32_1 = arith.constant 0 : i32
    return %c0_i32, %c0_i32_0 : i32, i32
  }
  func.func @transform_10(%arg0: i32) -> (i32, i32) {
    %c0_i32 = arith.constant 0 : i32
    %c0_i32_0 = arith.constant 0 : i32
    %c0_i32_1 = arith.constant 0 : i32
    return %c0_i32, %c0_i32_0 : i32, i32
  }
  func.func @transform_11(%arg0: i32) -> (i32, i32) {
    %c0_i32 = arith.constant 0 : i32
    %c0_i32_0 = arith.constant 0 : i32
    %c0_i32_1 = arith.constant 0 : i32
    return %c0_i32, %c0_i32_0 : i32, i32
  }
  func.func @transform_12(%arg0: i32) -> (i32, i32) {
    %c0_i32 = arith.constant 0 : i32
    %c0_i32_0 = arith.constant 0 : i32
    %c0_i32_1 = arith.constant 0 : i32
    return %c0_i32, %c0_i32_0 : i32, i32
  }
  func.func @transform_13(%arg0: i32) -> (i32, i32) {
    %c0_i32 = arith.constant 0 : i32
    %c0_i32_0 = arith.constant 0 : i32
    %c0_i32_1 = arith.constant 0 : i32
    return %c0_i32, %c0_i32_0 : i32, i32
  }
  func.func @transform_14(%arg0: i32) -> (i32, i32) {
    %c0_i32 = arith.constant 0 : i32
    %c0_i32_0 = arith.constant 0 : i32
    return %arg0, %c0_i32 : i32, i32
  }
  func.func @transform_15(%arg0: i32) -> (i32, i32) {
    %c0_i32 = arith.constant 0 : i32
    %c0_i32_0 = arith.constant 0 : i32
    %c0_i32_1 = arith.constant 0 : i32
    return %c0_i32, %c0_i32_0 : i32, i32
  }
  func.func @transform_16(%arg0: i32) -> (i32, i32) {
    %c0_i32 = arith.constant 0 : i32
    %c0_i32_0 = arith.constant 0 : i32
    %c0_i32_1 = arith.constant 0 : i32
    return %c0_i32, %c0_i32_0 : i32, i32
  }
  func.func @transform_17(%arg0: i32) -> (i32, i32) {
    %c0_i32 = arith.constant 0 : i32
    %c0_i32_0 = arith.constant 0 : i32
    %c0_i32_1 = arith.constant 0 : i32
    return %c0_i32, %c0_i32_0 : i32, i32
  }
  func.func @transform_18(%arg0: i32) -> (i32, i32) {
    %c0_i32 = arith.constant 0 : i32
    %c0_i32_0 = arith.constant 0 : i32
    %c0_i32_1 = arith.constant 0 : i32
    return %c0_i32, %c0_i32_0 : i32, i32
  }
  func.func @transform_19(%arg0: i32) -> (i32, i32) {
    %c0_i32 = arith.constant 0 : i32
    %c0_i32_0 = arith.constant 0 : i32
    %c0_i32_1 = arith.constant 0 : i32
    return %c0_i32, %c0_i32_0 : i32, i32
  }
}

module attributes {stable_mosaic.version = 11 : i64} {
  func.func @_moco_head_kernel(%arg0: i32, %arg1: memref<8x128xf32, #tpu.memory_space<vmem>>, %arg2: memref<8x128xf32, #tpu.memory_space<vmem>>, %arg3: memref<1025x128xf32, #tpu.memory_space<vmem>>, %arg4: memref<8x1025xf32, #tpu.memory_space<vmem>>) attributes {dimension_semantics = [#tpu.dimension_semantics<arbitrary>], iteration_bounds = array<i64: 1>, scalar_prefetch = 0 : i64, scratch_operands = 0 : i64, tpu.core_type = #tpu.core_type<tc>, window_params = [{pipeline_mode = #tpu.pipeline_mode<synchronous>, transform_indices = @transform_0, window_bounds = array<i64: 8, 128>}, {pipeline_mode = #tpu.pipeline_mode<synchronous>, transform_indices = @transform_1, window_bounds = array<i64: 8, 128>}, {pipeline_mode = #tpu.pipeline_mode<synchronous>, transform_indices = @transform_2, window_bounds = array<i64: 1025, 128>}, {pipeline_mode = #tpu.pipeline_mode<synchronous>, transform_indices = @transform_3, window_bounds = array<i64: 8, 1025>}]} {
    %c0 = arith.constant 0 : index
    %c0_0 = arith.constant 0 : index
    %0 = vector.load %arg1[%c0, %c0_0] : memref<8x128xf32, #tpu.memory_space<vmem>>, vector<8x128xf32>
    %c0_1 = arith.constant 0 : index
    %c0_2 = arith.constant 0 : index
    %1 = vector.load %arg2[%c0_1, %c0_2] : memref<8x128xf32, #tpu.memory_space<vmem>>, vector<8x128xf32>
    %2 = arith.mulf %0, %1 : vector<8x128xf32>
    %cst = arith.constant dense<0.000000e+00> : vector<8xf32>
    %3 = vector.multi_reduction <add>, %2, %cst [1] : vector<8x128xf32> to vector<8xf32>
    %4 = vector.shape_cast %3 : vector<8xf32> to vector<8x1xf32>
    %5 = arith.truncf %0 : vector<8x128xf32> to vector<8x128xbf16>
    %c0_3 = arith.constant 0 : index
    %c0_4 = arith.constant 0 : index
    %6 = vector.load %arg3[%c0_3, %c0_4] : memref<1025x128xf32, #tpu.memory_space<vmem>>, vector<1025x128xf32>
    %7 = arith.truncf %6 : vector<1025x128xf32> to vector<1025x128xbf16>
    %cst_5 = arith.constant dense<0.000000e+00> : vector<8x1025xf32>
    %8 = tpu.matmul %5, %7, %cst_5 {dimension_numbers = #tpu.dot_dimension_numbers<[1], [1], [0], [0], [0, 0, 1, 0], [], []>} : vector<8x128xbf16>, vector<1025x128xbf16>, vector<8x1025xf32> -> vector<8x1025xf32>
    %9 = tpu.iota {dimensions = array<i32: 1>} : vector<8x1025xi32>
    %10 = vector.shape_cast %4 : vector<8x1xf32> to vector<8x1xf32>
    %11 = vector.broadcast %10 : vector<8x1xf32> to vector<8x1025xf32>
    %c0_i32 = arith.constant 0 : i32
    %12 = vector.broadcast %c0_i32 : i32 to vector<8x1025xi32>
    %13 = arith.cmpi eq, %9, %12 : vector<8x1025xi32>
    %14 = arith.select %13, %11, %8 : vector<8x1025xi1>, vector<8x1025xf32>
    %cst_6 = arith.constant 14.2857141 : f32
    %15 = vector.broadcast %cst_6 : f32 to vector<8x1025xf32>
    %16 = arith.mulf %14, %15 : vector<8x1025xf32>
    %c0_7 = arith.constant 0 : index
    %c0_8 = arith.constant 0 : index
    %17 = vector.load %arg4[%c0_7, %c0_8] : memref<8x1025xf32, #tpu.memory_space<vmem>>, vector<8x1025xf32>
    tpu.vector_store %arg4[%c0_7, %c0_8], %16 {strides = array<i32>} : memref<8x1025xf32, #tpu.memory_space<vmem>>, vector<8x1025xf32>,
    return
  }
  func.func @transform_0(%arg0: i32) -> (i32, i32) {
    %c0_i32 = arith.constant 0 : i32
    %c0_i32_0 = arith.constant 0 : i32
    %c0_i32_1 = arith.constant 0 : i32
    return %c0_i32, %c0_i32_0 : i32, i32
  }
  func.func @transform_1(%arg0: i32) -> (i32, i32) {
    %c0_i32 = arith.constant 0 : i32
    %c0_i32_0 = arith.constant 0 : i32
    %c0_i32_1 = arith.constant 0 : i32
    return %c0_i32, %c0_i32_0 : i32, i32
  }
  func.func @transform_2(%arg0: i32) -> (i32, i32) {
    %c0_i32 = arith.constant 0 : i32
    %c0_i32_0 = arith.constant 0 : i32
    %c0_i32_1 = arith.constant 0 : i32
    return %c0_i32, %c0_i32_0 : i32, i32
  }
  func.func @transform_3(%arg0: i32) -> (i32, i32) {
    %c0_i32 = arith.constant 0 : i32
    %c0_i32_0 = arith.constant 0 : i32
    %c0_i32_1 = arith.constant 0 : i32
    return %c0_i32, %c0_i32_0 : i32, i32
  }
}

module attributes {stable_mosaic.version = 11 : i64} {
  func.func @_enqueue_kernel(%arg0: i32, %arg1: memref<8x128xf32, #tpu.memory_space<vmem>>, %arg2: memref<1xi32, #tpu.memory_space<smem>>, %arg3: memref<1025x128xf32, #tpu.memory_space<any>>, %arg4: memref<1025x128xf32, #tpu.memory_space<any>>, %arg5: memref<!tpu.dma_semaphore, #tpu.memory_space<semaphore_mem>>) attributes {dimension_semantics = [#tpu.dimension_semantics<arbitrary>], iteration_bounds = array<i64: 1>, scalar_prefetch = 0 : i64, scratch_operands = 1 : i64, tpu.core_type = #tpu.core_type<tc>, window_params = [{pipeline_mode = #tpu.pipeline_mode<synchronous>, transform_indices = @transform_0, window_bounds = array<i64: 8, 128>}, {transform_indices = @transform_1, window_bounds = array<i64: 1>}, {}, {}]} {
    %c0 = arith.constant 0 : index
    %0 = memref.load %arg2[%c0] : memref<1xi32, #tpu.memory_space<smem>>
    %c1_i32 = arith.constant 1 : i32
    %1 = arith.addi %0, %c1_i32 : i32
    %c0_i32 = arith.constant 0 : i32
    %2 = tpu.memref_slice %arg4[%1, %c0_i32] : memref<1025x128xf32, #tpu.memory_space<any>> -> memref<8x128xf32, #tpu.memory_space<any>>
    tpu.enqueue_dma source(%arg1 : memref<8x128xf32, #tpu.memory_space<vmem>>) target(%2 : memref<8x128xf32, #tpu.memory_space<any>>) target_semaphore(%arg5 : memref<!tpu.dma_semaphore, #tpu.memory_space<semaphore_mem>>)
    %c0_i32_0 = arith.constant 0 : i32
    %3 = tpu.memref_slice %arg4[%1, %c0_i32_0] : memref<1025x128xf32, #tpu.memory_space<any>> -> memref<8x128xf32, #tpu.memory_space<any>>
    tpu.wait_dma2 semaphore(%arg5 : memref<!tpu.dma_semaphore, #tpu.memory_space<semaphore_mem>>) src(%arg1 : memref<8x128xf32, #tpu.memory_space<vmem>>) dst(%3 : memref<8x128xf32, #tpu.memory_space<any>>)
    return
  }
  func.func @transform_0(%arg0: i32) -> (i32, i32) {
    %c0_i32 = arith.constant 0 : i32
    %c0_i32_0 = arith.constant 0 : i32
    %c0_i32_1 = arith.constant 0 : i32
    return %c0_i32, %c0_i32_0 : i32, i32
  }
  func.func @transform_1(%arg0: i32) -> i32 {
    %c0_i32 = arith.constant 0 : i32
    %c0_i32_0 = arith.constant 0 : i32
    return %c0_i32 : i32
  }
}

</mosaic_0001>

<bundles_post_ra>
// kernel: moco_forward.6
= control target key start
LH: loop header
LB: loop body
LE: loop exit
PB: predicated region body
PF: predicated region fallthrough
CT: control target
= control target key end

     0   :  { %s851_s0 = inlined_call_operand.vmem [shape: f32[8,128], index: 0, kind: input, shape index: {}]   ;;  %s852_s1 = inlined_call_operand.vmem [shape: f32[8,128], index: 1, kind: input, shape index: {}]   ;;  %s853_s2 = inlined_call_operand.vmem [shape: f32[1025,128], index: 2, kind: input, shape index: {}]   ;;  %s854_s3 = inlined_call_operand.hbm [shape: f32[8,1025], index: 3, kind: output, shape index: {}]  }
   0x1   :  { %v36_v0 = vld [vmem:[%s853_s2 + $0x70] sm:$0xff]  ;;  %v37_v1 = vld [vmem:[%s853_s2 + $0x78] sm:$0xff]  ;;  %v34_v11 = vld [vmem:[%s853_s2 + $0x60] sm:$0xff] }
   0x2   :  { %v68_v2 = vld [vmem:[%s853_s2 + $0x170] sm:$0xff]  ;;  %v158_v3 = vpack.c.bf16 %v37_v1, %v36_v0  ;;  %v69_v4 = vld [vmem:[%s853_s2 + $0x178] sm:$0xff]  ;;  %v35_v12 = vld [vmem:[%s853_s2 + $0x68] sm:$0xff] }
   0x3   :  { %v84_v5 = vld [vmem:[%s853_s2 + $0x1f0] sm:$0xff]  ;;  %v85_v6 = vld [vmem:[%s853_s2 + $0x1f8] sm:$0xff]  ;;  %v174_v7 = vpack.c.bf16 %v69_v4, %v68_v2  ;;  %v66_v14 = vld [vmem:[%s853_s2 + $0x160] sm:$0xff]  ;;  %v157_v18 = vpack.c.bf16 %v35_v12, %v34_v11 }
   0x4   :  { %v182_v8 = vpack.c.bf16 %v85_v6, %v84_v5  ;;  %v52_v9 = vld [vmem:[%s853_s2 + $0xf0] sm:$0xff]  ;;  %216 = vmatpush.bf16.xpose.msra.mxu0 %v158_v3  ;;  %v53_v10 = vld [vmem:[%s853_s2 + $0xf8] sm:$0xff]  ;;  %v67_v15 = vld [vmem:[%s853_s2 + $0x168] sm:$0xff] }
   0x5   :  { %242 = vmatpush.bf16.xpose.msra.mxu2 %v174_v7  ;;  %v166_v13 = vpack.c.bf16 %v53_v10, %v52_v9  ;;  %v82_v16 = vld [vmem:[%s853_s2 + $0x1e0] sm:$0xff]  ;;  %v83_v17 = vld [vmem:[%s853_s2 + $0x1e8] sm:$0xff]  ;;  %v173_v21 = vpack.c.bf16 %v67_v15, %v66_v14  ;;  %v32_v24 = vld [vmem:[%s853_s2 + $0x50] sm:$0xff] }
   0x6   :  { %255 = vmatpush.bf16.xpose.msra.mxu3 %v182_v8  ;;  %v50_v19 = vld [vmem:[%s853_s2 + $0xe0] sm:$0xff]  ;;  %v51_v20 = vld [vmem:[%s853_s2 + $0xe8] sm:$0xff]  ;;  %v181_v22 = vpack.c.bf16 %v83_v17, %v82_v16  ;;  %v33_v25 = vld [vmem:[%s853_s2 + $0x58] sm:$0xff] }
   0x7   :  { %229 = vmatpush.bf16.xpose.msra.mxu1 %v166_v13  ;;  %v165_v23 = vpack.c.bf16 %v51_v20, %v50_v19  ;;  %v64_v26 = vld [vmem:[%s853_s2 + $0x150] sm:$0xff]  ;;  %v65_v27 = vld [vmem:[%s853_s2 + $0x158] sm:$0xff]  ;;  %v156_v30 = vpack.c.bf16 %v33_v25, %v32_v24 }
   0x8   :  { %v80_v28 = vld [vmem:[%s853_s2 + $0x1d0] sm:$0xff]  ;;  %v81_v29 = vld [vmem:[%s853_s2 + $0x1d8] sm:$0xff]  ;;  %v172_v33 = vpack.c.bf16 %v65_v27, %v64_v26 }
   0x9   :  { %v48_v31 = vld [vmem:[%s853_s2 + $0xd0] sm:$0xff]  ;;  %v49_v32 = vld [vmem:[%s853_s2 + $0xd8] sm:$0xff]  ;;  %v180_v34 = vpack.c.bf16 %v81_v29, %v80_v28 }
   0xc   :  { %217 = vmatpush.bf16.xpose.msra.mxu0 %v157_v18 }
   0xd   :  { %243 = vmatpush.bf16.xpose.msra.mxu2 %v173_v21 }
   0xe   :  { %256 = vmatpush.bf16.xpose.msra.mxu3 %v181_v22 }
   0xf   :  { %230 = vmatpush.bf16.xpose.msra.mxu1 %v165_v23 }
  0x10   :  { %8 = vsyncpa [#allocation3], 0  ;;  %v164_v35 = vpack.c.bf16 %v49_v32, %v48_v31  ;;  %v30_v36 = vld [vmem:[%s853_s2 + $0x40] sm:$0xff]  ;;  %v31_v37 = vld [vmem:[%s853_s2 + $0x48] sm:$0xff]  ;;  %s387_s27 = sshll.u32 %s854_s3, 4  ;;  %vm378_vm1 = vcmask 7168   ;;  %s388_s27 = int_to_ptr.hbm [resolvable:$true] %s387_s27 }
  0x11   :  { %v62_v38 = vld [vmem:[%s853_s2 + $0x140] sm:$0xff]  ;;  %v63_v39 = vld [vmem:[%s853_s2 + $0x148] sm:$0xff]  ;;  %v155_v42 = vpack.c.bf16 %v31_v37, %v30_v36  ;;  %v28_v48 = vld [vmem:[%s853_s2 + $0x30] sm:$0xff] }
  0x12   :  { %v78_v40 = vld [vmem:[%s853_s2 + $0x1c0] sm:$0xff]  ;;  %v79_v41 = vld [vmem:[%s853_s2 + $0x1c8] sm:$0xff]  ;;  %v171_v45 = vpack.c.bf16 %v63_v39, %v62_v38  ;;  %v29_v49 = vld [vmem:[%s853_s2 + $0x38] sm:$0xff] }
  0x13   :  { %v46_v43 = vld [vmem:[%s853_s2 + $0xc0] sm:$0xff]  ;;  %v47_v44 = vld [vmem:[%s853_s2 + $0xc8] sm:$0xff]  ;;  %v179_v46 = vpack.c.bf16 %v79_v41, %v78_v40  ;;  %v60_v50 = vld [vmem:[%s853_s2 + $0x130] sm:$0xff]  ;;  %v154_v54 = vpack.c.bf16 %v29_v49, %v28_v48 }
  0x14   :  { %218 = vmatpush.bf16.xpose.msra.mxu0 %v156_v30  ;;  %v163_v47 = vpack.c.bf16 %v47_v44, %v46_v43  ;;  %v61_v51 = vld [vmem:[%s853_s2 + $0x138] sm:$0xff]  ;;  %v76_v52 = vld [vmem:[%s853_s2 + $0x1b0] sm:$0xff]  ;;  %v26_v60 = vld [vmem:[%s853_s2 + $0x20] sm:$0xff] }
  0x15   :  { %244 = vmatpush.bf16.xpose.msra.mxu2 %v172_v33  ;;  %v77_v53 = vld [vmem:[%s853_s2 + $0x1b8] sm:$0xff]  ;;  %v44_v55 = vld [vmem:[%s853_s2 + $0xb0] sm:$0xff]  ;;  %v170_v57 = vpack.c.bf16 %v61_v51, %v60_v50  ;;  %v27_v61 = vld [vmem:[%s853_s2 + $0x28] sm:$0xff] }
  0x16   :  { %257 = vmatpush.bf16.xpose.msra.mxu3 %v180_v34  ;;  %v45_v56 = vld [vmem:[%s853_s2 + $0xb8] sm:$0xff]  ;;  %v178_v58 = vpack.c.bf16 %v77_v53, %v76_v52  ;;  %v58_v62 = vld [vmem:[%s853_s2 + $0x120] sm:$0xff]  ;;  %v59_v63 = vld [vmem:[%s853_s2 + $0x128] sm:$0xff]  ;;  %v153_v2 = vpack.c.bf16 %v27_v61, %v26_v60 }
  0x17   :  { %231 = vmatpush.bf16.xpose.msra.mxu1 %v164_v35  ;;  %v162_v59 = vpack.c.bf16 %v45_v56, %v44_v55  ;;  %v74_v0 = vld [vmem:[%s853_s2 + $0x1a0] sm:$0xff]  ;;  %v75_v1 = vld [vmem:[%s853_s2 + $0x1a8] sm:$0xff]  ;;  %v169_v5 = vpack.c.bf16 %v59_v63, %v58_v62  ;;  %v24_v8 = vld [vmem:[%s853_s2 + $0x10] sm:$0xff] }
  0x18   :  { %v42_v3 = vld [vmem:[%s853_s2 + $0xa0] sm:$0xff]  ;;  %v43_v4 = vld [vmem:[%s853_s2 + $0xa8] sm:$0xff]  ;;  %v177_v6 = vpack.c.bf16 %v75_v1, %v74_v0  ;;  %v25_v9 = vld [vmem:[%s853_s2 + $0x18] sm:$0xff] }
  0x19   :  { %v161_v7 = vpack.c.bf16 %v43_v4, %v42_v3  ;;  %v56_v10 = vld [vmem:[%s853_s2 + $0x110] sm:$0xff]  ;;  %v57_v11 = vld [vmem:[%s853_s2 + $0x118] sm:$0xff]  ;;  %v152_v14 = vpack.c.bf16 %v25_v9, %v24_v8  ;;  %v22_v20 = vld [vmem:[%s853_s2] sm:$0xff] }
  0x1a   :  { %v72_v12 = vld [vmem:[%s853_s2 + $0x190] sm:$0xff]  ;;  %v73_v13 = vld [vmem:[%s853_s2 + $0x198] sm:$0xff]  ;;  %v168_v17 = vpack.c.bf16 %v57_v11, %v56_v10  ;;  %v23_v21 = vld [vmem:[%s853_s2 + $0x8] sm:$0xff] }
  0x1b   :  { %v40_v15 = vld [vmem:[%s853_s2 + $0x90] sm:$0xff]  ;;  %v41_v16 = vld [vmem:[%s853_s2 + $0x98] sm:$0xff]  ;;  %v176_v18 = vpack.c.bf16 %v73_v13, %v72_v12  ;;  %v54_v24 = vld [vmem:[%s853_s2 + $0x100] sm:$0xff]  ;;  %v151_v31 = vpack.c.bf16 %v23_v21, %v22_v20 }
  0x1c   :  { %219 = vmatpush.bf16.xpose.msra.mxu0 %v155_v42  ;;  %v160_v19 = vpack.c.bf16 %v41_v16, %v40_v15  ;;  %v100_v22 = vld [vmem:[%s853_s2 + $0x270] sm:$0xff]  ;;  %v101_v23 = vld [vmem:[%s853_s2 + $0x278] sm:$0xff]  ;;  %v55_v25 = vld [vmem:[%s853_s2 + $0x108] sm:$0xff] }
  0x1d   :  { %245 = vmatpush.bf16.xpose.msra.mxu2 %v171_v45  ;;  %v70_v26 = vld [vmem:[%s853_s2 + $0x180] sm:$0xff]  ;;  %v71_v27 = vld [vmem:[%s853_s2 + $0x188] sm:$0xff]  ;;  %v132_v28 = vld [vmem:[%s853_s2 + $0x370] sm:$0xff]  ;;  %v190_v35 = vpack.c.bf16 %v101_v23, %v100_v22  ;;  %v167_v36 = vpack.c.bf16 %v55_v25, %v54_v24 }
  0x1e   :  { %258 = vmatpush.bf16.xpose.msra.mxu3 %v179_v46  ;;  %v133_v29 = vld [vmem:[%s853_s2 + $0x378] sm:$0xff]  ;;  %v148_v30 = vld [vmem:[%s853_s2 + $0x3f0] sm:$0xff]  ;;  %v38_v33 = vld [vmem:[%s853_s2 + $0x80] sm:$0xff]  ;;  %v175_v39 = vpack.c.bf16 %v71_v27, %v70_v26 }
  0x1f   :  { %232 = vmatpush.bf16.xpose.msra.mxu1 %v163_v47  ;;  %v149_v32 = vld [vmem:[%s853_s2 + $0x3f8] sm:$0xff]  ;;  %v39_v34 = vld [vmem:[%s853_s2 + $0x88] sm:$0xff]  ;;  %v116_v37 = vld [vmem:[%s853_s2 + $0x2f0] sm:$0xff]  ;;  %v206_v40 = vpack.c.bf16 %v133_v29, %v132_v28 }
  0x20   :  { %v117_v38 = vld [vmem:[%s853_s2 + $0x2f8] sm:$0xff]  ;;  %v214_v41 = vpack.c.bf16 %v149_v32, %v148_v30  ;;  %v159_v42 = vpack.c.bf16 %v39_v34, %v38_v33  ;;  %v98_v44 = vld [vmem:[%s853_s2 + $0x260] sm:$0xff]  ;;  %v99_v45 = vld [vmem:[%s853_s2 + $0x268] sm:$0xff] }
  0x21   :  { %v198_v43 = vpack.c.bf16 %v117_v38, %v116_v37  ;;  %v130_v46 = vld [vmem:[%s853_s2 + $0x360] sm:$0xff]  ;;  %v131_v47 = vld [vmem:[%s853_s2 + $0x368] sm:$0xff]  ;;  %v189_v52 = vpack.c.bf16 %v99_v45, %v98_v44  ;;  %v128_v60 = vld [vmem:[%s853_s2 + $0x350] sm:$0xff] }
  0x22   :  { %v16_v48 = vld [vmem:[%s851_s0] sm:$0xff]  ;;  %v147_v50 = vld [vmem:[%s853_s2 + $0x3e8] sm:$0xff]  ;;  %v205_v55 = vpack.c.bf16 %v131_v47, %v130_v46  ;;  %v129_v61 = vld [vmem:[%s853_s2 + $0x358] sm:$0xff] }
  0x23   :  { %v146_v49 = vld [vmem:[%s853_s2 + $0x3e0] sm:$0xff]  ;;  %v681_v51 = vpack.c.bf16 %v16_v48, %v16_v48  ;;  %v144_v62 = vld [vmem:[%s853_s2 + $0x3d0] sm:$0xff]  ;;  %v145_v63 = vld [vmem:[%s853_s2 + $0x3d8] sm:$0xff]  ;;  %v204_v3 = vpack.c.bf16 %v129_v61, %v128_v60 }
  0x24   :  { %220 = vmatpush.bf16.xpose.msra.mxu0 %v154_v54  ;;  %v114_v53 = vld [vmem:[%s853_s2 + $0x2e0] sm:$0xff]  ;;  %v115_v54 = vld [vmem:[%s853_s2 + $0x2e8] sm:$0xff]  ;;  %v213_v56 = vpack.c.bf16 %v147_v50, %v146_v49  ;;  %v112_v1 = vld [vmem:[%s853_s2 + $0x2d0] sm:$0xff]  ;;  %v212_v4 = vpack.c.bf16 %v145_v63, %v144_v62 }
  0x25   :  { %246 = vmatpush.bf16.xpose.msra.mxu2 %v170_v57  ;;  %v197_v57 = vpack.c.bf16 %v115_v54, %v114_v53  ;;  %v126_v8 = vld [vmem:[%s853_s2 + $0x340] sm:$0xff]  ;;  %v127_v9 = vld [vmem:[%s853_s2 + $0x348] sm:$0xff]  ;;  %v92_v20 = vld [vmem:[%s853_s2 + $0x230] sm:$0xff] }
  0x26   :  { %259 = vmatpush.bf16.xpose.msra.mxu3 %v178_v58  ;;  %v96_v58 = vld [vmem:[%s853_s2 + $0x250] sm:$0xff]  ;;  %v142_v10 = vld [vmem:[%s853_s2 + $0x3c0] sm:$0xff]  ;;  %v143_v11 = vld [vmem:[%s853_s2 + $0x3c8] sm:$0xff]  ;;  %v203_v15 = vpack.c.bf16 %v127_v9, %v126_v8 }
  0x27   :  { %233 = vmatpush.bf16.xpose.msra.mxu1 %v162_v59  ;;  %v97_v59 = vld [vmem:[%s853_s2 + $0x258] sm:$0xff]  ;;  %v110_v13 = vld [vmem:[%s853_s2 + $0x2c0] sm:$0xff]  ;;  %v211_v16 = vpack.c.bf16 %v143_v11, %v142_v10  ;;  %v124_v22 = vld [vmem:[%s853_s2 + $0x330] sm:$0xff] }
  0x28   :  { %v188_v0 = vpack.c.bf16 %v97_v59, %v96_v58  ;;  %v93_v21 = vld [vmem:[%s853_s2 + $0x238] sm:$0xff]  ;;  %v140_v24 = vld [vmem:[%s853_s2 + $0x3b0] sm:$0xff]  ;;  %v90_v32 = vld [vmem:[%s853_s2 + $0x220] sm:$0xff] }
  0x29   :  { %v125_v23 = vld [vmem:[%s853_s2 + $0x338] sm:$0xff]  ;;  %v186_v26 = vpack.c.bf16 %v93_v21, %v92_v20  ;;  %v108_v27 = vld [vmem:[%s853_s2 + $0x2b0] sm:$0xff]  ;;  %v91_v33 = vld [vmem:[%s853_s2 + $0x228] sm:$0xff] }
  0x2a   :  { %v141_v25 = vld [vmem:[%s853_s2 + $0x3b8] sm:$0xff]  ;;  %v202_v29 = vpack.c.bf16 %v125_v23, %v124_v22  ;;  %v122_v34 = vld [vmem:[%s853_s2 + $0x320] sm:$0xff]  ;;  %v139_v37 = vld [vmem:[%s853_s2 + $0x3a8] sm:$0xff]  ;;  %v185_v38 = vpack.c.bf16 %v91_v33, %v90_v32 }
  0x2b   :  { %v109_v28 = vld [vmem:[%s853_s2 + $0x2b8] sm:$0xff]  ;;  %v210_v30 = vpack.c.bf16 %v141_v25, %v140_v24  ;;  %v88_v44 = vld [vmem:[%s853_s2 + $0x210] sm:$0xff]  ;;  %v87_v58 = vld [vmem:[%s853_s2 + $0x208] sm:$0xff] }
  0x2c   :  { %221 = vmatpush.bf16.xpose.msra.mxu0 %v153_v2  ;;  %v113_v2 = vld [vmem:[%s853_s2 + $0x2d8] sm:$0xff]  ;;  %v120_v46 = vld [vmem:[%s853_s2 + $0x310] sm:$0xff]  ;;  %v118_v59 = vld [vmem:[%s853_s2 + $0x300] sm:$0xff] }
  0x2d   :  { %247 = vmatpush.bf16.xpose.msra.mxu2 %v169_v5  ;;  %v196_v5 = vpack.c.bf16 %v113_v2, %v112_v1  ;;  %v89_v45 = vld [vmem:[%s853_s2 + $0x218] sm:$0xff]  ;;  %v119_v60 = vld [vmem:[%s853_s2 + $0x308] sm:$0xff]  ;;  %v150_v61 = vld [vmem:[%s853_s2 + $0x400] sm:$0x1] }
  0x2e   :  { %260 = vmatpush.bf16.xpose.msra.mxu3 %v177_v6  ;;  %v94_v6 = vld [vmem:[%s853_s2 + $0x240] sm:$0xff]  ;;  %v121_v47 = vld [vmem:[%s853_s2 + $0x318] sm:$0xff]  ;;  %v184_v50 = vpack.c.bf16 %v89_v45, %v88_v44  ;;  %v135_v63 = vld [vmem:[%s853_s2 + $0x388] sm:$0xff] }
  0x2f   :  { %234 = vmatpush.bf16.xpose.msra.mxu1 %v161_v7  ;;  %v95_v7 = vld [vmem:[%s853_s2 + $0x248] sm:$0xff]  ;;  %v137_v49 = vld [vmem:[%s853_s2 + $0x398] sm:$0xff]  ;;  %v200_v54 = vpack.c.bf16 %v121_v47, %v120_v46  ;;  %v134_v62 = vld [vmem:[%s853_s2 + $0x380] sm:$0xff] }
  0x30   :  { %v187_v12 = vpack.c.bf16 %v95_v7, %v94_v6  ;;  %v105_v53 = vld [vmem:[%s853_s2 + $0x298] sm:$0xff]  ;;  %v102_v1 = vld [vmem:[%s853_s2 + $0x280] sm:$0xff]  ;;  %v103_v2 = vld [vmem:[%s853_s2 + $0x288] sm:$0xff]  ;;  %v333_v7 = vlaneseq }
  0x31   :  { %v191_v6 = vpack.c.bf16 %v103_v2, %v102_v1 }
  0x32   :  { %v334_v9 = vand.u32 127, %v333_v7 }
  0x34   :  { %222 = vmatpush.bf16.xpose.msra.mxu0 %v152_v14  ;;  %v111_v14 = vld [vmem:[%s853_s2 + $0x2c8] sm:$0xff]  ;;  %vm343_vm0 = vcmp.eq.s32.totalorder %v334_v9, 0 }
  0x35   :  { %248 = vmatpush.bf16.xpose.msra.mxu2 %v168_v17  ;;  %v17_v17 = vld [vmem:[%s852_s1] sm:$0xff] }
  0x36   :  { %261 = vmatpush.bf16.xpose.msra.mxu3 %v176_v18  ;;  %v195_v18 = vpack.c.bf16 %v111_v14, %v110_v13 }
  0x37   :  { %235 = vmatpush.bf16.xpose.msra.mxu1 %v160_v19  ;;  %v18_v19 = vmul.f32 %v17_v17, %v16_v48  ;;  %v136_v48 = vld [vmem:[%s853_s2 + $0x390] sm:$0xff] }
  0x39   :  { %19 = vadd.xlane.f32.xlu0 %v18_v19 }
  0x3c   :  { %223 = vmatpush.bf16.xpose.msra.mxu0 %v151_v31  ;;  %v194_v31 = vpack.c.bf16 %v109_v28, %v108_v27 }
  0x3d   :  { %249 = vmatpush.bf16.xpose.msra.mxu2 %v167_v36  ;;  %v138_v36 = vld [vmem:[%s853_s2 + $0x3a0] sm:$0xff] }
  0x3e   :  { %262 = vmatpush.bf16.xpose.msra.mxu3 %v175_v39  ;;  %v106_v39 = vld [vmem:[%s853_s2 + $0x2a0] sm:$0xff] }
  0x3f   :  { %236 = vmatpush.bf16.xpose.msra.mxu1 %v159_v42  ;;  %v209_v42 = vpack.c.bf16 %v139_v37, %v138_v36 }
  0x43   :  { %224 = vmatmul.bf16.vlgmr.msra.gmra.mxu0 %v681_v51 }
  0x44   :  { %268 = vmatpush.bf16.xpose.msrb.mxu0 %v190_v35  ;;  %250 = vmatmul.bf16.vlgmr.msra.gmra.mxu2 %v681_v51  ;;  %v123_v35 = vld [vmem:[%s853_s2 + $0x328] sm:$0xff] }
  0x45   :  { %294 = vmatpush.bf16.xpose.msrb.mxu2 %v206_v40  ;;  %263 = vmatmul.bf16.vlgmr.msra.gmra.mxu3 %v681_v51  ;;  %v107_v40 = vld [vmem:[%s853_s2 + $0x2a8] sm:$0xff] }
  0x46   :  { %307 = vmatpush.bf16.xpose.msrb.mxu3 %v214_v41  ;;  %237 = vmatmul.bf16.vlgmr.msra.gmra.mxu1 %v681_v51  ;;  %v201_v41 = vpack.c.bf16 %v123_v35, %v122_v34 }
  0x47   :  { %281 = vmatpush.bf16.xpose.msrb.mxu1 %v198_v43  ;;  %v193_v43 = vpack.c.bf16 %v107_v40, %v106_v39 }
  0x4c   :  { %269 = vmatpush.bf16.xpose.msrb.mxu0 %v189_v52  ;;  %v104_v52 = vld [vmem:[%s853_s2 + $0x290] sm:$0xff] }
  0x4d   :  { %295 = vmatpush.bf16.xpose.msrb.mxu2 %v205_v55  ;;  %v208_v55 = vpack.c.bf16 %v137_v49, %v136_v48 }
  0x4e   :  { %308 = vmatpush.bf16.xpose.msrb.mxu3 %v213_v56  ;;  %v192_v56 = vpack.c.bf16 %v105_v53, %v104_v52 }
  0x4f   :  { %282 = vmatpush.bf16.xpose.msrb.mxu1 %v197_v57  ;;  %v86_v57 = vld [vmem:[%s853_s2 + $0x200] sm:$0xff]  ;;  %s423_s2 = smov [#allocation2]  }
  0x50   :  { %s385_s24 = sshll.u32 %s423_s2, 4  ;;  %s386_s24 = int_to_ptr.vmem [resolvable:$true] %s385_s24 }
  0x54   :  { %270 = vmatpush.bf16.xpose.msrb.mxu0 %v188_v0  ;;  %v183_v0 = vpack.c.bf16 %v87_v58, %v86_v57 }
  0x55   :  { %296 = vmatpush.bf16.xpose.msrb.mxu2 %v204_v3  ;;  %v199_v3 = vpack.c.bf16 %v119_v60, %v118_v59 }
  0x56   :  { %309 = vmatpush.bf16.xpose.msrb.mxu3 %v212_v4  ;;  %v215_v4 = vpack.c.bf16 %v150_v61, %v150_v61 }
  0x57   :  { %283 = vmatpush.bf16.xpose.msrb.mxu1 %v196_v5  ;;  %v207_v5 = vpack.c.bf16 %v135_v63, %v134_v62 }
  0x5c   :  { %271 = vmatpush.bf16.xpose.msrb.mxu0 %v187_v12 }
  0x5d   :  { %297 = vmatpush.bf16.xpose.msrb.mxu2 %v203_v15 }
  0x5e   :  { %310 = vmatpush.bf16.xpose.msrb.mxu3 %v211_v16 }
  0x5f   :  { %284 = vmatpush.bf16.xpose.msrb.mxu1 %v195_v18 }
  0x64   :  { %272 = vmatpush.bf16.xpose.msrb.mxu0 %v186_v26 }
  0x65   :  { %298 = vmatpush.bf16.xpose.msrb.mxu2 %v202_v29 }
  0x66   :  { %311 = vmatpush.bf16.xpose.msrb.mxu3 %v210_v30 }
  0x67   :  { %285 = vmatpush.bf16.xpose.msrb.mxu1 %v194_v31 }
  0x6c   :  { %273 = vmatpush.bf16.xpose.msrb.mxu0 %v185_v38 }
  0x6d   :  { %299 = vmatpush.bf16.xpose.msrb.mxu2 %v201_v41 }
  0x6e   :  { %312 = vmatpush.bf16.xpose.msrb.mxu3 %v209_v42 }
  0x6f   :  { %286 = vmatpush.bf16.xpose.msrb.mxu1 %v193_v43 }
  0x74   :  { %274 = vmatpush.bf16.xpose.msrb.mxu0 %v184_v50 }
  0x75   :  { %300 = vmatpush.bf16.xpose.msrb.mxu2 %v200_v54 }
  0x76   :  { %313 = vmatpush.bf16.xpose.msrb.mxu3 %v208_v55 }
  0x77   :  { %287 = vmatpush.bf16.xpose.msrb.mxu1 %v192_v56 }
  0x7c   :  { %275 = vmatpush.bf16.xpose.msrb.mxu0 %v183_v0 }
  0x7d   :  { %301 = vmatpush.bf16.xpose.msrb.mxu2 %v199_v3 }
  0x7e   :  { %314 = vmatpush.bf16.xpose.msrb.mxu3 %v207_v5 }
  0x7f   :  { %288 = vmatpush.bf16.xpose.msrb.mxu1 %v191_v6 }
  0x83   :  { %276 = vmatmul.bf16.vlgmr.msrb.gmra.mxu0 %v681_v51 }
  0x84   :  { %327 = vmatpush.bf16.xpose.msra.mxu0 %v215_v4  ;;  %302 = vmatmul.bf16.vlgmr.msrb.gmra.mxu2 %v681_v51 }
  0x85   :  { %315 = vmatmul.bf16.vlgmr.msrb.gmra.mxu3 %v681_v51 }
  0x86   :  { %289 = vmatmul.bf16.vlgmr.msrb.gmra.mxu1 %v681_v51 }
  0x93   :  { %328 = vmatmul.bf16.vlgmr.msra.gmra.mxu0 %v681_v51 }
  0xac   :  { %v20_v16 = vpop.xlane.xlu0 %19 }
  0xc0   :  { %v225_v8 = vpop.f32.mrf.mxu0 }
  0xc1   :  { %v352_v18 = vsel %vm343_vm0, %v20_v16, %v225_v8 }
  0xc2   :  { %v361_v19 = vmul.f32 14.285714, %v352_v18 }
  0xc3   :  { %v238_v10 = vpop.f32.mrf.mxu1 }
  0xc4   :  { %v362_v11 = vmul.f32 14.285714, %v238_v10  ;;  %370 = vst [vmem:[#allocation2] sm:$0xff] %v361_v19 }
  0xc6   :  { %371 = vst [vmem:[#allocation2 + $0x8] sm:$0xff] %v362_v11 }
  0xc7   :  { %v251_v12 = vpop.f32.mrf.mxu2 }
  0xc8   :  { %v227_v13 = vpop.f32.mrf.mxu0  ;;  %v363_v14 = vmul.f32 14.285714, %v251_v12  ;;  %v264_v15 = vpop.f32.mrf.mxu3 }
  0xc9   :  { %v364_v17 = vmul.f32 14.285714, %v264_v15 }
  0xca   :  { %372 = vst [vmem:[#allocation2 + $0x10] sm:$0xff] %v363_v14 }
  0xcb   :  { %373 = vst [vmem:[#allocation2 + $0x18] sm:$0xff] %v364_v17  ;;  %v240_v20 = vpop.f32.mrf.mxu1 }
  0xcf   :  { %v253_v51 = vpop.f32.mrf.mxu2 }
  0xd0   :  { %v266_v21 = vpop.f32.mrf.mxu3 }
 0x100   :  { %v277_v22 = vpop.f32.mrf.mxu0 }
 0x101   :  { %v365_v23 = vmul.f32 14.285714, %v277_v22 }
 0x103   :  { %374 = vst [vmem:[#allocation2 + $0x20] sm:$0xff] %v365_v23  ;;  %v290_v24 = vpop.f32.mrf.mxu1 }
 0x104   :  { %v366_v25 = vmul.f32 14.285714, %v290_v24 }
 0x106   :  { %375 = vst [vmem:[#allocation2 + $0x28] sm:$0xff] %v366_v25 }
 0x107   :  { %v303_v26 = vpop.f32.mrf.mxu2 }
 0x108   :  { %v279_v27 = vpop.f32.mrf.mxu0  ;;  %v367_v28 = vmul.f32 14.285714, %v303_v26  ;;  %v316_v29 = vpop.f32.mrf.mxu3 }
 0x109   :  { %v368_v30 = vmul.f32 14.285714, %v316_v29 }
 0x10a   :  { %376 = vst [vmem:[#allocation2 + $0x30] sm:$0xff] %v367_v28 }
 0x10b   :  { %377 = vst [vmem:[#allocation2 + $0x38] sm:$0xff] %v368_v30  ;;  %v292_v31 = vpop.f32.mrf.mxu1 }
 0x10f   :  { %v305_v32 = vpop.f32.mrf.mxu2 }
 0x110   :  { %v318_v33 = vpop.f32.mrf.mxu3  ;;  %v329_v34 = vpop.f32.mrf.mxu0 }
 0x111   :  { %v369_v35 = vmul.f32 14.285714, %v329_v34 }
 0x113   :  { %379 = vst.msk [vmem:[#allocation2 + $0x40] sm:$0xff] %vm378_vm1, %v369_v35 }
 0x114   :  { %390 = dma.vmem_to_hbm [thread:$0]  %s386_s24, 1152, %s388_s27, [#allocation3]  }
 0x118   :  { %v331_v36 = vpop.f32.mrf.mxu0 }
 0x119   :  { %421 = dma.done.wait [#allocation3], 1152  }
 0x11a   :  { %422 = vsyncadd [#allocation3], 4294966144 }
 0x11b   :  { %395 = vsyncpa [#allocation3], 1 }

// kernel: moco_forward.4
= control target key start
LH: loop header
LB: loop body
LE: loop exit
PB: predicated region body
PF: predicated region fallthrough
CT: control target
= control target key end

     0   :  { %s1109_s24 = smov 0   ;;  %s1111_s25 = smov 0   ;;  %s1598_s0 = inlined_call_operand.vmem [shape: bf16[8,1024], index: 0, kind: input, shape index: {}]   ;;  %s1599_s1 = inlined_call_operand.vmem [shape: f32[1024,256], index: 1, kind: input, shape index: {}]   ;;  %s1600_s2 = inlined_call_operand.vmem [shape: f32[1,256], index: 2, kind: input, shape index: {}]   ;;  %s1601_s3 = inlined_call_operand.vmem [shape: f32[256,256], index: 3, kind: input, shape index: {}]   ;;  %s1602_s4 = inlined_call_operand.vmem [shape: f32[1,256], index: 4, kind: input, shape index: {}]   ;;  %s1603_s5 = inlined_call_operand.vmem [shape: f32[256,128], index: 5, kind: input, shape index: {}]   ;;  %s1604_s6 = inlined_call_operand.vmem [shape: f32[1,128], index: 6, kind: input, shape index: {}]   ;;  %s1605_s7 = inlined_call_operand.vmem [shape: f32[8,128], index: 7, kind: output, shape index: {}]  }
   0x1   :  { %s1113_s26 = smov 0  }
   0x2 LB: > { %s26_s27 = sadd.s32 1, %s1062_s25  ;;  %p1004_p0 = scmp.ge.s32.totalorder %s1066_s26, 1  ;;  %s1066_s26 = sphi %s1113_s26, %s17_s26   ;;  %s1062_s25 = sphi %s1111_s25, %s1607_s25   ;;  %s1058_s24 = sphi %s1109_s24, %s1606_s24  }
   0x3   : > { %p27_p1 = scmp.ge.s32.totalorder %s26_s27, 2  ;;  %p268_p2 = scmp.lt.s32.totalorder %s1066_s26, 3 }
   0x5   : > { %s1609_s27 = smov (%p27_p1, %s26_s27), 0  ;;  %p269_p3 = pnand %p1004_p0, %p268_p2 }
   0x6   : > { %s1005_s28 = sshll.u32 (!%p269_p3), %s1058_s24, 2  ;;  %s1007_s29 = sshll.u32 (!%p269_p3), %s1058_s24, 6 }
   0x7   : > { %272 = sbr.rel (%p269_p3) target bundleno = 677 (0x2a5), region = 48  ;;  %p312_p4 = scmp.lt.s32.totalorder (!%p269_p3), %s1005_s28, 7 }
   0x8   : > { %p320_p5 = scmp.lt.s32.totalorder (!%p269_p3), %s1007_s29, 127  ;;  %p1010_p6 = scmp.ne.s32.totalorder (!%p269_p3), %s1058_s24, 0 }
   0xc   : > { %s1611_s28 = smov (!%p312_p4, %s1005_s28), 7  ;;  %s1613_s29 = smov (!%p320_p5, %s1007_s29), 127 }
   0xd   : > { %s1006_s30 = sshll.u32 %s1611_s28, 2  ;;  %s1015_s11 = sshll.u32 %s1613_s29, 4 }
   0xe   : > { %s1134_s10 = scalar_lea.vmem %s1598_s0, %s1006_s30  ;;  %s1139_s14 = scalar_lea.vmem %s1599_s1, %s1015_s11 }
   0xf   : > { %333 = sbr.rel (%p1010_p6) target bundleno = 23 (0x17), region = 52 }
  0x14   : > { %v1068_v0 = vmov 0.0  }
  0x15   : > { %334 = vst [vmem:[#allocation2] sm:$0xff] %v1068_v0 }
  0x16   : > { %335 = vst [vmem:[#allocation2 + $0x8] sm:$0xff] %v1068_v0 }
  0x17 PF: > { %v368_v1 = vld [vmem:[%s1139_s14 + $0xe0] sm:$0xff]  ;;  %v370_v2 = vld [vmem:[%s1139_s14 + $0xf0] sm:$0xff]  ;;  %p1011_p7 = scmp.ne.s32.totalorder %s1058_s24, 1 }
  0x18   : > { %v400_v3 = vld [vmem:[%s1139_s14 + $0x1e0] sm:$0xff]  ;;  %v482_v4 = vpack.c.bf16 %v370_v2, %v368_v1  ;;  %v402_v5 = vld [vmem:[%s1139_s14 + $0x1f0] sm:$0xff] }
  0x19   : > { %v432_v6 = vld [vmem:[%s1139_s14 + $0x2e0] sm:$0xff]  ;;  %v434_v7 = vld [vmem:[%s1139_s14 + $0x2f0] sm:$0xff]  ;;  %v498_v8 = vpack.c.bf16 %v402_v5, %v400_v3 }
  0x1a   : > { %v514_v9 = vpack.c.bf16 %v434_v7, %v432_v6  ;;  %v464_v10 = vld [vmem:[%s1139_s14 + $0x3e0] sm:$0xff]  ;;  %v466_v11 = vld [vmem:[%s1139_s14 + $0x3f0] sm:$0xff]  ;;  %546 = vmatpush.bf16.msra.mxu0 %v482_v4 }
  0x1b   : > { %v364_v12 = vld [vmem:[%s1139_s14 + $0xc0] sm:$0xff]  ;;  %v530_v13 = vpack.c.bf16 %v466_v11, %v464_v10  ;;  %v366_v14 = vld [vmem:[%s1139_s14 + $0xd0] sm:$0xff]  ;;  %559 = vmatpush.bf16.msra.mxu1 %v498_v8 }
  0x1c   : > { %v396_v15 = vld [vmem:[%s1139_s14 + $0x1c0] sm:$0xff]  ;;  %v398_v16 = vld [vmem:[%s1139_s14 + $0x1d0] sm:$0xff]  ;;  %572 = vmatpush.bf16.msra.mxu2 %v514_v9  ;;  %v480_v17 = vpack.c.bf16 %v366_v14, %v364_v12 }
  0x1d   : > { %v496_v18 = vpack.c.bf16 %v398_v16, %v396_v15  ;;  %v428_v19 = vld [vmem:[%s1139_s14 + $0x2c0] sm:$0xff]  ;;  %v430_v20 = vld [vmem:[%s1139_s14 + $0x2d0] sm:$0xff]  ;;  %585 = vmatpush.bf16.msra.mxu3 %v530_v13 }
  0x1e   : > { %v460_v21 = vld [vmem:[%s1139_s14 + $0x3c0] sm:$0xff]  ;;  %v512_v22 = vpack.c.bf16 %v430_v20, %v428_v19  ;;  %v462_v23 = vld [vmem:[%s1139_s14 + $0x3d0] sm:$0xff]  ;;  %547 = vmatpush.bf16.msra.mxu0 %v480_v17 }
  0x1f   : > { %v360_v24 = vld [vmem:[%s1139_s14 + $0xa0] sm:$0xff]  ;;  %v362_v25 = vld [vmem:[%s1139_s14 + $0xb0] sm:$0xff]  ;;  %v528_v26 = vpack.c.bf16 %v462_v23, %v460_v21  ;;  %560 = vmatpush.bf16.msra.mxu1 %v496_v18 }
  0x20   : > { %v392_v27 = vld [vmem:[%s1139_s14 + $0x1a0] sm:$0xff]  ;;  %v394_v28 = vld [vmem:[%s1139_s14 + $0x1b0] sm:$0xff]  ;;  %v478_v30 = vpack.c.bf16 %v362_v25, %v360_v24  ;;  %573 = vmatpush.bf16.msra.mxu2 %v512_v22 }
  0x21   : > { %v424_v29 = vld [vmem:[%s1139_s14 + $0x2a0] sm:$0xff]  ;;  %v426_v31 = vld [vmem:[%s1139_s14 + $0x2b0] sm:$0xff]  ;;  %v494_v34 = vpack.c.bf16 %v394_v28, %v392_v27  ;;  %586 = vmatpush.bf16.msra.mxu3 %v528_v26 }
  0x22   : > { %v456_v32 = vld [vmem:[%s1139_s14 + $0x3a0] sm:$0xff]  ;;  %v458_v33 = vld [vmem:[%s1139_s14 + $0x3b0] sm:$0xff]  ;;  %v510_v35 = vpack.c.bf16 %v426_v31, %v424_v29  ;;  %548 = vmatpush.bf16.msra.mxu0 %v478_v30  ;;  %v369_v29 = vld [vmem:[%s1139_s14 + $0xe8] sm:$0xff] }
  0x23   : > { %v356_v36 = vld [vmem:[%s1139_s14 + $0x80] sm:$0xff]  ;;  %v358_v37 = vld [vmem:[%s1139_s14 + $0x90] sm:$0xff]  ;;  %v526_v39 = vpack.c.bf16 %v458_v33, %v456_v32  ;;  %561 = vmatpush.bf16.msra.mxu1 %v494_v34  ;;  %v371_v30 = vld [vmem:[%s1139_s14 + $0xf8] sm:$0xff] }
  0x24   : > { %v388_v38 = vld [vmem:[%s1139_s14 + $0x180] sm:$0xff]  ;;  %v390_v40 = vld [vmem:[%s1139_s14 + $0x190] sm:$0xff]  ;;  %v476_v45 = vpack.c.bf16 %v358_v37, %v356_v36  ;;  %574 = vmatpush.bf16.msra.mxu2 %v510_v35  ;;  %v401_v31 = vld [vmem:[%s1139_s14 + $0x1e8] sm:$0xff] }
  0x25   : > { %v420_v41 = vld [vmem:[%s1139_s14 + $0x280] sm:$0xff]  ;;  %v422_v42 = vld [vmem:[%s1139_s14 + $0x290] sm:$0xff]  ;;  %v492_v46 = vpack.c.bf16 %v390_v40, %v388_v38  ;;  %587 = vmatpush.bf16.msra.mxu3 %v526_v39  ;;  %v339_v32 = vld [vmem:[%s1134_s10 + $0x8] sm:$0xff] }
  0x26   : > { %v452_v43 = vld [vmem:[%s1139_s14 + $0x380] sm:$0xff]  ;;  %v454_v44 = vld [vmem:[%s1139_s14 + $0x390] sm:$0xff]  ;;  %v508_v47 = vpack.c.bf16 %v422_v42, %v420_v41  ;;  %549 = vmatpush.bf16.msra.mxu0 %v476_v45  ;;  %v403_v34 = vld [vmem:[%s1139_s14 + $0x1f8] sm:$0xff]  ;;  %v536_v37 = vunpack.c.l.b16 %v339_v32  ;;  %v537_v42 = vunpack.c.h.b16 %v339_v32 }
  0x27   : > { %v352_v48 = vld [vmem:[%s1139_s14 + $0x60] sm:$0xff]  ;;  %v354_v49 = vld [vmem:[%s1139_s14 + $0x70] sm:$0xff]  ;;  %v524_v51 = vpack.c.bf16 %v454_v44, %v452_v43  ;;  %562 = vmatpush.bf16.msra.mxu1 %v492_v46  ;;  %v433_v35 = vld [vmem:[%s1139_s14 + $0x2e8] sm:$0xff]  ;;  %v483_v44 = vpack.c.bf16 %v371_v30, %v369_v29  ;;  %v499_v46 = vpack.c.bf16 %v403_v34, %v401_v31 }
  0x28   : > { %v384_v50 = vld [vmem:[%s1139_s14 + $0x160] sm:$0xff]  ;;  %v386_v52 = vld [vmem:[%s1139_s14 + $0x170] sm:$0xff]  ;;  %v474_v57 = vpack.c.bf16 %v354_v49, %v352_v48  ;;  %575 = vmatpush.bf16.msra.mxu2 %v508_v47  ;;  %v435_v36 = vld [vmem:[%s1139_s14 + $0x2f8] sm:$0xff] }
  0x29   : > { %v416_v53 = vld [vmem:[%s1139_s14 + $0x260] sm:$0xff]  ;;  %v418_v54 = vld [vmem:[%s1139_s14 + $0x270] sm:$0xff]  ;;  %v490_v58 = vpack.c.bf16 %v386_v52, %v384_v50  ;;  %588 = vmatpush.bf16.msra.mxu3 %v524_v51  ;;  %v465_v40 = vld [vmem:[%s1139_s14 + $0x3e8] sm:$0xff]  ;;  %v515_v47 = vpack.c.bf16 %v435_v36, %v433_v35 }
  0x2a   : > { %v448_v55 = vld [vmem:[%s1139_s14 + $0x360] sm:$0xff]  ;;  %v450_v56 = vld [vmem:[%s1139_s14 + $0x370] sm:$0xff]  ;;  %v506_v59 = vpack.c.bf16 %v418_v54, %v416_v53  ;;  %550 = vmatpush.bf16.msra.mxu0 %v474_v57  ;;  %v467_v41 = vld [vmem:[%s1139_s14 + $0x3f8] sm:$0xff]  ;;  %v1222_v57 = vpack.c.b16 %v536_v37, %v536_v37 }
  0x2b   : > { %v348_v60 = vld [vmem:[%s1139_s14 + $0x40] sm:$0xff]  ;;  %v350_v61 = vld [vmem:[%s1139_s14 + $0x50] sm:$0xff]  ;;  %v522_v63 = vpack.c.bf16 %v450_v56, %v448_v55  ;;  %563 = vmatpush.bf16.msra.mxu1 %v490_v58  ;;  %v365_v48 = vld [vmem:[%s1139_s14 + $0xc8] sm:$0xff]  ;;  %v531_v53 = vpack.c.bf16 %v467_v41, %v465_v40 }
  0x2c   : > { %v380_v62 = vld [vmem:[%s1139_s14 + $0x140] sm:$0xff]  ;;  %v382_v0 = vld [vmem:[%s1139_s14 + $0x150] sm:$0xff]  ;;  %v472_v5 = vpack.c.bf16 %v350_v61, %v348_v60  ;;  %576 = vmatpush.bf16.msra.mxu2 %v506_v59  ;;  %v367_v49 = vld [vmem:[%s1139_s14 + $0xd8] sm:$0xff]  ;;  %v1226_v60 = vpack.c.b16 %v537_v42, %v537_v42 }
  0x2d   : > { %v412_v1 = vld [vmem:[%s1139_s14 + $0x240] sm:$0xff]  ;;  %v414_v2 = vld [vmem:[%s1139_s14 + $0x250] sm:$0xff]  ;;  %v488_v6 = vpack.c.bf16 %v382_v0, %v380_v62  ;;  %589 = vmatpush.bf16.msra.mxu3 %v522_v63  ;;  %v397_v50 = vld [vmem:[%s1139_s14 + $0x1c8] sm:$0xff]  ;;  %v481_v62 = vpack.c.bf16 %v367_v49, %v365_v48 }
  0x2e   : > { %v444_v3 = vld [vmem:[%s1139_s14 + $0x340] sm:$0xff]  ;;  %v446_v4 = vld [vmem:[%s1139_s14 + $0x350] sm:$0xff]  ;;  %v504_v7 = vpack.c.bf16 %v414_v2, %v412_v1  ;;  %551 = vmatpush.bf16.msra.mxu0 %v472_v5  ;;  %v399_v54 = vld [vmem:[%s1139_s14 + $0x1d8] sm:$0xff] }
  0x2f   : > { %v344_v8 = vld [vmem:[%s1139_s14 + $0x20] sm:$0xff]  ;;  %v346_v9 = vld [vmem:[%s1139_s14 + $0x30] sm:$0xff]  ;;  %v520_v11 = vpack.c.bf16 %v446_v4, %v444_v3  ;;  %564 = vmatpush.bf16.msra.mxu1 %v488_v6  ;;  %v429_v55 = vld [vmem:[%s1139_s14 + $0x2c8] sm:$0xff]  ;;  %v497_v0 = vpack.c.bf16 %v399_v54, %v397_v50 }
  0x30   : > { %v376_v10 = vld [vmem:[%s1139_s14 + $0x120] sm:$0xff]  ;;  %v378_v12 = vld [vmem:[%s1139_s14 + $0x130] sm:$0xff]  ;;  %v470_v17 = vpack.c.bf16 %v346_v9, %v344_v8  ;;  %577 = vmatpush.bf16.msra.mxu2 %v504_v7  ;;  %v431_v56 = vld [vmem:[%s1139_s14 + $0x2d8] sm:$0xff] }
  0x31   : > { %v408_v13 = vld [vmem:[%s1139_s14 + $0x220] sm:$0xff]  ;;  %v410_v14 = vld [vmem:[%s1139_s14 + $0x230] sm:$0xff]  ;;  %v486_v21 = vpack.c.bf16 %v378_v12, %v376_v10  ;;  %590 = vmatpush.bf16.msra.mxu3 %v520_v11  ;;  %v461_v58 = vld [vmem:[%s1139_s14 + $0x3c8] sm:$0xff]  ;;  %v513_v1 = vpack.c.bf16 %v431_v56, %v429_v55 }
  0x32   : > { %v440_v15 = vld [vmem:[%s1139_s14 + $0x320] sm:$0xff]  ;;  %v442_v16 = vld [vmem:[%s1139_s14 + $0x330] sm:$0xff]  ;;  %v502_v22 = vpack.c.bf16 %v410_v14, %v408_v13  ;;  %552 = vmatpush.bf16.msra.mxu0 %v470_v17  ;;  %v463_v59 = vld [vmem:[%s1139_s14 + $0x3d8] sm:$0xff] }
  0x33   : > { %v340_v18 = vld [vmem:[%s1139_s14] sm:$0xff]  ;;  %v342_v19 = vld [vmem:[%s1139_s14 + $0x10] sm:$0xff]  ;;  %v518_v26 = vpack.c.bf16 %v442_v16, %v440_v15  ;;  %565 = vmatpush.bf16.msra.mxu1 %v486_v21  ;;  %v361_v2 = vld [vmem:[%s1139_s14 + $0xa8] sm:$0xff]  ;;  %v529_v5 = vpack.c.bf16 %v463_v59, %v461_v58 }
  0x34   : > { %v372_v20 = vld [vmem:[%s1139_s14 + $0x100] sm:$0xff]  ;;  %v374_v23 = vld [vmem:[%s1139_s14 + $0x110] sm:$0xff]  ;;  %v468_v33 = vpack.c.bf16 %v342_v19, %v340_v18  ;;  %578 = vmatpush.bf16.msra.mxu2 %v502_v22  ;;  %v363_v3 = vld [vmem:[%s1139_s14 + $0xb8] sm:$0xff] }
  0x35   : > { %v404_v24 = vld [vmem:[%s1139_s14 + $0x200] sm:$0xff]  ;;  %v406_v25 = vld [vmem:[%s1139_s14 + $0x210] sm:$0xff]  ;;  %v484_v38 = vpack.c.bf16 %v374_v23, %v372_v20  ;;  %591 = vmatpush.bf16.msra.mxu3 %v518_v26  ;;  %v393_v4 = vld [vmem:[%s1139_s14 + $0x1a8] sm:$0xff]  ;;  %v479_v11 = vpack.c.bf16 %v363_v3, %v361_v2 }
  0x36   : > { %v436_v27 = vld [vmem:[%s1139_s14 + $0x300] sm:$0xff]  ;;  %v438_v28 = vld [vmem:[%s1139_s14 + $0x310] sm:$0xff]  ;;  %v500_v39 = vpack.c.bf16 %v406_v25, %v404_v24  ;;  %553 = vmatpush.bf16.msra.mxu0 %v468_v33  ;;  %v395_v6 = vld [vmem:[%s1139_s14 + $0x1b8] sm:$0xff] }
  0x37   : > { %v516_v43 = vpack.c.bf16 %v438_v28, %v436_v27  ;;  %v338_v45 = vld [vmem:[%s1134_s10] sm:$0xff]  ;;  %566 = vmatpush.bf16.msra.mxu1 %v484_v38  ;;  %v425_v7 = vld [vmem:[%s1139_s14 + $0x2a8] sm:$0xff]  ;;  %v427_v8 = vld [vmem:[%s1139_s14 + $0x2b8] sm:$0xff]  ;;  %v495_v12 = vpack.c.bf16 %v395_v6, %v393_v4 }
  0x38   : > { %v534_v51 = vunpack.c.l.b16 %v338_v45  ;;  %v535_v52 = vunpack.c.h.b16 %v338_v45  ;;  %579 = vmatpush.bf16.msra.mxu2 %v500_v39  ;;  %v457_v9 = vld [vmem:[%s1139_s14 + $0x3a8] sm:$0xff]  ;;  %v459_v10 = vld [vmem:[%s1139_s14 + $0x3b8] sm:$0xff]  ;;  %v511_v13 = vpack.c.bf16 %v427_v8, %v425_v7 }
  0x39   : > { %592 = vmatpush.bf16.msra.mxu3 %v516_v43  ;;  %v357_v14 = vld [vmem:[%s1139_s14 + $0x88] sm:$0xff]  ;;  %v359_v15 = vld [vmem:[%s1139_s14 + $0x98] sm:$0xff]  ;;  %v527_v17 = vpack.c.bf16 %v459_v10, %v457_v9 }
  0x3a   : > { %v1228_v61 = vpack.c.b16 %v534_v51, %v534_v51  ;;  %598 = vmatpush.bf16.msrb.mxu0 %v483_v44  ;;  %v1230_v63 = vpack.c.b16 %v535_v52, %v535_v52  ;;  %v389_v16 = vld [vmem:[%s1139_s14 + $0x188] sm:$0xff]  ;;  %v391_v18 = vld [vmem:[%s1139_s14 + $0x198] sm:$0xff]  ;;  %v477_v23 = vpack.c.bf16 %v359_v15, %v357_v14 }
  0x3b   : > { %611 = vmatpush.bf16.msrb.mxu1 %v499_v46  ;;  %580 = vmatmul.bf16.vlgmr.msra.gmra.mxu2 %v1222_v57  ;;  %v421_v19 = vld [vmem:[%s1139_s14 + $0x288] sm:$0xff]  ;;  %v423_v20 = vld [vmem:[%s1139_s14 + $0x298] sm:$0xff]  ;;  %v493_v24 = vpack.c.bf16 %v391_v18, %v389_v16 }
  0x3c   : > { %624 = vmatpush.bf16.msrb.mxu2 %v515_v47  ;;  %593 = vmatmul.bf16.vlgmr.msra.gmra.mxu3 %v1226_v60  ;;  %v453_v21 = vld [vmem:[%s1139_s14 + $0x388] sm:$0xff]  ;;  %v455_v22 = vld [vmem:[%s1139_s14 + $0x398] sm:$0xff]  ;;  %v509_v25 = vpack.c.bf16 %v423_v20, %v421_v19 }
  0x3d   : > { %637 = vmatpush.bf16.msrb.mxu3 %v531_v53  ;;  %554 = vmatmul.bf16.vlgmr.msra.gmra.mxu0 %v1228_v61  ;;  %v353_v26 = vld [vmem:[%s1139_s14 + $0x68] sm:$0xff]  ;;  %v355_v27 = vld [vmem:[%s1139_s14 + $0x78] sm:$0xff]  ;;  %v525_v29 = vpack.c.bf16 %v455_v22, %v453_v21  ;;  %v336_v21 = vld [vmem:[#allocation2] sm:$0xff] }
  0x3e   : > { %599 = vmatpush.bf16.msrb.mxu0 %v481_v62  ;;  %567 = vmatmul.bf16.vlgmr.msra.gmra.mxu1 %v1230_v63  ;;  %v385_v28 = vld [vmem:[%s1139_s14 + $0x168] sm:$0xff]  ;;  %v387_v30 = vld [vmem:[%s1139_s14 + $0x178] sm:$0xff]  ;;  %v475_v35 = vpack.c.bf16 %v355_v27, %v353_v26 }
  0x3f   : > { %612 = vmatpush.bf16.msrb.mxu1 %v497_v0  ;;  %v417_v31 = vld [vmem:[%s1139_s14 + $0x268] sm:$0xff]  ;;  %v419_v32 = vld [vmem:[%s1139_s14 + $0x278] sm:$0xff]  ;;  %v491_v36 = vpack.c.bf16 %v387_v30, %v385_v28 }
  0x40   : > { %625 = vmatpush.bf16.msrb.mxu2 %v513_v1  ;;  %v449_v33 = vld [vmem:[%s1139_s14 + $0x368] sm:$0xff]  ;;  %v451_v34 = vld [vmem:[%s1139_s14 + $0x378] sm:$0xff]  ;;  %v507_v37 = vpack.c.bf16 %v419_v32, %v417_v31 }
  0x41   : > { %638 = vmatpush.bf16.msrb.mxu3 %v529_v5  ;;  %v349_v38 = vld [vmem:[%s1139_s14 + $0x48] sm:$0xff]  ;;  %v351_v39 = vld [vmem:[%s1139_s14 + $0x58] sm:$0xff]  ;;  %v523_v41 = vpack.c.bf16 %v451_v34, %v449_v33 }
  0x42   : > { %600 = vmatpush.bf16.msrb.mxu0 %v479_v11  ;;  %v381_v40 = vld [vmem:[%s1139_s14 + $0x148] sm:$0xff]  ;;  %v383_v42 = vld [vmem:[%s1139_s14 + $0x158] sm:$0xff]  ;;  %v473_v47 = vpack.c.bf16 %v351_v39, %v349_v38 }
  0x43   : > { %613 = vmatpush.bf16.msrb.mxu1 %v495_v12  ;;  %v413_v43 = vld [vmem:[%s1139_s14 + $0x248] sm:$0xff]  ;;  %v415_v44 = vld [vmem:[%s1139_s14 + $0x258] sm:$0xff]  ;;  %v489_v48 = vpack.c.bf16 %v383_v42, %v381_v40 }
  0x44   : > { %626 = vmatpush.bf16.msrb.mxu2 %v511_v13  ;;  %v445_v45 = vld [vmem:[%s1139_s14 + $0x348] sm:$0xff]  ;;  %v447_v46 = vld [vmem:[%s1139_s14 + $0x358] sm:$0xff]  ;;  %v505_v49 = vpack.c.bf16 %v415_v44, %v413_v43 }
  0x45   : > { %639 = vmatpush.bf16.msrb.mxu3 %v527_v17  ;;  %v345_v50 = vld [vmem:[%s1139_s14 + $0x28] sm:$0xff]  ;;  %v347_v51 = vld [vmem:[%s1139_s14 + $0x38] sm:$0xff]  ;;  %v521_v53 = vpack.c.bf16 %v447_v46, %v445_v45 }
  0x46   : > { %601 = vmatpush.bf16.msrb.mxu0 %v477_v23  ;;  %v377_v52 = vld [vmem:[%s1139_s14 + $0x128] sm:$0xff]  ;;  %v379_v54 = vld [vmem:[%s1139_s14 + $0x138] sm:$0xff]  ;;  %v471_v62 = vpack.c.bf16 %v347_v51, %v345_v50 }
  0x47   : > { %614 = vmatpush.bf16.msrb.mxu1 %v493_v24  ;;  %v409_v55 = vld [vmem:[%s1139_s14 + $0x228] sm:$0xff]  ;;  %v411_v56 = vld [vmem:[%s1139_s14 + $0x238] sm:$0xff]  ;;  %v487_v0 = vpack.c.bf16 %v379_v54, %v377_v52 }
  0x48   : > { %627 = vmatpush.bf16.msrb.mxu2 %v509_v25  ;;  %v441_v58 = vld [vmem:[%s1139_s14 + $0x328] sm:$0xff]  ;;  %v443_v59 = vld [vmem:[%s1139_s14 + $0x338] sm:$0xff]  ;;  %v503_v1 = vpack.c.bf16 %v411_v56, %v409_v55 }
  0x49   : > { %640 = vmatpush.bf16.msrb.mxu3 %v525_v29  ;;  %v341_v2 = vld [vmem:[%s1139_s14 + $0x8] sm:$0xff]  ;;  %v343_v3 = vld [vmem:[%s1139_s14 + $0x18] sm:$0xff]  ;;  %v519_v5 = vpack.c.bf16 %v443_v59, %v441_v58 }
  0x4a   : > { %602 = vmatpush.bf16.msrb.mxu0 %v475_v35  ;;  %v373_v4 = vld [vmem:[%s1139_s14 + $0x108] sm:$0xff]  ;;  %v375_v6 = vld [vmem:[%s1139_s14 + $0x118] sm:$0xff]  ;;  %v469_v11 = vpack.c.bf16 %v343_v3, %v341_v2 }
  0x4b   : > { %615 = vmatpush.bf16.msrb.mxu1 %v491_v36  ;;  %v405_v7 = vld [vmem:[%s1139_s14 + $0x208] sm:$0xff]  ;;  %v407_v8 = vld [vmem:[%s1139_s14 + $0x218] sm:$0xff]  ;;  %v485_v12 = vpack.c.bf16 %v375_v6, %v373_v4 }
  0x4c   : > { %628 = vmatpush.bf16.msrb.mxu2 %v507_v37  ;;  %v437_v9 = vld [vmem:[%s1139_s14 + $0x308] sm:$0xff]  ;;  %v439_v10 = vld [vmem:[%s1139_s14 + $0x318] sm:$0xff]  ;;  %v501_v13 = vpack.c.bf16 %v407_v8, %v405_v7 }
  0x4d   : > { %641 = vmatpush.bf16.msrb.mxu3 %v523_v41  ;;  %v517_v14 = vpack.c.bf16 %v439_v10, %v437_v9  ;;  %v337_v31 = vld [vmem:[#allocation2 + $0x8] sm:$0xff] }
  0x4e   : > { %603 = vmatpush.bf16.msrb.mxu0 %v473_v47 }
  0x4f   : > { %616 = vmatpush.bf16.msrb.mxu1 %v489_v48 }
  0x50   : > { %629 = vmatpush.bf16.msrb.mxu2 %v505_v49 }
  0x51   : > { %642 = vmatpush.bf16.msrb.mxu3 %v521_v53 }
  0x52   : > { %604 = vmatpush.bf16.msrb.mxu0 %v471_v62 }
  0x53   : > { %617 = vmatpush.bf16.msrb.mxu1 %v487_v0 }
  0x54   : > { %630 = vmatpush.bf16.msrb.mxu2 %v503_v1 }
  0x55   : > { %643 = vmatpush.bf16.msrb.mxu3 %v519_v5 }
  0x56   : > { %605 = vmatpush.bf16.msrb.mxu0 %v469_v11 }
  0x57   : > { %618 = vmatpush.bf16.msrb.mxu1 %v485_v12 }
  0x58   : > { %631 = vmatpush.bf16.msrb.mxu2 %v501_v13 }
  0x59   : > { %644 = vmatpush.bf16.msrb.mxu3 %v517_v14  ;;  %606 = vmatmul.bf16.vlgmr.msrb.gmra.mxu0 %v1228_v61 }
  0x5a   : > { %619 = vmatmul.bf16.vlgmr.msrb.gmra.mxu1 %v1230_v63 }
  0x5b   : > { %632 = vmatmul.bf16.vlgmr.msrb.gmra.mxu2 %v1222_v57 }
  0x5c   : > { %645 = vmatmul.bf16.vlgmr.msrb.gmra.mxu3 %v1226_v60 }
  0xba   : > { %v555_v15 = vpop.f32.mrf.mxu0 }
  0xbb   : > { %v568_v16 = vpop.f32.mrf.mxu1 }
  0xbc   : > { %v569_v17 = vadd.f32 %v568_v16, %v555_v15 }
  0xbe   : > { %v581_v18 = vpop.f32.mrf.mxu2 }
  0xbf   : > { %v582_v19 = vadd.f32 %v581_v18, %v569_v17  ;;  %v594_v20 = vpop.f32.mrf.mxu3 }
  0xc1   : > { %v595_v22 = vadd.f32 %v594_v20, %v582_v19 }
  0xc2   : > { %v557_v23 = vpop.f32.mrf.mxu0 }
  0xc3   : > { %v570_v24 = vpop.f32.mrf.mxu1  ;;  %v650_v25 = vadd.f32 %v595_v22, %v336_v21 }
  0xc5   : > { %652 = vst [vmem:[#allocation2] sm:$0xff] %v650_v25 }
  0xc6   : > { %v583_v26 = vpop.f32.mrf.mxu2 }
  0xc7   : > { %v596_v61 = vpop.f32.mrf.mxu3 }
  0xd6   : > { %v607_v27 = vpop.f32.mrf.mxu0 }
  0xd7   : > { %v620_v63 = vpop.f32.mrf.mxu1 }
  0xd8   : > { %v621_v28 = vadd.f32 %v620_v63, %v607_v27 }
  0xde   : > { %v633_v57 = vpop.f32.mrf.mxu2  ;;  %v609_v30 = vpop.f32.mrf.mxu0 }
  0xdf   : > { %v634_v29 = vadd.f32 %v633_v57, %v621_v28  ;;  %v646_v60 = vpop.f32.mrf.mxu3  ;;  %v622_v32 = vpop.f32.mrf.mxu1 }
  0xe1   : > { %v647_v33 = vadd.f32 %v646_v60, %v634_v29 }
  0xe3   : > { %v651_v34 = vadd.f32 %v647_v33, %v337_v31  ;;  %657 = sbr.rel (%p1011_p7) target bundleno = 677 (0x2a5), region = 56 }
  0xe5   : > { %653 = vst [vmem:[#allocation2 + $0x8] sm:$0xff] %v651_v34 }
  0xe6   : > { %v635_v35 = vpop.f32.mrf.mxu2 }
  0xe7   : > { %v648_v36 = vpop.f32.mrf.mxu3 }
  0xe8   : > { %v689_v37 = vld [vmem:[%s1601_s3 + $0xe0] sm:$0xff]  ;;  %v691_v38 = vld [vmem:[%s1601_s3 + $0xf0] sm:$0xff]  ;;  %v690_v42 = vld [vmem:[%s1601_s3 + $0xe8] sm:$0xff] }
  0xe9   : > { %v721_v39 = vld [vmem:[%s1601_s3 + $0x1e0] sm:$0xff]  ;;  %v784_v40 = vpack.c.bf16 %v691_v38, %v689_v37  ;;  %v723_v41 = vld [vmem:[%s1601_s3 + $0x1f0] sm:$0xff]  ;;  %v692_v43 = vld [vmem:[%s1601_s3 + $0xf8] sm:$0xff] }
  0xea   : > { %v800_v44 = vpack.c.bf16 %v723_v41, %v721_v39  ;;  %v785_v45 = vpack.c.bf16 %v692_v43, %v690_v42  ;;  %v722_v46 = vld [vmem:[%s1601_s3 + $0x1e8] sm:$0xff]  ;;  %v724_v47 = vld [vmem:[%s1601_s3 + $0x1f8] sm:$0xff]  ;;  %v685_v48 = vld [vmem:[%s1601_s3 + $0xc0] sm:$0xff] }
  0xeb   : > { %807 = vmatpush.bf16.msra.mxu0 %v784_v40  ;;  %v801_v49 = vpack.c.bf16 %v724_v47, %v722_v46  ;;  %v687_v50 = vld [vmem:[%s1601_s3 + $0xd0] sm:$0xff]  ;;  %v717_v51 = vld [vmem:[%s1601_s3 + $0x1c0] sm:$0xff]  ;;  %v686_v55 = vld [vmem:[%s1601_s3 + $0xc8] sm:$0xff] }
  0xec   : > { %v719_v52 = vld [vmem:[%s1601_s3 + $0x1d0] sm:$0xff]  ;;  %820 = vmatpush.bf16.msra.mxu1 %v800_v44  ;;  %833 = vmatpush.bf16.msra.mxu2 %v785_v45  ;;  %v782_v53 = vpack.c.bf16 %v687_v50, %v685_v48  ;;  %v688_v56 = vld [vmem:[%s1601_s3 + $0xd8] sm:$0xff]  ;;  %v718_v58 = vld [vmem:[%s1601_s3 + $0x1c8] sm:$0xff] }
  0xed   : > { %v798_v54 = vpack.c.bf16 %v719_v52, %v717_v51  ;;  %846 = vmatpush.bf16.msra.mxu3 %v801_v49  ;;  %v783_v59 = vpack.c.bf16 %v688_v56, %v686_v55  ;;  %v720_v62 = vld [vmem:[%s1601_s3 + $0x1d8] sm:$0xff]  ;;  %v681_v0 = vld [vmem:[%s1601_s3 + $0xa0] sm:$0xff]  ;;  %v683_v1 = vld [vmem:[%s1601_s3 + $0xb0] sm:$0xff] }
  0xee   : > { %v799_v2 = vpack.c.bf16 %v720_v62, %v718_v58  ;;  %v713_v3 = vld [vmem:[%s1601_s3 + $0x1a0] sm:$0xff]  ;;  %v715_v4 = vld [vmem:[%s1601_s3 + $0x1b0] sm:$0xff]  ;;  %v682_v5 = vld [vmem:[%s1601_s3 + $0xa8] sm:$0xff]  ;;  %v780_v6 = vpack.c.bf16 %v683_v1, %v681_v0 }
  0xef   : > { %808 = vmatpush.bf16.msra.mxu0 %v782_v53  ;;  %v684_v7 = vld [vmem:[%s1601_s3 + $0xb8] sm:$0xff]  ;;  %v714_v8 = vld [vmem:[%s1601_s3 + $0x1a8] sm:$0xff]  ;;  %v796_v10 = vpack.c.bf16 %v715_v4, %v713_v3  ;;  %v677_v12 = vld [vmem:[%s1601_s3 + $0x80] sm:$0xff] }
  0xf0   : > { %v716_v9 = vld [vmem:[%s1601_s3 + $0x1b8] sm:$0xff]  ;;  %821 = vmatpush.bf16.msra.mxu1 %v798_v54  ;;  %834 = vmatpush.bf16.msra.mxu2 %v783_v59  ;;  %v781_v11 = vpack.c.bf16 %v684_v7, %v682_v5  ;;  %v679_v13 = vld [vmem:[%s1601_s3 + $0x90] sm:$0xff]  ;;  %v709_v14 = vld [vmem:[%s1601_s3 + $0x180] sm:$0xff] }
  0xf1   : > { %847 = vmatpush.bf16.msra.mxu3 %v799_v2  ;;  %v797_v15 = vpack.c.bf16 %v716_v9, %v714_v8  ;;  %v711_v16 = vld [vmem:[%s1601_s3 + $0x190] sm:$0xff]  ;;  %v678_v17 = vld [vmem:[%s1601_s3 + $0x88] sm:$0xff]  ;;  %v680_v18 = vld [vmem:[%s1601_s3 + $0x98] sm:$0xff]  ;;  %v778_v21 = vpack.c.bf16 %v679_v13, %v677_v12 }
  0xf2   : > { %v710_v19 = vld [vmem:[%s1601_s3 + $0x188] sm:$0xff]  ;;  %v712_v20 = vld [vmem:[%s1601_s3 + $0x198] sm:$0xff]  ;;  %v794_v22 = vpack.c.bf16 %v711_v16, %v709_v14  ;;  %v779_v23 = vpack.c.bf16 %v680_v18, %v678_v17  ;;  %v673_v24 = vld [vmem:[%s1601_s3 + $0x60] sm:$0xff] }
  0xf3   : > { %809 = vmatpush.bf16.msra.mxu0 %v780_v6  ;;  %v675_v25 = vld [vmem:[%s1601_s3 + $0x70] sm:$0xff]  ;;  %v705_v26 = vld [vmem:[%s1601_s3 + $0x160] sm:$0xff]  ;;  %v795_v61 = vpack.c.bf16 %v712_v20, %v710_v19  ;;  %v674_v63 = vld [vmem:[%s1601_s3 + $0x68] sm:$0xff] }
  0xf4   : > { %822 = vmatpush.bf16.msra.mxu1 %v796_v10  ;;  %835 = vmatpush.bf16.msra.mxu2 %v781_v11  ;;  %v707_v27 = vld [vmem:[%s1601_s3 + $0x170] sm:$0xff]  ;;  %v676_v28 = vld [vmem:[%s1601_s3 + $0x78] sm:$0xff]  ;;  %v706_v57 = vld [vmem:[%s1601_s3 + $0x168] sm:$0xff]  ;;  %v776_v60 = vpack.c.bf16 %v675_v25, %v673_v24 }
  0xf5   : > { %848 = vmatpush.bf16.msra.mxu3 %v797_v15  ;;  %v708_v29 = vld [vmem:[%s1601_s3 + $0x178] sm:$0xff]  ;;  %v792_v30 = vpack.c.bf16 %v707_v27, %v705_v26  ;;  %v777_v31 = vpack.c.bf16 %v676_v28, %v674_v63  ;;  %v669_v32 = vld [vmem:[%s1601_s3 + $0x40] sm:$0xff]  ;;  %v671_v33 = vld [vmem:[%s1601_s3 + $0x50] sm:$0xff] }
  0xf6   : > { %v701_v34 = vld [vmem:[%s1601_s3 + $0x140] sm:$0xff]  ;;  %v793_v35 = vpack.c.bf16 %v708_v29, %v706_v57  ;;  %v703_v36 = vld [vmem:[%s1601_s3 + $0x150] sm:$0xff]  ;;  %v670_v37 = vld [vmem:[%s1601_s3 + $0x48] sm:$0xff]  ;;  %v774_v41 = vpack.c.bf16 %v671_v33, %v669_v32 }
  0xf7   : > { %810 = vmatpush.bf16.msra.mxu0 %v778_v21  ;;  %v672_v38 = vld [vmem:[%s1601_s3 + $0x58] sm:$0xff]  ;;  %v702_v39 = vld [vmem:[%s1601_s3 + $0x148] sm:$0xff]  ;;  %v665_v42 = vld [vmem:[%s1601_s3 + $0x20] sm:$0xff]  ;;  %v790_v44 = vpack.c.bf16 %v703_v36, %v701_v34 }
  0xf8   : > { %823 = vmatpush.bf16.msra.mxu1 %v794_v22  ;;  %836 = vmatpush.bf16.msra.mxu2 %v779_v23  ;;  %v704_v40 = vld [vmem:[%s1601_s3 + $0x158] sm:$0xff]  ;;  %v667_v43 = vld [vmem:[%s1601_s3 + $0x30] sm:$0xff]  ;;  %v775_v45 = vpack.c.bf16 %v672_v38, %v670_v37  ;;  %v697_v46 = vld [vmem:[%s1601_s3 + $0x120] sm:$0xff] }
  0xf9   : > { %849 = vmatpush.bf16.msra.mxu3 %v795_v61  ;;  %v699_v47 = vld [vmem:[%s1601_s3 + $0x130] sm:$0xff]  ;;  %v666_v48 = vld [vmem:[%s1601_s3 + $0x28] sm:$0xff]  ;;  %v791_v49 = vpack.c.bf16 %v704_v40, %v702_v39  ;;  %v668_v50 = vld [vmem:[%s1601_s3 + $0x38] sm:$0xff]  ;;  %v772_v59 = vpack.c.bf16 %v667_v43, %v665_v42 }
  0xfa   : > { %v658_v51 = vld [vmem:[#allocation2] sm:$0xff]  ;;  %v698_v53 = vld [vmem:[%s1601_s3 + $0x128] sm:$0xff]  ;;  %v700_v54 = vld [vmem:[%s1601_s3 + $0x138] sm:$0xff]  ;;  %v788_v62 = vpack.c.bf16 %v699_v47, %v697_v46  ;;  %v773_v1 = vpack.c.bf16 %v668_v50, %v666_v48 }
  0xfb   : > { %811 = vmatpush.bf16.msra.mxu0 %v776_v60  ;;  %v660_v52 = vld [vmem:[%s1600_s2] sm:$0x3]  ;;  %v659_v56 = vld [vmem:[#allocation2 + $0x8] sm:$0xff]  ;;  %v663_v2 = vld [vmem:[%s1601_s3 + $0x10] sm:$0xff]  ;;  %v789_v7 = vpack.c.bf16 %v700_v54, %v698_v53 }
  0xfc   : > { %824 = vmatpush.bf16.msra.mxu1 %v792_v30  ;;  %837 = vmatpush.bf16.msra.mxu2 %v777_v31  ;;  %v760_v55 = vperm.slane %v660_v52, 0  ;;  %v761_v58 = vperm.slane %v660_v52, 1  ;;  %v661_v0 = vld [vmem:[%s1601_s3] sm:$0xff]  ;;  %v695_v4 = vld [vmem:[%s1601_s3 + $0x110] sm:$0xff]  ;;  %v662_v8 = vld [vmem:[%s1601_s3 + $0x8] sm:$0xff] }
  0xfd   : > { %850 = vmatpush.bf16.msra.mxu3 %v793_v35  ;;  %v693_v3 = vld [vmem:[%s1601_s3 + $0x100] sm:$0xff]  ;;  %v664_v9 = vld [vmem:[%s1601_s3 + $0x18] sm:$0xff]  ;;  %v694_v10 = vld [vmem:[%s1601_s3 + $0x108] sm:$0xff]  ;;  %v770_v15 = vpack.c.bf16 %v663_v2, %v661_v0 }
  0xfe   : > { %v764_v5 = vadd.f32 %v760_v55, %v658_v51  ;;  %v765_v6 = vadd.f32 %v761_v58, %v659_v56  ;;  %v696_v11 = vld [vmem:[%s1601_s3 + $0x118] sm:$0xff]  ;;  %v740_v13 = vld [vmem:[%s1603_s5 + $0x70] sm:$0xff]  ;;  %v786_v19 = vpack.c.bf16 %v695_v4, %v693_v3  ;;  %v771_v20 = vpack.c.bf16 %v664_v9, %v662_v8  ;;  %v738_v24 = vld [vmem:[%s1603_s5 + $0x60] sm:$0xff] }
  0xff   : > { %812 = vmatpush.bf16.msra.mxu0 %v774_v41  ;;  %v741_v14 = vld [vmem:[%s1603_s5 + $0x78] sm:$0xff]  ;;  %v756_v17 = vld [vmem:[%s1603_s5 + $0xf0] sm:$0xff]  ;;  %v787_v21 = vpack.c.bf16 %v696_v11, %v694_v10  ;;  %v739_v25 = vld [vmem:[%s1603_s5 + $0x68] sm:$0xff] }
 0x100   : > { %825 = vmatpush.bf16.msra.mxu1 %v790_v44  ;;  %838 = vmatpush.bf16.msra.mxu2 %v775_v45  ;;  %v766_v12 = vmax.f32 %v764_v5, 0.0  ;;  %v767_v16 = vmax.f32 %v765_v6, 0.0  ;;  %v757_v18 = vld [vmem:[%s1603_s5 + $0xf8] sm:$0xff]  ;;  %v870_v22 = vpack.c.bf16 %v741_v14, %v740_v13  ;;  %v754_v27 = vld [vmem:[%s1603_s5 + $0xe0] sm:$0xff]  ;;  %v755_v63 = vld [vmem:[%s1603_s5 + $0xe8] sm:$0xff]  ;;  %v869_v28 = vpack.c.bf16 %v739_v25, %v738_v24 }
 0x101   : > { %851 = vmatpush.bf16.msra.mxu3 %v791_v49  ;;  %v878_v26 = vpack.c.bf16 %v757_v18, %v756_v17  ;;  %v736_v57 = vld [vmem:[%s1603_s5 + $0x50] sm:$0xff]  ;;  %v737_v29 = vld [vmem:[%s1603_s5 + $0x58] sm:$0xff]  ;;  %v877_v60 = vpack.c.bf16 %v755_v63, %v754_v27  ;;  %v734_v33 = vld [vmem:[%s1603_s5 + $0x40] sm:$0xff] }
 0x102   : > { %v768_v23 = vpack.c.bf16 %v766_v12, %v766_v12  ;;  %v769_v61 = vpack.c.bf16 %v767_v16, %v767_v16  ;;  %v752_v30 = vld [vmem:[%s1603_s5 + $0xd0] sm:$0xff]  ;;  %v753_v31 = vld [vmem:[%s1603_s5 + $0xd8] sm:$0xff]  ;;  %v868_v32 = vpack.c.bf16 %v737_v29, %v736_v57  ;;  %v735_v34 = vld [vmem:[%s1603_s5 + $0x48] sm:$0xff] }
 0x103   : > { %813 = vmatpush.bf16.msra.mxu0 %v772_v59  ;;  %v876_v35 = vpack.c.bf16 %v753_v31, %v752_v30  ;;  %v750_v36 = vld [vmem:[%s1603_s5 + $0xc0] sm:$0xff]  ;;  %v751_v37 = vld [vmem:[%s1603_s5 + $0xc8] sm:$0xff]  ;;  %v867_v38 = vpack.c.bf16 %v735_v34, %v734_v33  ;;  %v732_v39 = vld [vmem:[%s1603_s5 + $0x30] sm:$0xff] }
 0x104   : > { %826 = vmatpush.bf16.msra.mxu1 %v788_v62  ;;  %839 = vmatpush.bf16.msra.mxu2 %v773_v1  ;;  %v733_v40 = vld [vmem:[%s1603_s5 + $0x38] sm:$0xff]  ;;  %v875_v41 = vpack.c.bf16 %v751_v37, %v750_v36  ;;  %v730_v43 = vld [vmem:[%s1603_s5 + $0x20] sm:$0xff]  ;;  %v731_v44 = vld [vmem:[%s1603_s5 + $0x28] sm:$0xff] }
 0x105   : > { %852 = vmatpush.bf16.msra.mxu3 %v789_v7  ;;  %v866_v42 = vpack.c.bf16 %v733_v40, %v732_v39  ;;  %v865_v45 = vpack.c.bf16 %v731_v44, %v730_v43  ;;  %v748_v46 = vld [vmem:[%s1603_s5 + $0xb0] sm:$0xff]  ;;  %v749_v47 = vld [vmem:[%s1603_s5 + $0xb8] sm:$0xff]  ;;  %v746_v52 = vld [vmem:[%s1603_s5 + $0xa0] sm:$0xff] }
 0x106   : > { %v874_v48 = vpack.c.bf16 %v749_v47, %v748_v46  ;;  %v728_v49 = vld [vmem:[%s1603_s5 + $0x10] sm:$0xff]  ;;  %v729_v50 = vld [vmem:[%s1603_s5 + $0x18] sm:$0xff]  ;;  %v747_v53 = vld [vmem:[%s1603_s5 + $0xa8] sm:$0xff] }
 0x107   : > { %814 = vmatpush.bf16.msra.mxu0 %v770_v15  ;;  %v864_v51 = vpack.c.bf16 %v729_v50, %v728_v49  ;;  %v873_v54 = vpack.c.bf16 %v747_v53, %v746_v52  ;;  %v726_v55 = vld [vmem:[%s1603_s5] sm:$0xff]  ;;  %v727_v56 = vld [vmem:[%s1603_s5 + $0x8] sm:$0xff]  ;;  %v744_v59 = vld [vmem:[%s1603_s5 + $0x90] sm:$0xff] }
 0x108   : > { %827 = vmatpush.bf16.msra.mxu1 %v786_v19  ;;  %840 = vmatpush.bf16.msra.mxu2 %v771_v20  ;;  %v863_v58 = vpack.c.bf16 %v727_v56, %v726_v55  ;;  %v745_v62 = vld [vmem:[%s1603_s5 + $0x98] sm:$0xff]  ;;  %v742_v1 = vld [vmem:[%s1603_s5 + $0x80] sm:$0xff]  ;;  %v743_v2 = vld [vmem:[%s1603_s5 + $0x88] sm:$0xff] }
 0x109   : > { %853 = vmatpush.bf16.msra.mxu3 %v787_v21  ;;  %v872_v0 = vpack.c.bf16 %v745_v62, %v744_v59  ;;  %v871_v3 = vpack.c.bf16 %v743_v2, %v742_v1  ;;  %v725_v4 = vld [vmem:[%s1602_s4] sm:$0x3] }
 0x10a   : > { %815 = vmatmul.bf16.vlgmr.msra.gmra.mxu0 %v768_v23  ;;  %v803_v5 = vperm.slane %v725_v4, 0  ;;  %v804_v10 = vperm.slane %v725_v4, 1 }
 0x10b   : > { %882 = vmatpush.bf16.msrb.mxu0 %v870_v22  ;;  %828 = vmatmul.bf16.vlgmr.msra.gmra.mxu1 %v769_v61 }
 0x10c   : > { %895 = vmatpush.bf16.msrb.mxu1 %v878_v26  ;;  %841 = vmatmul.bf16.vlgmr.msra.gmra.mxu2 %v768_v23  ;;  %v1041_v23 = vld [vmem:[%s1604_s6] ss:$0 sm:$0xff] }
 0x10d   : > { %854 = vmatmul.bf16.vlgmr.msra.gmra.mxu3 %v769_v61 }
 0x10f   : > { %883 = vmatpush.bf16.msrb.mxu0 %v869_v28 }
 0x110   : > { %896 = vmatpush.bf16.msrb.mxu1 %v877_v60 }
 0x113   : > { %884 = vmatpush.bf16.msrb.mxu0 %v868_v32 }
 0x114   : > { %897 = vmatpush.bf16.msrb.mxu1 %v876_v35 }
 0x117   : > { %885 = vmatpush.bf16.msrb.mxu0 %v867_v38 }
 0x118   : > { %898 = vmatpush.bf16.msrb.mxu1 %v875_v41 }
 0x11b   : > { %886 = vmatpush.bf16.msrb.mxu0 %v866_v42 }
 0x11c   : > { %899 = vmatpush.bf16.msrb.mxu1 %v874_v48 }
 0x11f   : > { %887 = vmatpush.bf16.msrb.mxu0 %v865_v45 }
 0x120   : > { %900 = vmatpush.bf16.msrb.mxu1 %v873_v54 }
 0x123   : > { %888 = vmatpush.bf16.msrb.mxu0 %v864_v51 }
 0x124   : > { %901 = vmatpush.bf16.msrb.mxu1 %v872_v0 }
 0x127   : > { %889 = vmatpush.bf16.msrb.mxu0 %v863_v58 }
 0x128   : > { %902 = vmatpush.bf16.msrb.mxu1 %v871_v3 }
 0x187   : > { %v816_v6 = vpop.f32.mrf.mxu0 }
 0x188   : > { %v817_v7 = vadd.f32 %v816_v6, %v803_v5  ;;  %v829_v8 = vpop.f32.mrf.mxu1 }
 0x18a   : > { %v830_v9 = vadd.f32 %v829_v8, %v817_v7 }
 0x18c   : > { %v859_v11 = vmax.f32 %v830_v9, 0.0 }
 0x18e   : > { %v861_v12 = vpack.c.bf16 %v859_v11, %v859_v11 }
 0x18f   : > { %v842_v13 = vpop.f32.mrf.mxu2  ;;  %v818_v16 = vpop.f32.mrf.mxu0 }
 0x190   : > { %v843_v14 = vadd.f32 %v842_v13, %v804_v10  ;;  %v855_v15 = vpop.f32.mrf.mxu3  ;;  %v831_v17 = vpop.f32.mrf.mxu1  ;;  %890 = vmatmul.bf16.vlgmr.msrb.gmra.mxu0 %v861_v12 }
 0x192   : > { %v856_v18 = vadd.f32 %v855_v15, %v843_v14 }
 0x194   : > { %v860_v19 = vmax.f32 %v856_v18, 0.0 }
 0x196   : > { %v862_v20 = vpack.c.bf16 %v860_v19, %v860_v19 }
 0x197   : > { %v844_v21 = vpop.f32.mrf.mxu2 }
 0x198   : > { %v857_v22 = vpop.f32.mrf.mxu3  ;;  %903 = vmatmul.bf16.vlgmr.msrb.gmra.mxu1 %v862_v20 }
 0x20d   : > { %v891_v24 = vpop.f32.mrf.mxu0 }
 0x20e   : > { %v892_v25 = vadd.f32 %v1041_v23, %v891_v24 }
 0x215   : > { %v904_v26 = vpop.f32.mrf.mxu1  ;;  %v893_v27 = vpop.f32.mrf.mxu0 }
 0x216   : > { %v905_v61 = vadd.f32 %v904_v26, %v892_v25 }
 0x218   : > { %v908_v63 = vmul.f32 %v905_v61, %v905_v61 }
 0x21a   : > { %909 = vadd.xlane.f32.xlu0 %v908_v63 }
 0x21d   : > { %v906_v28 = vpop.f32.mrf.mxu1 }
 0x28d   : > { %v910_v57 = vpop.xlane.xlu0 %909 }
 0x28e   : > { %v911_v29 = vmax.f32 %v910_v57, 1e-24 }
 0x290   : > { %1042 = vrsqrt.f32 %v911_v29  ;;  %vm918_vm1 = vweird.f32 %v911_v29 }
 0x296   : > { %v1043_v60 = vpop.eup %1042 }
 0x297   : > { %v913_v30 = vmul.f32 %v1043_v60, %v911_v29  ;;  %vm919_vm0 = vweird.f32 %v1043_v60 }
 0x298   : > { %vm920_vm2 = vmor %vm918_vm1, %vm919_vm0 }
 0x299   : > { %v914_v31 = vmul.f32 %v1043_v60, %v913_v30 }
 0x29b   : > { %v915_v32 = vmul.f32 0.5, %v914_v31 }
 0x29d   : > { %v916_v33 = vsub.f32 1.5, %v915_v32 }
 0x29f   : > { %v917_v34 = vmul.f32 %v1043_v60, %v916_v33 }
 0x2a1   : > { %v921_v35 = vsel %vm920_vm2, %v1043_v60, %v917_v34 }
 0x2a2   : > { %v922_v36 = vmul.f32 %v921_v35, %v905_v61 }
 0x2a4   : > { %923 = vst [vmem:[%s1605_s7] sm:$0xff] %v922_v36 }
 0x2a5 PF: > { %s17_s26 = sadd.s32 1, %s1066_s26   ;;  %s1606_s24 = smov %s1062_s25 }
 0x2a6   : > { %p14_p8 = scmp.ge.s32.totalorder %s17_s26, 4   ;;  %s1607_s25 = smov %s1609_s27 }
 0x2a8   :  { %16 = sbr.rel (!%p14_p8) target bundleno = 2 (0x2), region = 89 }

// kernel: moco_forward.7
= control target key start
LH: loop header
LB: loop body
LE: loop exit
PB: predicated region body
PF: predicated region fallthrough
CT: control target
= control target key end

     0   :  { %s98_s0 = inlined_call_operand.vmem [shape: f32[8,128], index: 0, kind: input, shape index: {}]   ;;  %s99_s1 = inlined_call_operand.<no memory space> [shape: s32[1], index: 1, kind: input, shape index: {}]   ;;  %s100_s2 = inlined_call_operand.vmem [shape: f32[1025,128], index: 2, kind: input, shape index: {}, may-alias: {2,3}]   ;;  %s101_s3 = inlined_call_operand.vmem [shape: f32[1025,128], index: 3, kind: output, shape index: {}, may-alias: {2,3}]  }
   0x1   :  { %s59_s16 = scalar_lea.vmem %s101_s3, %s99_s1  ;;  %v42_v0 = vld [vmem:[%s98_s0] sm:$0xff] }
   0x2   :  { %65 = vst [vmem:[%s59_s16 + $0x1] sm:$0xff] %v42_v0 }
   0x3   :  { %49 = vsyncadd [#allocation2], 128 }
   0x4   :  { %67 = dma.done.wait [#allocation2], 128 }
   0x5   :  { %68 = vsyncadd [#allocation2], 4294967168 }
   0x6   :  { %53 = vsyncmov [#allocation2] }
   0x9   :  { %s54_s2 = vpop.sfrf %53 }
   0xa   :  { %p66_p0 = scmp.ne.s32.totalorder %s54_s2, 0 }
   0xc   :  { %58 = shalt.err (%p66_p0)  }

// kernel: moco_forward.5
= control target key start
LH: loop header
LB: loop body
LE: loop exit
PB: predicated region body
PF: predicated region fallthrough
CT: control target
= control target key end

     0   :  { %s4708_s0 = inlined_call_operand.vmem [shape: bf16[8,1024], index: 0, kind: input, shape index: {}]   ;;  %s4709_s1 = inlined_call_operand.vmem [shape: f32[1024,256], index: 1, kind: input, shape index: {}]   ;;  %s4710_s2 = inlined_call_operand.vmem [shape: f32[1024,256], index: 2, kind: input, shape index: {}]   ;;  %s4711_s3 = inlined_call_operand.vmem [shape: f32[1,256], index: 3, kind: input, shape index: {}]   ;;  %s4712_s4 = inlined_call_operand.vmem [shape: f32[1,256], index: 4, kind: input, shape index: {}]   ;;  %s4713_s5 = inlined_call_operand.vmem [shape: f32[256,256], index: 5, kind: input, shape index: {}]   ;;  %s4714_s6 = inlined_call_operand.vmem [shape: f32[256,256], index: 6, kind: input, shape index: {}]   ;;  %s4715_s7 = inlined_call_operand.vmem [shape: f32[1,256], index: 7, kind: input, shape index: {}]   ;;  %s4716_s8 = inlined_call_operand.vmem [shape: f32[1,256], index: 8, kind: input, shape index: {}]   ;;  %s4717_s9 = inlined_call_operand.vmem [shape: f32[256,128], index: 9, kind: input, shape index: {}]   ;;  %s4718_s10 = inlined_call_operand.vmem [shape: f32[256,128], index: 10, kind: input, shape index: {}]   ;;  %s4719_s11 = inlined_call_operand.vmem [shape: f32[1,128], index: 11, kind: input, shape index: {}]   ;;  %s4720_s12 = inlined_call_operand.vmem [shape: f32[1,128], index: 12, kind: input, shape index: {}]   ;;  %s4721_s13 = inlined_call_operand.vmem [shape: f32[8,128], index: 13, kind: output, shape index: {0}]   ;;  %s4722_s14 = inlined_call_operand.hbm [shape: f32[1024,256], index: 14, kind: output, shape index: {1}]   ;;  %s4723_s15 = inlined_call_operand.hbm [shape: f32[1,256], index: 15, kind: output, shape index: {2}]   ;;  %s4724_s16 = inlined_call_operand.hbm [shape: f32[256,256], index: 16, kind: output, shape index: {3}]   ;;  %s4725_s17 = inlined_call_operand.hbm [shape: f32[1,256], index: 17, kind: output, shape index: {4}]   ;;  %s4726_s18 = inlined_call_operand.hbm [shape: f32[256,128], index: 18, kind: output, shape index: {5}]   ;;  %s4727_s19 = inlined_call_operand.hbm [shape: f32[1,128], index: 19, kind: output, shape index: {6}]  }
   0x1   :  { %4815 = sst [smem:[#allocation101_spill]] %s4708_s0 }
   0x2   :  { %4816 = sst [smem:[#allocation102_spill]] %s4709_s1 }
   0x3   :  { %4817 = sst [smem:[#allocation103_spill]] %s4710_s2 }
   0x4   :  { %4818 = sst [smem:[#allocation104_spill]] %s4711_s3 }
   0x5   :  { %4819 = sst [smem:[#allocation105_spill]] %s4712_s4 }
   0x6   :  { %4820 = sst [smem:[#allocation106_spill]] %s4722_s14 }
   0x7   :  { %4821 = sst [smem:[#allocation107_spill]] %s4724_s16 }
   0x8   :  { %4822 = sst [smem:[#allocation108_spill]] %s4726_s18 }
   0x9   :  { %4823 = sst [smem:[#allocation109_spill]] %s4727_s19 }
   0xa   :  { %25 = vsyncpa [#allocation4], 0 }
   0xb   :  { %27 = vsyncpa [#allocation4 + $0x1], 0 }
   0xc   :  { %28 = vsyncpa [#allocation6], 0 }
   0xd   :  { %29 = vsyncpa [#allocation9], 0 }
   0xe   :  { %30 = vsyncpa [#allocation12], 0  ;;  %s3046_s0 = smov 0   ;;  %s3048_s30 = smov 0  }
   0xf   :  { %s3050_s20 = smov 0   ;;  %s3052_s21 = smov 0  }
  0x10 LB: > { %4824 = sst [smem:[#allocation17_spill]] %s2922_s0  ;;  %s3067_s1 = sadd.s32 4294967295, %s2934_s21   ;;  %s2934_s21 = sphi %s3052_s21, %s5002_s21   ;;  %s2930_s20 = sphi %s3050_s20, %s5004_s20   ;;  %s2926_s30 = sphi %s3048_s30, %s5006_s30   ;;  %s2922_s0 = sphi %s3046_s0, %s5005_s0  }
  0x11   : > { %4825 = sst [smem:[#allocation18_spill]] %s2930_s20  ;;  %s2604_s22 = sadd.s32 4294967294, %s2934_s21  }
  0x12   : > { %4826 = sst [smem:[#allocation19_spill]] %s2934_s21  ;;  %s3071_s2 = sadd.s32 1, %s2934_s21  }
  0x13   : > { %4827 = sst [smem:[#allocation20_spill]] %s3071_s2  ;;  %s352_s23 = sadd.s32 1, %s2930_s20 }
  0x14   : > { %s349_s24 = ssub.s32 %s2934_s21, %s3071_s2  ;;  %p362_p0 = scmp.ne.s32.totalorder %s2930_s20, %s2926_s30 }
  0x15   : > { %p350_p1 = scmp.eq.s32.totalorder %s349_s24, 0  ;;  %p363_p2 = scmp.eq.s32.totalorder %s3067_s1, 1 }
  0x16   : > { %p368_p3 = scmp.ne.s32.totalorder %s2926_s30, %s2922_s0  ;;  %p369_p4 = scmp.eq.s32.totalorder %s2604_s22, 1 }
  0x17   : > { %s3082_s25 = scalar_select %p350_p1, %s2930_s20, %s352_s23  }
  0x18   : > { %p3086_p5 = por %p363_p2, %p362_p0  ;;  %p3090_p6 = por %p369_p4, %p368_p3 }
  0x19   : > { %4828 = sst [smem:[#allocation21_spill]] %s3082_s25  ;;  %p2607_p7 = scmp.ge.s32.totalorder %s2934_s21, 1 }
  0x1a   : > { %s4829_s3 = scalar_select %p3086_p5, 1, 0 }
  0x1b   : > { %s4831_s26 = scalar_select %p3090_p6, 1, 0 }
  0x1c   : > { %4830 = sst [smem:[#allocation22_spill]] %s4829_s3  ;;  %p551_p8 = scmp.lt.s32.totalorder %s2934_s21, 3 }
  0x1d   : > { %4832 = sst [smem:[#allocation23_spill]] %s4831_s26 }
  0x1e   : > { %p552_p9 = pnand %p2607_p7, %p551_p8 }
  0x20   : > { %555 = sbr.rel (%p552_p9) target bundleno = 1011 (0x3f3), region = 72 }
  0x25   : > { %s2609_s27 = sshll.u32 %s3067_s1, 2  ;;  %s2611_s28 = sshll.u32 %s3067_s1, 6 }
  0x26   : > { %p620_p10 = scmp.lt.s32.totalorder %s2609_s27, 7  ;;  %p626_p11 = scmp.lt.s32.totalorder %s2611_s28, 127 }
  0x27   : > { %s606_s22 = sand.u32 1, %s2926_s30   ;;  %s4833_s25 = sld [smem:[#allocation101_spill]] }
  0x28   : > { %s5008_s27 = smov (!%p620_p10, %s2609_s27), 7  ;;  %s5010_s28 = smov (!%p626_p11, %s2611_s28), 127 }
  0x29   : > { %s2610_s29 = sshll.u32 %s5008_s27, 2  ;;  %s2608_s2 = sshll.u32 %s606_s22, 10 }
  0x2a   : > { %s2635_s26 = sshll.u32 %s5010_s28, 4  ;;  %s4834_s19 = sld [smem:[#allocation102_spill]] }
  0x2b   : > { %s4835_s3 = sld [smem:[#allocation103_spill]]  ;;  %s3127_s14 = scalar_lea.vmem [#allocation3], %s2608_s2 }
  0x2c   : > { %p2617_p12 = scmp.ne.s32.totalorder %s3067_s1, 0 }
  0x2d   : > { %s3102_s20 = scalar_lea.vmem %s4833_s25, %s2610_s29 }
  0x30   : > { %s3109_s18 = scalar_lea.vmem %s4834_s19, %s2635_s26 }
  0x31   : > { %s3114_s27 = scalar_lea.vmem %s4835_s3, %s2635_s26  ;;  %v896_v1 = vld [vmem:[%s3109_s18] sm:$0xff]  ;;  %v897_v6 = vld [vmem:[%s3109_s18 + $0x8] sm:$0xff]  ;;  %v898_v8 = vld [vmem:[%s3109_s18 + $0x10] sm:$0xff] }
  0x32   : > { %v640_v0 = vld [vmem:[%s3114_s27] sm:$0xff]  ;;  %v641_v2 = vld [vmem:[%s3114_s27 + $0x8] sm:$0xff]  ;;  %v1024_v4 = vmul.f32 0.001, %v896_v1  ;;  %v642_v7 = vld [vmem:[%s3114_s27 + $0x10] sm:$0xff] }
  0x33   : > { %v768_v3 = vmul.f32 0.999, %v640_v0  ;;  %v769_v5 = vmul.f32 0.999, %v641_v2  ;;  %v1025_v10 = vmul.f32 0.001, %v897_v6 }
  0x34   : > { %v770_v11 = vmul.f32 0.999, %v642_v7  ;;  %v1026_v12 = vmul.f32 0.001, %v898_v8  ;;  %v643_v13 = vld [vmem:[%s3114_s27 + $0x18] sm:$0xff]  ;;  %v644_v15 = vld [vmem:[%s3114_s27 + $0x20] sm:$0xff] }
  0x35   : > { %v3122_v9 = vadd.f32 %v1024_v4, %v768_v3  ;;  %v899_v14 = vld [vmem:[%s3109_s18 + $0x18] sm:$0xff]  ;;  %v3131_v16 = vadd.f32 %v1025_v10, %v769_v5  ;;  %v771_v18 = vmul.f32 0.999, %v643_v13  ;;  %v900_v20 = vld [vmem:[%s3109_s18 + $0x20] sm:$0xff]  ;;  %v645_v21 = vld [vmem:[%s3114_s27 + $0x28] sm:$0xff] }
  0x36   : > { %v3133_v17 = vadd.f32 %v1026_v12, %v770_v11  ;;  %v1027_v19 = vmul.f32 0.001, %v899_v14  ;;  %v772_v22 = vmul.f32 0.999, %v644_v15  ;;  %v1028_v23 = vmul.f32 0.001, %v900_v20 }
  0x37   : > { %4836 = vst [vmem:[#allocation24_spill] sm:$0xff] %v3122_v9  ;;  %v773_v24 = vmul.f32 0.999, %v645_v21  ;;  %v901_v26 = vld [vmem:[%s3109_s18 + $0x28] sm:$0xff]  ;;  %v646_v27 = vld [vmem:[%s3114_s27 + $0x30] sm:$0xff]  ;;  %v647_v32 = vld [vmem:[%s3114_s27 + $0x38] sm:$0xff] }
  0x38   : > { %1280 = vst [vmem:[%s3127_s14] sm:$0xff] %v3122_v9  ;;  %v3139_v25 = vadd.f32 %v1027_v19, %v771_v18  ;;  %v902_v28 = vld [vmem:[%s3109_s18 + $0x30] sm:$0xff]  ;;  %v3146_v29 = vadd.f32 %v1028_v23, %v772_v22  ;;  %v1029_v30 = vmul.f32 0.001, %v901_v26  ;;  %v774_v31 = vmul.f32 0.999, %v646_v27  ;;  %v903_v35 = vld [vmem:[%s3109_s18 + $0x38] sm:$0xff] }
  0x39   : > { %4837 = vst [vmem:[#allocation25_spill] sm:$0xff] %v3131_v16  ;;  %v1030_v33 = vmul.f32 0.001, %v902_v28  ;;  %v775_v34 = vmul.f32 0.999, %v647_v32  ;;  %v648_v38 = vld [vmem:[%s3114_s27 + $0x40] sm:$0xff] }
  0x3a   : > { %4838 = vst [vmem:[#allocation26_spill] sm:$0xff] %v3133_v17  ;;  %v3154_v36 = vadd.f32 %v1029_v30, %v773_v24  ;;  %v1031_v37 = vmul.f32 0.001, %v903_v35  ;;  %v904_v39 = vld [vmem:[%s3109_s18 + $0x40] sm:$0xff]  ;;  %v649_v40 = vld [vmem:[%s3114_s27 + $0x48] sm:$0xff]  ;;  %v650_v47 = vld [vmem:[%s3114_s27 + $0x50] sm:$0xff] }
  0x3b   : > { %1281 = vst [vmem:[%s3127_s14 + $0x8] sm:$0xff] %v3131_v16  ;;  %v3159_v41 = vadd.f32 %v1030_v33, %v774_v31  ;;  %v776_v42 = vmul.f32 0.999, %v648_v38  ;;  %v1032_v43 = vmul.f32 0.001, %v904_v39  ;;  %v905_v46 = vld [vmem:[%s3109_s18 + $0x48] sm:$0xff] }
  0x3c   : > { %4839 = vst [vmem:[#allocation27_spill] sm:$0xff] %v3139_v25  ;;  %v777_v44 = vmul.f32 0.999, %v649_v40  ;;  %v3163_v45 = vadd.f32 %v1031_v37, %v775_v34  ;;  %v906_v48 = vld [vmem:[%s3109_s18 + $0x50] sm:$0xff]  ;;  %v1033_v50 = vmul.f32 0.001, %v905_v46 }
  0x3d   : > { %1282 = vst [vmem:[%s3127_s14 + $0x10] sm:$0xff] %v3133_v17  ;;  %v3170_v49 = vadd.f32 %v1032_v43, %v776_v42  ;;  %v778_v51 = vmul.f32 0.999, %v650_v47  ;;  %v651_v52 = vld [vmem:[%s3114_s27 + $0x58] sm:$0xff]  ;;  %v1034_v53 = vmul.f32 0.001, %v906_v48 }
  0x3e   : > { %4840 = vst [vmem:[#allocation28_spill] sm:$0xff] %v3146_v29  ;;  %v779_v54 = vmul.f32 0.999, %v651_v52  ;;  %v907_v55 = vld [vmem:[%s3109_s18 + $0x58] sm:$0xff]  ;;  %v3178_v56 = vadd.f32 %v1033_v50, %v777_v44  ;;  %v652_v58 = vld [vmem:[%s3114_s27 + $0x60] sm:$0xff]  ;;  %v653_v60 = vld [vmem:[%s3114_s27 + $0x68] sm:$0xff] }
  0x3f   : > { %1283 = vst [vmem:[%s3127_s14 + $0x18] sm:$0xff] %v3139_v25  ;;  %v1035_v57 = vmul.f32 0.001, %v907_v55  ;;  %v908_v59 = vld [vmem:[%s3109_s18 + $0x60] sm:$0xff]  ;;  %v3183_v61 = vadd.f32 %v1034_v53, %v778_v51  ;;  %v780_v62 = vmul.f32 0.999, %v652_v58 }
  0x40   : > { %1284 = vst [vmem:[%s3127_s14 + $0x20] sm:$0xff] %v3146_v29  ;;  %v1036_v63 = vmul.f32 0.001, %v908_v59  ;;  %v781_v0 = vmul.f32 0.999, %v653_v60  ;;  %v909_v2 = vld [vmem:[%s3109_s18 + $0x68] sm:$0xff] }
  0x41   : > { %4841 = vst [vmem:[#allocation29_spill] sm:$0xff] %v3154_v36  ;;  %v3187_v1 = vadd.f32 %v1035_v57, %v779_v54  ;;  %v654_v3 = vld [vmem:[%s3114_s27 + $0x70] sm:$0xff]  ;;  %v1037_v6 = vmul.f32 0.001, %v909_v2  ;;  %v655_v8 = vld [vmem:[%s3114_s27 + $0x78] sm:$0xff]  ;;  %v656_v15 = vld [vmem:[%s3114_s27 + $0x80] sm:$0xff] }
  0x42   : > { %4842 = vst [vmem:[#allocation30_spill] sm:$0xff] %v3159_v41  ;;  %v910_v4 = vld [vmem:[%s3109_s18 + $0x70] sm:$0xff]  ;;  %v3194_v5 = vadd.f32 %v1036_v63, %v780_v62  ;;  %v782_v7 = vmul.f32 0.999, %v654_v3  ;;  %v783_v11 = vmul.f32 0.999, %v655_v8 }
  0x43   : > { %1285 = vst [vmem:[%s3127_s14 + $0x28] sm:$0xff] %v3154_v36  ;;  %v1038_v10 = vmul.f32 0.001, %v910_v4  ;;  %v911_v12 = vld [vmem:[%s3109_s18 + $0x78] sm:$0xff]  ;;  %v3202_v13 = vadd.f32 %v1037_v6, %v781_v0  ;;  %v912_v18 = vld [vmem:[%s3109_s18 + $0x80] sm:$0xff]  ;;  %v657_v19 = vld [vmem:[%s3114_s27 + $0x88] sm:$0xff] }
  0x44   : > { %4843 = vst [vmem:[#allocation31_spill] sm:$0xff] %v3163_v45  ;;  %v1039_v14 = vmul.f32 0.001, %v911_v12  ;;  %v784_v21 = vmul.f32 0.999, %v656_v15  ;;  %v913_v26 = vld [vmem:[%s3109_s18 + $0x88] sm:$0xff] }
  0x45   : > { %1286 = vst [vmem:[%s3127_s14 + $0x30] sm:$0xff] %v3159_v41  ;;  %v3207_v20 = vadd.f32 %v1038_v10, %v782_v7  ;;  %v1040_v22 = vmul.f32 0.001, %v912_v18  ;;  %v785_v23 = vmul.f32 0.999, %v657_v19  ;;  %v658_v27 = vld [vmem:[%s3114_s27 + $0x90] sm:$0xff] }
  0x46   : > { %1287 = vst [vmem:[%s3127_s14 + $0x38] sm:$0xff] %v3163_v45  ;;  %v3211_v24 = vadd.f32 %v1039_v14, %v783_v11  ;;  %v914_v28 = vld [vmem:[%s3109_s18 + $0x90] sm:$0xff]  ;;  %v1041_v31 = vmul.f32 0.001, %v913_v26  ;;  %v786_v32 = vmul.f32 0.999, %v658_v27 }
  0x47   : > { %1288 = vst [vmem:[%s3127_s14 + $0x40] sm:$0xff] %v3170_v49  ;;  %v3218_v30 = vadd.f32 %v1040_v22, %v784_v21  ;;  %v659_v33 = vld [vmem:[%s3114_s27 + $0x98] sm:$0xff]  ;;  %v1042_v34 = vmul.f32 0.001, %v914_v28  ;;  %v660_v40 = vld [vmem:[%s3114_s27 + $0xa0] sm:$0xff]  ;;  %v661_v43 = vld [vmem:[%s3114_s27 + $0xa8] sm:$0xff] }
  0x48   : > { %4844 = vst [vmem:[#allocation32_spill] sm:$0xff] %v3178_v56  ;;  %v787_v35 = vmul.f32 0.999, %v659_v33  ;;  %v915_v37 = vld [vmem:[%s3109_s18 + $0x98] sm:$0xff]  ;;  %v3226_v38 = vadd.f32 %v1041_v31, %v785_v23  ;;  %v916_v42 = vld [vmem:[%s3109_s18 + $0xa0] sm:$0xff]  ;;  %v917_v51 = vld [vmem:[%s3109_s18 + $0xa8] sm:$0xff] }
  0x49   : > { %1289 = vst [vmem:[%s3127_s14 + $0x48] sm:$0xff] %v3178_v56  ;;  %v1043_v39 = vmul.f32 0.001, %v915_v37  ;;  %v3231_v44 = vadd.f32 %v1042_v34, %v786_v32  ;;  %v788_v46 = vmul.f32 0.999, %v660_v40  ;;  %v662_v52 = vld [vmem:[%s3114_s27 + $0xb0] sm:$0xff] }
  0x4a   : > { %4845 = vst [vmem:[#allocation33_spill] sm:$0xff] %v3187_v1  ;;  %v1044_v47 = vmul.f32 0.001, %v916_v42  ;;  %v789_v48 = vmul.f32 0.999, %v661_v43  ;;  %v918_v53 = vld [vmem:[%s3109_s18 + $0xb0] sm:$0xff] }
  0x4b   : > { %1290 = vst [vmem:[%s3127_s14 + $0x50] sm:$0xff] %v3183_v61  ;;  %v3235_v50 = vadd.f32 %v1043_v39, %v787_v35  ;;  %v1045_v55 = vmul.f32 0.001, %v917_v51  ;;  %v790_v57 = vmul.f32 0.999, %v662_v52  ;;  %v663_v58 = vld [vmem:[%s3114_s27 + $0xb8] sm:$0xff] }
  0x4c   : > { %1291 = vst [vmem:[%s3127_s14 + $0x58] sm:$0xff] %v3187_v1  ;;  %v3242_v54 = vadd.f32 %v1044_v47, %v788_v46  ;;  %v1046_v59 = vmul.f32 0.001, %v918_v53  ;;  %v791_v60 = vmul.f32 0.999, %v663_v58  ;;  %v919_v62 = vld [vmem:[%s3109_s18 + $0xb8] sm:$0xff] }
  0x4d   : > { %1292 = vst [vmem:[%s3127_s14 + $0x60] sm:$0xff] %v3194_v5  ;;  %v3250_v63 = vadd.f32 %v1045_v55, %v789_v48  ;;  %v1047_v0 = vmul.f32 0.001, %v919_v62  ;;  %v664_v2 = vld [vmem:[%s3114_s27 + $0xc0] sm:$0xff]  ;;  %v665_v4 = vld [vmem:[%s3114_s27 + $0xc8] sm:$0xff]  ;;  %v666_v14 = vld [vmem:[%s3114_s27 + $0xd0] sm:$0xff] }
  0x4e   : > { %4846 = vst [vmem:[#allocation34_spill] sm:$0xff] %v3202_v13  ;;  %v920_v3 = vld [vmem:[%s3109_s18 + $0xc0] sm:$0xff]  ;;  %v3255_v6 = vadd.f32 %v1046_v59, %v790_v57  ;;  %v792_v7 = vmul.f32 0.999, %v664_v2  ;;  %v793_v10 = vmul.f32 0.999, %v665_v4 }
  0x4f   : > { %1293 = vst [vmem:[%s3127_s14 + $0x68] sm:$0xff] %v3202_v13  ;;  %v1048_v8 = vmul.f32 0.001, %v920_v3  ;;  %v3259_v11 = vadd.f32 %v1047_v0, %v791_v60  ;;  %v921_v12 = vld [vmem:[%s3109_s18 + $0xc8] sm:$0xff]  ;;  %v922_v15 = vld [vmem:[%s3109_s18 + $0xd0] sm:$0xff]  ;;  %v667_v22 = vld [vmem:[%s3114_s27 + $0xd8] sm:$0xff] }
  0x50   : > { %4847 = vst [vmem:[#allocation35_spill] sm:$0xff] %v3211_v24  ;;  %v1049_v19 = vmul.f32 0.001, %v921_v12  ;;  %v794_v21 = vmul.f32 0.999, %v666_v14  ;;  %v923_v27 = vld [vmem:[%s3109_s18 + $0xd8] sm:$0xff] }
  0x51   : > { %1294 = vst [vmem:[%s3127_s14 + $0x70] sm:$0xff] %v3207_v20  ;;  %v3266_v18 = vadd.f32 %v1048_v8, %v792_v7  ;;  %v1050_v23 = vmul.f32 0.001, %v922_v15  ;;  %v795_v26 = vmul.f32 0.999, %v667_v22  ;;  %v668_v32 = vld [vmem:[%s3114_s27 + $0xe0] sm:$0xff] }
  0x52   : > { %1295 = vst [vmem:[%s3127_s14 + $0x78] sm:$0xff] %v3211_v24  ;;  %v3274_v28 = vadd.f32 %v1049_v19, %v793_v10  ;;  %v1051_v31 = vmul.f32 0.001, %v923_v27  ;;  %v924_v33 = vld [vmem:[%s3109_s18 + $0xe0] sm:$0xff]  ;;  %v669_v34 = vld [vmem:[%s3114_s27 + $0xe8] sm:$0xff]  ;;  %v670_v46 = vld [vmem:[%s3114_s27 + $0xf0] sm:$0xff] }
  0x53   : > { %1296 = vst [vmem:[%s3127_s14 + $0x80] sm:$0xff] %v3218_v30  ;;  %v3279_v35 = vadd.f32 %v1050_v23, %v794_v21  ;;  %v796_v37 = vmul.f32 0.999, %v668_v32  ;;  %v1052_v39 = vmul.f32 0.001, %v924_v33  ;;  %v925_v43 = vld [vmem:[%s3109_s18 + $0xe8] sm:$0xff] }
  0x54   : > { %4848 = vst [vmem:[#allocation36_spill] sm:$0xff] %v3226_v38  ;;  %v797_v40 = vmul.f32 0.999, %v669_v34  ;;  %v3283_v42 = vadd.f32 %v1051_v31, %v795_v26  ;;  %v926_v47 = vld [vmem:[%s3109_s18 + $0xf0] sm:$0xff]  ;;  %v1053_v51 = vmul.f32 0.001, %v925_v43 }
  0x55   : > { %1297 = vst [vmem:[%s3127_s14 + $0x88] sm:$0xff] %v3226_v38  ;;  %v3290_v48 = vadd.f32 %v1052_v39, %v796_v37  ;;  %v798_v52 = vmul.f32 0.999, %v670_v46  ;;  %v671_v53 = vld [vmem:[%s3114_s27 + $0xf8] sm:$0xff]  ;;  %v1054_v55 = vmul.f32 0.001, %v926_v47 }
  0x56   : > { %4849 = vst [vmem:[#allocation37_spill] sm:$0xff] %v3235_v50  ;;  %v799_v57 = vmul.f32 0.999, %v671_v53  ;;  %v927_v58 = vld [vmem:[%s3109_s18 + $0xf8] sm:$0xff]  ;;  %v3298_v59 = vadd.f32 %v1053_v51, %v797_v40  ;;  %v672_v62 = vld [vmem:[%s3114_s27 + $0x100] sm:$0xff]  ;;  %v673_v2 = vld [vmem:[%s3114_s27 + $0x108] sm:$0xff] }
  0x57   : > { %1298 = vst [vmem:[%s3127_s14 + $0x90] sm:$0xff] %v3231_v44  ;;  %v1055_v60 = vmul.f32 0.001, %v927_v58  ;;  %v928_v0 = vld [vmem:[%s3109_s18 + $0x100] sm:$0xff]  ;;  %v3303_v3 = vadd.f32 %v1054_v55, %v798_v52  ;;  %v800_v4 = vmul.f32 0.999, %v672_v62 }
  0x58   : > { %1299 = vst [vmem:[%s3127_s14 + $0x98] sm:$0xff] %v3235_v50  ;;  %v1056_v7 = vmul.f32 0.001, %v928_v0  ;;  %v801_v8 = vmul.f32 0.999, %v673_v2  ;;  %v929_v12 = vld [vmem:[%s3109_s18 + $0x108] sm:$0xff] }
  0x59   : > { %1300 = vst [vmem:[%s3127_s14 + $0xa0] sm:$0xff] %v3242_v54  ;;  %v3307_v10 = vadd.f32 %v1055_v60, %v799_v57  ;;  %v674_v14 = vld [vmem:[%s3114_s27 + $0x110] sm:$0xff]  ;;  %v1057_v21 = vmul.f32 0.001, %v929_v12  ;;  %v675_v23 = vld [vmem:[%s3114_s27 + $0x118] sm:$0xff]  ;;  %v676_v34 = vld [vmem:[%s3114_s27 + $0x120] sm:$0xff] }
  0x5a   : > { %4850 = vst [vmem:[#allocation38_spill] sm:$0xff] %v3250_v63  ;;  %v930_v15 = vld [vmem:[%s3109_s18 + $0x110] sm:$0xff]  ;;  %v3314_v19 = vadd.f32 %v1056_v7, %v800_v4  ;;  %v802_v22 = vmul.f32 0.999, %v674_v14  ;;  %v803_v27 = vmul.f32 0.999, %v675_v23 }
  0x5b   : > { %1301 = vst [vmem:[%s3127_s14 + $0xa8] sm:$0xff] %v3250_v63  ;;  %v1058_v26 = vmul.f32 0.001, %v930_v15  ;;  %v931_v31 = vld [vmem:[%s3109_s18 + $0x118] sm:$0xff]  ;;  %v3322_v32 = vadd.f32 %v1057_v21, %v801_v8  ;;  %v932_v37 = vld [vmem:[%s3109_s18 + $0x120] sm:$0xff]  ;;  %v677_v39 = vld [vmem:[%s3114_s27 + $0x128] sm:$0xff] }
  0x5c   : > { %4851 = vst [vmem:[#allocation39_spill] sm:$0xff] %v3259_v11  ;;  %v1059_v33 = vmul.f32 0.001, %v931_v31  ;;  %v804_v43 = vmul.f32 0.999, %v676_v34  ;;  %v933_v52 = vld [vmem:[%s3109_s18 + $0x128] sm:$0xff] }
  0x5d   : > { %1302 = vst [vmem:[%s3127_s14 + $0xb0] sm:$0xff] %v3255_v6  ;;  %v3327_v40 = vadd.f32 %v1058_v26, %v802_v22  ;;  %v1060_v46 = vmul.f32 0.001, %v932_v37  ;;  %v805_v47 = vmul.f32 0.999, %v677_v39  ;;  %v678_v53 = vld [vmem:[%s3114_s27 + $0x130] sm:$0xff] }
  0x5e   : > { %1303 = vst [vmem:[%s3127_s14 + $0xb8] sm:$0xff] %v3259_v11  ;;  %v3331_v51 = vadd.f32 %v1059_v33, %v803_v27  ;;  %v934_v55 = vld [vmem:[%s3109_s18 + $0x130] sm:$0xff]  ;;  %v1061_v58 = vmul.f32 0.001, %v933_v52  ;;  %v806_v60 = vmul.f32 0.999, %v678_v53 }
  0x5f   : > { %1304 = vst [vmem:[%s3127_s14 + $0xc0] sm:$0xff] %v3266_v18  ;;  %v3338_v57 = vadd.f32 %v1060_v46, %v804_v43  ;;  %v679_v62 = vld [vmem:[%s3114_s27 + $0x138] sm:$0xff]  ;;  %v1062_v0 = vmul.f32 0.001, %v934_v55  ;;  %v680_v12 = vld [vmem:[%s3114_s27 + $0x140] sm:$0xff]  ;;  %v681_v15 = vld [vmem:[%s3114_s27 + $0x148] sm:$0xff] }
  0x60   : > { %4852 = vst [vmem:[#allocation40_spill] sm:$0xff] %v3274_v28  ;;  %v807_v2 = vmul.f32 0.999, %v679_v62  ;;  %v935_v4 = vld [vmem:[%s3109_s18 + $0x138] sm:$0xff]  ;;  %v3346_v7 = vadd.f32 %v1061_v58, %v805_v47  ;;  %v936_v14 = vld [vmem:[%s3109_s18 + $0x140] sm:$0xff]  ;;  %v937_v31 = vld [vmem:[%s3109_s18 + $0x148] sm:$0xff] }
  0x61   : > { %1305 = vst [vmem:[%s3127_s14 + $0xc8] sm:$0xff] %v3274_v28  ;;  %v1063_v8 = vmul.f32 0.001, %v935_v4  ;;  %v3351_v21 = vadd.f32 %v1062_v0, %v806_v60  ;;  %v808_v22 = vmul.f32 0.999, %v680_v12  ;;  %v682_v33 = vld [vmem:[%s3114_s27 + $0x150] sm:$0xff] }
  0x62   : > { %4853 = vst [vmem:[#allocation41_spill] sm:$0xff] %v3283_v42  ;;  %v1064_v23 = vmul.f32 0.001, %v936_v14  ;;  %v809_v26 = vmul.f32 0.999, %v681_v15  ;;  %v938_v34 = vld [vmem:[%s3109_s18 + $0x150] sm:$0xff] }
  0x63   : > { %1306 = vst [vmem:[%s3127_s14 + $0xd0] sm:$0xff] %v3279_v35  ;;  %v3355_v27 = vadd.f32 %v1063_v8, %v807_v2  ;;  %v1065_v39 = vmul.f32 0.001, %v937_v31  ;;  %v810_v43 = vmul.f32 0.999, %v682_v33  ;;  %v683_v46 = vld [vmem:[%s3114_s27 + $0x158] sm:$0xff] }
  0x64   : > { %1307 = vst [vmem:[%s3127_s14 + $0xd8] sm:$0xff] %v3283_v42  ;;  %v3362_v37 = vadd.f32 %v1064_v23, %v808_v22  ;;  %v1066_v47 = vmul.f32 0.001, %v938_v34  ;;  %v811_v52 = vmul.f32 0.999, %v683_v46  ;;  %v939_v53 = vld [vmem:[%s3109_s18 + $0x158] sm:$0xff] }
  0x65   : > { %1308 = vst [vmem:[%s3127_s14 + $0xe0] sm:$0xff] %v3290_v48  ;;  %v3370_v55 = vadd.f32 %v1065_v39, %v809_v26  ;;  %v1067_v58 = vmul.f32 0.001, %v939_v53  ;;  %v684_v60 = vld [vmem:[%s3114_s27 + $0x160] sm:$0xff]  ;;  %v685_v0 = vld [vmem:[%s3114_s27 + $0x168] sm:$0xff]  ;;  %v686_v22 = vld [vmem:[%s3114_s27 + $0x170] sm:$0xff] }
  0x66   : > { %4854 = vst [vmem:[#allocation42_spill] sm:$0xff] %v3298_v59  ;;  %v940_v62 = vld [vmem:[%s3109_s18 + $0x160] sm:$0xff]  ;;  %v3375_v2 = vadd.f32 %v1066_v47, %v810_v43  ;;  %v812_v4 = vmul.f32 0.999, %v684_v60  ;;  %v813_v12 = vmul.f32 0.999, %v685_v0 }
  0x67   : > { %1309 = vst [vmem:[%s3127_s14 + $0xe8] sm:$0xff] %v3298_v59  ;;  %v1068_v8 = vmul.f32 0.001, %v940_v62  ;;  %v3379_v14 = vadd.f32 %v1067_v58, %v811_v52  ;;  %v941_v15 = vld [vmem:[%s3109_s18 + $0x168] sm:$0xff]  ;;  %v942_v23 = vld [vmem:[%s3109_s18 + $0x170] sm:$0xff]  ;;  %v687_v34 = vld [vmem:[%s3114_s27 + $0x178] sm:$0xff] }
  0x68   : > { %4855 = vst [vmem:[#allocation43_spill] sm:$0xff] %v3307_v10  ;;  %v1069_v31 = vmul.f32 0.001, %v941_v15  ;;  %v814_v33 = vmul.f32 0.999, %v686_v22  ;;  %v943_v46 = vld [vmem:[%s3109_s18 + $0x178] sm:$0xff] }
  0x69   : > { %1310 = vst [vmem:[%s3127_s14 + $0xf0] sm:$0xff] %v3303_v3  ;;  %v3386_v26 = vadd.f32 %v1068_v8, %v812_v4  ;;  %v1070_v39 = vmul.f32 0.001, %v942_v23  ;;  %v815_v43 = vmul.f32 0.999, %v687_v34  ;;  %v688_v53 = vld [vmem:[%s3114_s27 + $0x180] sm:$0xff] }
  0x6a   : > { %4856 = vst [vmem:[#allocation44_spill] sm:$0xff] %v3314_v19  ;;  %v3394_v47 = vadd.f32 %v1069_v31, %v813_v12  ;;  %v1071_v52 = vmul.f32 0.001, %v943_v46  ;;  %v944_v58 = vld [vmem:[%s3109_s18 + $0x180] sm:$0xff]  ;;  %v689_v60 = vld [vmem:[%s3114_s27 + $0x188] sm:$0xff]  ;;  %v690_v22 = vld [vmem:[%s3114_s27 + $0x190] sm:$0xff] }
  0x6b   : > { %1311 = vst [vmem:[%s3127_s14 + $0xf8] sm:$0xff] %v3307_v10  ;;  %v3399_v62 = vadd.f32 %v1070_v39, %v814_v33  ;;  %v816_v0 = vmul.f32 0.999, %v688_v53  ;;  %v1072_v4 = vmul.f32 0.001, %v944_v58  ;;  %v945_v12 = vld [vmem:[%s3109_s18 + $0x188] sm:$0xff] }
  0x6c   : > { %1312 = vst [vmem:[%s3127_s14 + $0x100] sm:$0xff] %v3314_v19  ;;  %v817_v8 = vmul.f32 0.999, %v689_v60  ;;  %v3403_v15 = vadd.f32 %v1071_v52, %v815_v43  ;;  %v946_v23 = vld [vmem:[%s3109_s18 + $0x190] sm:$0xff]  ;;  %v1073_v33 = vmul.f32 0.001, %v945_v12 }
  0x6d   : > { %4857 = vst [vmem:[#allocation45_spill] sm:$0xff] %v3322_v32  ;;  %v3410_v31 = vadd.f32 %v1072_v4, %v816_v0  ;;  %v818_v34 = vmul.f32 0.999, %v690_v22  ;;  %v691_v39 = vld [vmem:[%s3114_s27 + $0x198] sm:$0xff]  ;;  %v1074_v46 = vmul.f32 0.001, %v946_v23 }
  0x6e   : > { %4858 = vst [vmem:[#allocation46_spill] sm:$0xff] %v3327_v40  ;;  %v819_v43 = vmul.f32 0.999, %v691_v39  ;;  %v947_v52 = vld [vmem:[%s3109_s18 + $0x198] sm:$0xff]  ;;  %v3418_v53 = vadd.f32 %v1073_v33, %v817_v8  ;;  %v692_v60 = vld [vmem:[%s3114_s27 + $0x1a0] sm:$0xff]  ;;  %v693_v4 = vld [vmem:[%s3114_s27 + $0x1a8] sm:$0xff] }
  0x6f   : > { %1313 = vst [vmem:[%s3127_s14 + $0x108] sm:$0xff] %v3322_v32  ;;  %v1075_v58 = vmul.f32 0.001, %v947_v52  ;;  %v948_v0 = vld [vmem:[%s3109_s18 + $0x1a0] sm:$0xff]  ;;  %v3423_v12 = vadd.f32 %v1074_v46, %v818_v34  ;;  %v820_v22 = vmul.f32 0.999, %v692_v60 }
  0x70   : > { %4859 = vst [vmem:[#allocation47_spill] sm:$0xff] %v3331_v51  ;;  %v1076_v23 = vmul.f32 0.001, %v948_v0  ;;  %v821_v39 = vmul.f32 0.999, %v693_v4  ;;  %v949_v8 = vld [vmem:[%s3109_s18 + $0x1a8] sm:$0xff] }
  0x71   : > { %1314 = vst [vmem:[%s3127_s14 + $0x110] sm:$0xff] %v3327_v40  ;;  %v694_v33 = vld [vmem:[%s3114_s27 + $0x1b0] sm:$0xff]  ;;  %v1077_v34 = vmul.f32 0.001, %v949_v8  ;;  %v695_v60 = vld [vmem:[%s3114_s27 + $0x1b8] sm:$0xff]  ;;  %v697_v8 = vld [vmem:[%s3114_s27 + $0x1c8] sm:$0xff] }
  0x72   : > { %4860 = vst [vmem:[#allocation48_spill] sm:$0xff] %v3338_v57  ;;  %v950_v52 = vld [vmem:[%s3109_s18 + $0x1b0] sm:$0xff]  ;;  %v3434_v32 = vadd.f32 %v1076_v23, %v820_v22  ;;  %v822_v46 = vmul.f32 0.999, %v694_v33  ;;  %v696_v22 = vld [vmem:[%s3114_s27 + $0x1c0] sm:$0xff] }
  0x73   : > { %1315 = vst [vmem:[%s3127_s14 + $0x118] sm:$0xff] %v3331_v51  ;;  %v3427_v51 = vadd.f32 %v1075_v58, %v819_v43  ;;  %v1078_v0 = vmul.f32 0.001, %v950_v52  ;;  %v823_v43 = vmul.f32 0.999, %v695_v60  ;;  %v951_v58 = vld [vmem:[%s3109_s18 + $0x1b8] sm:$0xff]  ;;  %v3442_v4 = vadd.f32 %v1077_v34, %v821_v39 }
  0x74   : > { %1316 = vst [vmem:[%s3127_s14 + $0x120] sm:$0xff] %v3338_v57  ;;  %v1079_v25 = vmul.f32 0.001, %v951_v58  ;;  %v952_v23 = vld [vmem:[%s3109_s18 + $0x1c0] sm:$0xff]  ;;  %v824_v16 = vmul.f32 0.999, %v696_v22 }
  0x75   : > { %4861 = vst [vmem:[#allocation49_spill] sm:$0xff] %v3346_v7  ;;  %v3447_v33 = vadd.f32 %v1078_v0, %v822_v46  ;;  %v1080_v52 = vmul.f32 0.001, %v952_v23  ;;  %v825_v60 = vmul.f32 0.999, %v697_v8  ;;  %v953_v39 = vld [vmem:[%s3109_s18 + $0x1c8] sm:$0xff] }
  0x76   : > { %4862 = vst [vmem:[#allocation50_spill] sm:$0xff] %v3351_v21  ;;  %v698_v34 = vld [vmem:[%s3114_s27 + $0x1d0] sm:$0xff]  ;;  %v1081_v46 = vmul.f32 0.001, %v953_v39  ;;  %v699_v22 = vld [vmem:[%s3114_s27 + $0x1d8] sm:$0xff]  ;;  %v701_v39 = vld [vmem:[%s3114_s27 + $0x1e8] sm:$0xff] }
  0x77   : > { %1317 = vst [vmem:[%s3127_s14 + $0x128] sm:$0xff] %v3346_v7  ;;  %v954_v58 = vld [vmem:[%s3109_s18 + $0x1d0] sm:$0xff]  ;;  %v3458_v7 = vadd.f32 %v1080_v52, %v824_v16  ;;  %v826_v0 = vmul.f32 0.999, %v698_v34  ;;  %v700_v16 = vld [vmem:[%s3114_s27 + $0x1e0] sm:$0xff]  ;;  %v1021_v57 = vld [vmem:[%s3109_s18 + $0x3e8] sm:$0xff] }
  0x78   : > { %4863 = vst [vmem:[#allocation51_spill] sm:$0xff] %v3355_v27  ;;  %v1082_v23 = vmul.f32 0.001, %v954_v58  ;;  %v3466_v8 = vadd.f32 %v1081_v46, %v825_v60  ;;  %v956_v52 = vld [vmem:[%s3109_s18 + $0x1e0] sm:$0xff]  ;;  %v828_v36 = vmul.f32 0.999, %v700_v16 }
  0x79   : > { %1318 = vst [vmem:[%s3127_s14 + $0x130] sm:$0xff] %v3351_v21  ;;  %v1084_v58 = vmul.f32 0.001, %v956_v52  ;;  %v957_v60 = vld [vmem:[%s3109_s18 + $0x1e8] sm:$0xff]  ;;  %v702_v46 = vld [vmem:[%s3114_s27 + $0x1f0] sm:$0xff]  ;;  %v703_v16 = vld [vmem:[%s3114_s27 + $0x1f8] sm:$0xff] }
  0x7a   : > { %1319 = vst [vmem:[%s3127_s14 + $0x138] sm:$0xff] %v3355_v27  ;;  %v3451_v27 = vadd.f32 %v1079_v25, %v823_v43  ;;  %v827_v25 = vmul.f32 0.999, %v699_v22  ;;  %v955_v43 = vld [vmem:[%s3109_s18 + $0x1d8] sm:$0xff]  ;;  %v3471_v34 = vadd.f32 %v1082_v23, %v826_v0  ;;  %v829_v22 = vmul.f32 0.999, %v701_v39 }
  0x7b   : > { %1320 = vst [vmem:[%s3127_s14 + $0x140] sm:$0xff] %v3362_v37  ;;  %v1083_v45 = vmul.f32 0.001, %v955_v43  ;;  %v958_v43 = vld [vmem:[%s3109_s18 + $0x1f0] sm:$0xff]  ;;  %v1085_v0 = vmul.f32 0.001, %v957_v60 }
  0x7c   : > { %4864 = vst [vmem:[#allocation52_spill] sm:$0xff] %v3370_v55  ;;  %v830_v23 = vmul.f32 0.999, %v702_v46  ;;  %v1086_v52 = vmul.f32 0.001, %v958_v43  ;;  %v705_v60 = vld [vmem:[%s3114_s27 + $0x208] sm:$0xff] }
  0x7d   : > { %1321 = vst [vmem:[%s3127_s14 + $0x148] sm:$0xff] %v3370_v55  ;;  %v3482_v55 = vadd.f32 %v1084_v58, %v828_v36  ;;  %v3490_v39 = vadd.f32 %v1085_v0, %v829_v22  ;;  %v704_v36 = vld [vmem:[%s3114_s27 + $0x200] sm:$0xff]  ;;  %v961_v22 = vld [vmem:[%s3109_s18 + $0x208] sm:$0xff]  ;;  %v706_v0 = vld [vmem:[%s3114_s27 + $0x210] sm:$0xff]  ;;  %v1149_v41 = vmul.f32 0.001, %v1021_v57 }
  0x7e   : > { %4865 = vst [vmem:[#allocation53_spill] sm:$0xff] %v3379_v14  ;;  %v960_v58 = vld [vmem:[%s3109_s18 + $0x200] sm:$0xff]  ;;  %v3495_v46 = vadd.f32 %v1086_v52, %v830_v23  ;;  %v832_v56 = vmul.f32 0.999, %v704_v36  ;;  %v1089_v23 = vmul.f32 0.001, %v961_v22 }
  0x7f   : > { %1322 = vst [vmem:[%s3127_s14 + $0x150] sm:$0xff] %v3375_v2  ;;  %v1088_v43 = vmul.f32 0.001, %v960_v58  ;;  %v834_v52 = vmul.f32 0.999, %v706_v0  ;;  %v707_v36 = vld [vmem:[%s3114_s27 + $0x218] sm:$0xff] }
  0x80   : > { %1323 = vst [vmem:[%s3127_s14 + $0x158] sm:$0xff] %v3379_v14  ;;  %v3475_v14 = vadd.f32 %v1083_v45, %v827_v25  ;;  %v831_v45 = vmul.f32 0.999, %v703_v16  ;;  %v959_v25 = vld [vmem:[%s3109_s18 + $0x1f8] sm:$0xff]  ;;  %v833_v16 = vmul.f32 0.999, %v705_v60 }
  0x81   : > { %1324 = vst [vmem:[%s3127_s14 + $0x160] sm:$0xff] %v3386_v26  ;;  %v1087_v1 = vmul.f32 0.001, %v959_v25  ;;  %v962_v25 = vld [vmem:[%s3109_s18 + $0x210] sm:$0xff]  ;;  %v709_v22 = vld [vmem:[%s3114_s27 + $0x228] sm:$0xff] }
  0x82   : > { %4866 = vst [vmem:[#allocation54_spill] sm:$0xff] %v3394_v47  ;;  %v1090_v58 = vmul.f32 0.001, %v962_v25  ;;  %v3514_v60 = vadd.f32 %v1089_v23, %v833_v16  ;;  %v965_v16 = vld [vmem:[%s3109_s18 + $0x228] sm:$0xff]  ;;  %v710_v23 = vld [vmem:[%s3114_s27 + $0x230] sm:$0xff] }
  0x83   : > { %1325 = vst [vmem:[%s3127_s14 + $0x168] sm:$0xff] %v3394_v47  ;;  %v3506_v47 = vadd.f32 %v1088_v43, %v832_v56  ;;  %v708_v56 = vld [vmem:[%s3114_s27 + $0x220] sm:$0xff] }
  0x84   : > { %4867 = vst [vmem:[#allocation55_spill] sm:$0xff] %v3403_v15  ;;  %v964_v43 = vld [vmem:[%s3109_s18 + $0x220] sm:$0xff]  ;;  %v3519_v0 = vadd.f32 %v1090_v58, %v834_v52  ;;  %v836_v13 = vmul.f32 0.999, %v708_v56  ;;  %v1093_v52 = vmul.f32 0.001, %v965_v16 }
  0x85   : > { %1326 = vst [vmem:[%s3127_s14 + $0x170] sm:$0xff] %v3399_v62  ;;  %v1092_v25 = vmul.f32 0.001, %v964_v43  ;;  %v838_v58 = vmul.f32 0.999, %v710_v23  ;;  %v711_v56 = vld [vmem:[%s3114_s27 + $0x238] sm:$0xff] }
  0x86   : > { %1327 = vst [vmem:[%s3127_s14 + $0x178] sm:$0xff] %v3403_v15  ;;  %v3499_v15 = vadd.f32 %v1087_v1, %v831_v45  ;;  %v835_v1 = vmul.f32 0.999, %v707_v36  ;;  %v963_v45 = vld [vmem:[%s3109_s18 + $0x218] sm:$0xff]  ;;  %v837_v36 = vmul.f32 0.999, %v709_v22 }
  0x87   : > { %1328 = vst [vmem:[%s3127_s14 + $0x180] sm:$0xff] %v3410_v31  ;;  %v1091_v24 = vmul.f32 0.001, %v963_v45  ;;  %v966_v45 = vld [vmem:[%s3109_s18 + $0x230] sm:$0xff]  ;;  %v713_v16 = vld [vmem:[%s3114_s27 + $0x248] sm:$0xff] }
  0x88   : > { %4868 = vst [vmem:[#allocation56_spill] sm:$0xff] %v3418_v53  ;;  %v1094_v43 = vmul.f32 0.001, %v966_v45  ;;  %v3538_v22 = vadd.f32 %v1093_v52, %v837_v36  ;;  %v969_v36 = vld [vmem:[%s3109_s18 + $0x248] sm:$0xff]  ;;  %v714_v52 = vld [vmem:[%s3114_s27 + $0x250] sm:$0xff] }
  0x89   : > { %1329 = vst [vmem:[%s3127_s14 + $0x188] sm:$0xff] %v3418_v53  ;;  %v3530_v53 = vadd.f32 %v1092_v25, %v836_v13  ;;  %v712_v13 = vld [vmem:[%s3114_s27 + $0x240] sm:$0xff] }
  0x8a   : > { %4869 = vst [vmem:[#allocation57_spill] sm:$0xff] %v3427_v51  ;;  %v968_v25 = vld [vmem:[%s3109_s18 + $0x240] sm:$0xff]  ;;  %v3543_v23 = vadd.f32 %v1094_v43, %v838_v58  ;;  %v1097_v58 = vmul.f32 0.001, %v969_v36  ;;  %v842_v43 = vmul.f32 0.999, %v714_v52 }
  0x8b   : > { %1330 = vst [vmem:[%s3127_s14 + $0x190] sm:$0xff] %v3423_v12  ;;  %v1096_v45 = vmul.f32 0.001, %v968_v25  ;;  %v717_v36 = vld [vmem:[%s3114_s27 + $0x268] sm:$0xff] }
  0x8c   : > { %1331 = vst [vmem:[%s3127_s14 + $0x198] sm:$0xff] %v3427_v51  ;;  %v3523_v51 = vadd.f32 %v1091_v24, %v835_v1  ;;  %v839_v24 = vmul.f32 0.999, %v711_v56  ;;  %v967_v1 = vld [vmem:[%s3109_s18 + $0x238] sm:$0xff]  ;;  %v841_v56 = vmul.f32 0.999, %v713_v16 }
  0x8d   : > { %1332 = vst [vmem:[%s3127_s14 + $0x1a0] sm:$0xff] %v3434_v32 }
  0x8e   : > { %4870 = vst [vmem:[#allocation58_spill] sm:$0xff] %v3442_v4  ;;  %v3562_v16 = vadd.f32 %v1097_v58, %v841_v56  ;;  %v973_v56 = vld [vmem:[%s3109_s18 + $0x268] sm:$0xff]  ;;  %v718_v58 = vld [vmem:[%s3114_s27 + $0x270] sm:$0xff] }
  0x8f   : > { %1333 = vst [vmem:[%s3127_s14 + $0x1a8] sm:$0xff] %v3442_v4 }
  0x90   : > { %4871 = vst [vmem:[#allocation59_spill] sm:$0xff] %v3451_v27 }
  0x91   : > { %1334 = vst [vmem:[%s3127_s14 + $0x1b0] sm:$0xff] %v3447_v33 }
  0x92   : > { %1335 = vst [vmem:[%s3127_s14 + $0x1b8] sm:$0xff] %v3451_v27 }
  0x93   : > { %1336 = vst [vmem:[%s3127_s14 + $0x1c0] sm:$0xff] %v3458_v7 }
  0x94   : > { %4872 = vst [vmem:[#allocation60_spill] sm:$0xff] %v3466_v8 }
  0x95   : > { %1337 = vst [vmem:[%s3127_s14 + $0x1c8] sm:$0xff] %v3466_v8 }
  0x96   : > { %4873 = vst [vmem:[#allocation61_spill] sm:$0xff] %v3475_v14 }
  0x97   : > { %1338 = vst [vmem:[%s3127_s14 + $0x1d0] sm:$0xff] %v3471_v34 }
  0x98   : > { %1339 = vst [vmem:[%s3127_s14 + $0x1d8] sm:$0xff] %v3475_v14 }
  0x99   : > { %1340 = vst [vmem:[%s3127_s14 + $0x1e0] sm:$0xff] %v3482_v55 }
  0x9a   : > { %4874 = vst [vmem:[#allocation62_spill] sm:$0xff] %v3490_v39 }
  0x9b   : > { %1341 = vst [vmem:[%s3127_s14 + $0x1e8] sm:$0xff] %v3490_v39 }
  0x9c   : > { %4875 = vst [vmem:[#allocation63_spill] sm:$0xff] %v3499_v15 }
  0x9d   : > { %1342 = vst [vmem:[%s3127_s14 + $0x1f0] sm:$0xff] %v3495_v46 }
  0x9e   : > { %4876 = vst [vmem:[#allocation64_spill] sm:$0xff] %v3506_v47 }
  0x9f   : > { %1343 = vst [vmem:[%s3127_s14 + $0x1f8] sm:$0xff] %v3499_v15 }
  0xa0   : > { %1344 = vst [vmem:[%s3127_s14 + $0x200] sm:$0xff] %v3506_v47 }
  0xa1   : > { %4877 = vst [vmem:[#allocation65_spill] sm:$0xff] %v3514_v60 }
  0xa2   : > { %4878 = vst [vmem:[#allocation66_spill] sm:$0xff] %v3519_v0 }
  0xa3   : > { %1345 = vst [vmem:[%s3127_s14 + $0x208] sm:$0xff] %v3514_v60  ;;  %v1095_v60 = vmul.f32 0.001, %v967_v1  ;;  %v970_v1 = vld [vmem:[%s3109_s18 + $0x250] sm:$0xff] }
  0xa4   : > { %4879 = vst [vmem:[#allocation67_spill] sm:$0xff] %v3523_v51  ;;  %v1098_v25 = vmul.f32 0.001, %v970_v1 }
  0xa5   : > { %1346 = vst [vmem:[%s3127_s14 + $0x210] sm:$0xff] %v3519_v0  ;;  %v3547_v50 = vadd.f32 %v1095_v60, %v839_v24  ;;  %v971_v24 = vld [vmem:[%s3109_s18 + $0x258] sm:$0xff] }
  0xa6   : > { %4880 = vst [vmem:[#allocation68_spill] sm:$0xff] %v3530_v53  ;;  %v3567_v52 = vadd.f32 %v1098_v25, %v842_v43  ;;  %v1101_v43 = vmul.f32 0.001, %v973_v56  ;;  %v846_v25 = vmul.f32 0.999, %v718_v58  ;;  %v721_v56 = vld [vmem:[%s3114_s27 + $0x288] sm:$0xff] }
  0xa7   : > { %1347 = vst [vmem:[%s3127_s14 + $0x218] sm:$0xff] %v3523_v51  ;;  %v840_v51 = vmul.f32 0.999, %v712_v13  ;;  %v715_v13 = vld [vmem:[%s3114_s27 + $0x258] sm:$0xff] }
  0xa8   : > { %1348 = vst [vmem:[%s3127_s14 + $0x220] sm:$0xff] %v3530_v53  ;;  %v843_v60 = vmul.f32 0.999, %v715_v13  ;;  %v845_v13 = vmul.f32 0.999, %v717_v36 }
  0xa9   : > { %4881 = vst [vmem:[#allocation69_spill] sm:$0xff] %v3538_v22  ;;  %v3554_v38 = vadd.f32 %v1096_v45, %v840_v51  ;;  %v716_v51 = vld [vmem:[%s3114_s27 + $0x260] sm:$0xff] }
  0xaa   : > { %4882 = vst [vmem:[#allocation70_spill] sm:$0xff] %v3543_v23  ;;  %v972_v45 = vld [vmem:[%s3109_s18 + $0x260] sm:$0xff]  ;;  %v3586_v36 = vadd.f32 %v1101_v43, %v845_v13  ;;  %v977_v13 = vld [vmem:[%s3109_s18 + $0x288] sm:$0xff]  ;;  %v722_v43 = vld [vmem:[%s3114_s27 + $0x290] sm:$0xff] }
  0xab   : > { %1349 = vst [vmem:[%s3127_s14 + $0x228] sm:$0xff] %v3538_v22  ;;  %v1099_v22 = vmul.f32 0.001, %v971_v24  ;;  %v1100_v1 = vmul.f32 0.001, %v972_v45  ;;  %v974_v24 = vld [vmem:[%s3109_s18 + $0x270] sm:$0xff] }
  0xac   : > { %4883 = vst [vmem:[#allocation71_spill] sm:$0xff] %v3547_v50  ;;  %v1102_v45 = vmul.f32 0.001, %v974_v24 }
  0xad   : > { %1350 = vst [vmem:[%s3127_s14 + $0x230] sm:$0xff] %v3543_v23  ;;  %v3571_v27 = vadd.f32 %v1099_v22, %v843_v60  ;;  %v975_v60 = vld [vmem:[%s3109_s18 + $0x278] sm:$0xff] }
  0xae   : > { %1351 = vst [vmem:[%s3127_s14 + $0x238] sm:$0xff] %v3547_v50  ;;  %v844_v50 = vmul.f32 0.999, %v716_v51  ;;  %v719_v51 = vld [vmem:[%s3114_s27 + $0x278] sm:$0xff]  ;;  %v3591_v58 = vadd.f32 %v1102_v45, %v846_v25  ;;  %v1105_v25 = vmul.f32 0.001, %v977_v13 }
  0xaf   : > { %1352 = vst [vmem:[%s3127_s14 + $0x240] sm:$0xff] %v3554_v38  ;;  %v847_v22 = vmul.f32 0.999, %v719_v51  ;;  %v849_v51 = vmul.f32 0.999, %v721_v56  ;;  %v725_v13 = vld [vmem:[%s3114_s27 + $0x2a8] sm:$0xff] }
  0xb0   : > { %4884 = vst [vmem:[#allocation72_spill] sm:$0xff] %v3562_v16  ;;  %v3578_v4 = vadd.f32 %v1100_v1, %v844_v50  ;;  %v720_v50 = vld [vmem:[%s3114_s27 + $0x280] sm:$0xff]  ;;  %v850_v45 = vmul.f32 0.999, %v722_v43 }
  0xb1   : > { %1353 = vst [vmem:[%s3127_s14 + $0x248] sm:$0xff] %v3562_v16  ;;  %v1103_v16 = vmul.f32 0.001, %v975_v60  ;;  %v976_v1 = vld [vmem:[%s3109_s18 + $0x280] sm:$0xff]  ;;  %v978_v60 = vld [vmem:[%s3109_s18 + $0x290] sm:$0xff]  ;;  %v3610_v56 = vadd.f32 %v1105_v25, %v849_v51  ;;  %v981_v51 = vld [vmem:[%s3109_s18 + $0x2a8] sm:$0xff] }
  0xb2   : > { %4885 = vst [vmem:[#allocation73_spill] sm:$0xff] %v3571_v27  ;;  %v1104_v24 = vmul.f32 0.001, %v976_v1  ;;  %v1106_v1 = vmul.f32 0.001, %v978_v60  ;;  %v726_v25 = vld [vmem:[%s3114_s27 + $0x2b0] sm:$0xff] }
  0xb3   : > { %1354 = vst [vmem:[%s3127_s14 + $0x250] sm:$0xff] %v3567_v52  ;;  %v3595_v11 = vadd.f32 %v1103_v16, %v847_v22  ;;  %v979_v22 = vld [vmem:[%s3109_s18 + $0x298] sm:$0xff] }
  0xb4   : > { %1355 = vst [vmem:[%s3127_s14 + $0x258] sm:$0xff] %v3571_v27  ;;  %v848_v27 = vmul.f32 0.999, %v720_v50  ;;  %v723_v50 = vld [vmem:[%s3114_s27 + $0x298] sm:$0xff]  ;;  %v3615_v43 = vadd.f32 %v1106_v1, %v850_v45  ;;  %v1109_v45 = vmul.f32 0.001, %v981_v51 }
  0xb5   : > { %1356 = vst [vmem:[%s3127_s14 + $0x260] sm:$0xff] %v3578_v4  ;;  %v851_v16 = vmul.f32 0.999, %v723_v50  ;;  %v853_v50 = vmul.f32 0.999, %v725_v13  ;;  %v729_v51 = vld [vmem:[%s3114_s27 + $0x2c8] sm:$0xff] }
  0xb6   : > { %4886 = vst [vmem:[#allocation74_spill] sm:$0xff] %v3586_v36  ;;  %v3602_v63 = vadd.f32 %v1104_v24, %v848_v27  ;;  %v724_v27 = vld [vmem:[%s3114_s27 + $0x2a0] sm:$0xff]  ;;  %v854_v1 = vmul.f32 0.999, %v726_v25 }
  0xb7   : > { %1357 = vst [vmem:[%s3127_s14 + $0x268] sm:$0xff] %v3586_v36  ;;  %v1107_v36 = vmul.f32 0.001, %v979_v22  ;;  %v980_v24 = vld [vmem:[%s3109_s18 + $0x2a0] sm:$0xff]  ;;  %v982_v22 = vld [vmem:[%s3109_s18 + $0x2b0] sm:$0xff]  ;;  %v3634_v13 = vadd.f32 %v1109_v45, %v853_v50  ;;  %v985_v50 = vld [vmem:[%s3109_s18 + $0x2c8] sm:$0xff] }
  0xb8   : > { %4887 = vst [vmem:[#allocation75_spill] sm:$0xff] %v3595_v11  ;;  %v1108_v60 = vmul.f32 0.001, %v980_v24  ;;  %v1110_v24 = vmul.f32 0.001, %v982_v22  ;;  %v730_v45 = vld [vmem:[%s3114_s27 + $0x2d0] sm:$0xff] }
  0xb9   : > { %1358 = vst [vmem:[%s3127_s14 + $0x270] sm:$0xff] %v3591_v58  ;;  %v3619_v14 = vadd.f32 %v1107_v36, %v851_v16  ;;  %v983_v16 = vld [vmem:[%s3109_s18 + $0x2b8] sm:$0xff] }
  0xba   : > { %1359 = vst [vmem:[%s3127_s14 + $0x278] sm:$0xff] %v3595_v11  ;;  %v852_v11 = vmul.f32 0.999, %v724_v27  ;;  %v727_v27 = vld [vmem:[%s3114_s27 + $0x2b8] sm:$0xff]  ;;  %v3639_v25 = vadd.f32 %v1110_v24, %v854_v1  ;;  %v1113_v1 = vmul.f32 0.001, %v985_v50 }
  0xbb   : > { %1360 = vst [vmem:[%s3127_s14 + $0x280] sm:$0xff] %v3602_v63  ;;  %v855_v36 = vmul.f32 0.999, %v727_v27  ;;  %v857_v27 = vmul.f32 0.999, %v729_v51  ;;  %v733_v50 = vld [vmem:[%s3114_s27 + $0x2e8] sm:$0xff] }
  0xbc   : > { %4888 = vst [vmem:[#allocation76_spill] sm:$0xff] %v3610_v56  ;;  %v3626_v8 = vadd.f32 %v1108_v60, %v852_v11  ;;  %v728_v11 = vld [vmem:[%s3114_s27 + $0x2c0] sm:$0xff]  ;;  %v858_v24 = vmul.f32 0.999, %v730_v45 }
  0xbd   : > { %1361 = vst [vmem:[%s3127_s14 + $0x288] sm:$0xff] %v3610_v56  ;;  %v1111_v56 = vmul.f32 0.001, %v983_v16  ;;  %v984_v60 = vld [vmem:[%s3109_s18 + $0x2c0] sm:$0xff]  ;;  %v986_v16 = vld [vmem:[%s3109_s18 + $0x2d0] sm:$0xff]  ;;  %v3658_v51 = vadd.f32 %v1113_v1, %v857_v27  ;;  %v989_v27 = vld [vmem:[%s3109_s18 + $0x2e8] sm:$0xff] }
  0xbe   : > { %4889 = vst [vmem:[#allocation77_spill] sm:$0xff] %v3619_v14  ;;  %v1112_v22 = vmul.f32 0.001, %v984_v60  ;;  %v1114_v60 = vmul.f32 0.001, %v986_v16  ;;  %v734_v1 = vld [vmem:[%s3114_s27 + $0x2f0] sm:$0xff] }
  0xbf   : > { %1362 = vst [vmem:[%s3127_s14 + $0x290] sm:$0xff] %v3615_v43  ;;  %v3643_v42 = vadd.f32 %v1111_v56, %v855_v36  ;;  %v987_v36 = vld [vmem:[%s3109_s18 + $0x2d8] sm:$0xff] }
  0xc0   : > { %1363 = vst [vmem:[%s3127_s14 + $0x298] sm:$0xff] %v3619_v14  ;;  %v856_v14 = vmul.f32 0.999, %v728_v11  ;;  %v731_v11 = vld [vmem:[%s3114_s27 + $0x2d8] sm:$0xff]  ;;  %v3663_v45 = vadd.f32 %v1114_v60, %v858_v24  ;;  %v1117_v24 = vmul.f32 0.001, %v989_v27 }
  0xc1   : > { %1364 = vst [vmem:[%s3127_s14 + $0x2a0] sm:$0xff] %v3626_v8  ;;  %v859_v56 = vmul.f32 0.999, %v731_v11  ;;  %v861_v11 = vmul.f32 0.999, %v733_v50  ;;  %v737_v27 = vld [vmem:[%s3114_s27 + $0x308] sm:$0xff] }
  0xc2   : > { %4890 = vst [vmem:[#allocation78_spill] sm:$0xff] %v3634_v13  ;;  %v3650_v28 = vadd.f32 %v1112_v22, %v856_v14  ;;  %v732_v14 = vld [vmem:[%s3114_s27 + $0x2e0] sm:$0xff]  ;;  %v862_v60 = vmul.f32 0.999, %v734_v1 }
  0xc3   : > { %1365 = vst [vmem:[%s3127_s14 + $0x2a8] sm:$0xff] %v3634_v13  ;;  %v1115_v13 = vmul.f32 0.001, %v987_v36  ;;  %v988_v22 = vld [vmem:[%s3109_s18 + $0x2e0] sm:$0xff]  ;;  %v990_v36 = vld [vmem:[%s3109_s18 + $0x2f0] sm:$0xff]  ;;  %v3682_v50 = vadd.f32 %v1117_v24, %v861_v11  ;;  %v993_v11 = vld [vmem:[%s3109_s18 + $0x308] sm:$0xff] }
  0xc4   : > { %4891 = vst [vmem:[#allocation79_spill] sm:$0xff] %v3643_v42  ;;  %v1116_v16 = vmul.f32 0.001, %v988_v22  ;;  %v1118_v22 = vmul.f32 0.001, %v990_v36  ;;  %v738_v24 = vld [vmem:[%s3114_s27 + $0x310] sm:$0xff] }
  0xc5   : > { %1366 = vst [vmem:[%s3127_s14 + $0x2b0] sm:$0xff] %v3639_v25  ;;  %v3667_v15 = vadd.f32 %v1115_v13, %v859_v56  ;;  %v991_v56 = vld [vmem:[%s3109_s18 + $0x2f8] sm:$0xff] }
  0xc6   : > { %1367 = vst [vmem:[%s3127_s14 + $0x2b8] sm:$0xff] %v3643_v42  ;;  %v860_v42 = vmul.f32 0.999, %v732_v14  ;;  %v735_v14 = vld [vmem:[%s3114_s27 + $0x2f8] sm:$0xff]  ;;  %v3687_v1 = vadd.f32 %v1118_v22, %v862_v60  ;;  %v1121_v60 = vmul.f32 0.001, %v993_v11 }
  0xc7   : > { %1368 = vst [vmem:[%s3127_s14 + $0x2c0] sm:$0xff] %v3650_v28  ;;  %v863_v13 = vmul.f32 0.999, %v735_v14  ;;  %v865_v14 = vmul.f32 0.999, %v737_v27  ;;  %v741_v11 = vld [vmem:[%s3114_s27 + $0x328] sm:$0xff] }
  0xc8   : > { %4892 = vst [vmem:[#allocation80_spill] sm:$0xff] %v3658_v51  ;;  %v3674_v39 = vadd.f32 %v1116_v16, %v860_v42  ;;  %v736_v42 = vld [vmem:[%s3114_s27 + $0x300] sm:$0xff]  ;;  %v866_v22 = vmul.f32 0.999, %v738_v24 }
  0xc9   : > { %1369 = vst [vmem:[%s3127_s14 + $0x2c8] sm:$0xff] %v3658_v51  ;;  %v1119_v51 = vmul.f32 0.001, %v991_v56  ;;  %v992_v16 = vld [vmem:[%s3109_s18 + $0x300] sm:$0xff]  ;;  %v994_v56 = vld [vmem:[%s3109_s18 + $0x310] sm:$0xff]  ;;  %v3706_v27 = vadd.f32 %v1121_v60, %v865_v14  ;;  %v997_v14 = vld [vmem:[%s3109_s18 + $0x328] sm:$0xff] }
  0xca   : > { %4893 = vst [vmem:[#allocation81_spill] sm:$0xff] %v3667_v15  ;;  %v1120_v36 = vmul.f32 0.001, %v992_v16  ;;  %v1122_v16 = vmul.f32 0.001, %v994_v56  ;;  %v742_v60 = vld [vmem:[%s3114_s27 + $0x330] sm:$0xff] }
  0xcb   : > { %1370 = vst [vmem:[%s3127_s14 + $0x2d0] sm:$0xff] %v3663_v45  ;;  %v3691_v10 = vadd.f32 %v1119_v51, %v863_v13  ;;  %v995_v13 = vld [vmem:[%s3109_s18 + $0x318] sm:$0xff] }
  0xcc   : > { %1371 = vst [vmem:[%s3127_s14 + $0x2d8] sm:$0xff] %v3667_v15  ;;  %v864_v15 = vmul.f32 0.999, %v736_v42  ;;  %v739_v42 = vld [vmem:[%s3114_s27 + $0x318] sm:$0xff]  ;;  %v3711_v24 = vadd.f32 %v1122_v16, %v866_v22  ;;  %v1125_v22 = vmul.f32 0.001, %v997_v14 }
  0xcd   : > { %1372 = vst [vmem:[%s3127_s14 + $0x2e0] sm:$0xff] %v3674_v39  ;;  %v867_v51 = vmul.f32 0.999, %v739_v42  ;;  %v869_v42 = vmul.f32 0.999, %v741_v11  ;;  %v745_v14 = vld [vmem:[%s3114_s27 + $0x348] sm:$0xff] }
  0xce   : > { %4894 = vst [vmem:[#allocation82_spill] sm:$0xff] %v3682_v50  ;;  %v3698_v59 = vadd.f32 %v1120_v36, %v864_v15  ;;  %v740_v15 = vld [vmem:[%s3114_s27 + $0x320] sm:$0xff]  ;;  %v870_v16 = vmul.f32 0.999, %v742_v60 }
  0xcf   : > { %1373 = vst [vmem:[%s3127_s14 + $0x2e8] sm:$0xff] %v3682_v50  ;;  %v1123_v50 = vmul.f32 0.001, %v995_v13  ;;  %v996_v36 = vld [vmem:[%s3109_s18 + $0x320] sm:$0xff]  ;;  %v998_v13 = vld [vmem:[%s3109_s18 + $0x330] sm:$0xff]  ;;  %v3730_v11 = vadd.f32 %v1125_v22, %v869_v42  ;;  %v1001_v42 = vld [vmem:[%s3109_s18 + $0x348] sm:$0xff] }
  0xd0   : > { %4895 = vst [vmem:[#allocation83_spill] sm:$0xff] %v3691_v10  ;;  %v1124_v56 = vmul.f32 0.001, %v996_v36  ;;  %v1126_v36 = vmul.f32 0.001, %v998_v13  ;;  %v746_v22 = vld [vmem:[%s3114_s27 + $0x350] sm:$0xff] }
  0xd1   : > { %1374 = vst [vmem:[%s3127_s14 + $0x2f0] sm:$0xff] %v3687_v1  ;;  %v3715_v0 = vadd.f32 %v1123_v50, %v867_v51  ;;  %v999_v51 = vld [vmem:[%s3109_s18 + $0x338] sm:$0xff] }
  0xd2   : > { %4896 = vst [vmem:[#allocation84_spill] sm:$0xff] %v3698_v59  ;;  %v3735_v60 = vadd.f32 %v1126_v36, %v870_v16  ;;  %v1129_v16 = vmul.f32 0.001, %v1001_v42  ;;  %v874_v36 = vmul.f32 0.999, %v746_v22  ;;  %v749_v42 = vld [vmem:[%s3114_s27 + $0x368] sm:$0xff] }
  0xd3   : > { %1375 = vst [vmem:[%s3127_s14 + $0x2f8] sm:$0xff] %v3691_v10  ;;  %v868_v10 = vmul.f32 0.999, %v740_v15  ;;  %v743_v15 = vld [vmem:[%s3114_s27 + $0x338] sm:$0xff] }
  0xd4   : > { %1376 = vst [vmem:[%s3127_s14 + $0x300] sm:$0xff] %v3698_v59  ;;  %v871_v50 = vmul.f32 0.999, %v743_v15  ;;  %v873_v15 = vmul.f32 0.999, %v745_v14 }
  0xd5   : > { %4897 = vst [vmem:[#allocation85_spill] sm:$0xff] %v3706_v27  ;;  %v3722_v59 = vadd.f32 %v1124_v56, %v868_v10  ;;  %v744_v10 = vld [vmem:[%s3114_s27 + $0x340] sm:$0xff] }
  0xd6   : > { %4898 = vst [vmem:[#allocation86_spill] sm:$0xff] %v3711_v24  ;;  %v1000_v56 = vld [vmem:[%s3109_s18 + $0x340] sm:$0xff]  ;;  %v3754_v14 = vadd.f32 %v1129_v16, %v873_v15  ;;  %v1005_v15 = vld [vmem:[%s3109_s18 + $0x368] sm:$0xff]  ;;  %v750_v16 = vld [vmem:[%s3114_s27 + $0x370] sm:$0xff] }
  0xd7   : > { %1377 = vst [vmem:[%s3127_s14 + $0x308] sm:$0xff] %v3706_v27  ;;  %v1127_v27 = vmul.f32 0.001, %v999_v51  ;;  %v1128_v13 = vmul.f32 0.001, %v1000_v56  ;;  %v1002_v51 = vld [vmem:[%s3109_s18 + $0x350] sm:$0xff] }
  0xd8   : > { %4899 = vst [vmem:[#allocation87_spill] sm:$0xff] %v3715_v0  ;;  %v1130_v56 = vmul.f32 0.001, %v1002_v51 }
  0xd9   : > { %1378 = vst [vmem:[%s3127_s14 + $0x310] sm:$0xff] %v3711_v24  ;;  %v3739_v24 = vadd.f32 %v1127_v27, %v871_v50  ;;  %v1003_v50 = vld [vmem:[%s3109_s18 + $0x358] sm:$0xff] }
  0xda   : > { %4900 = vst [vmem:[#allocation88_spill] sm:$0xff] %v3722_v59  ;;  %v3759_v22 = vadd.f32 %v1130_v56, %v874_v36  ;;  %v1133_v36 = vmul.f32 0.001, %v1005_v15  ;;  %v878_v56 = vmul.f32 0.999, %v750_v16  ;;  %v753_v15 = vld [vmem:[%s3114_s27 + $0x388] sm:$0xff] }
  0xdb   : > { %1379 = vst [vmem:[%s3127_s14 + $0x318] sm:$0xff] %v3715_v0  ;;  %v872_v0 = vmul.f32 0.999, %v744_v10  ;;  %v747_v10 = vld [vmem:[%s3114_s27 + $0x358] sm:$0xff] }
  0xdc   : > { %1380 = vst [vmem:[%s3127_s14 + $0x320] sm:$0xff] %v3722_v59  ;;  %v875_v27 = vmul.f32 0.999, %v747_v10  ;;  %v877_v10 = vmul.f32 0.999, %v749_v42 }
  0xdd   : > { %4901 = vst [vmem:[#allocation89_spill] sm:$0xff] %v3730_v11  ;;  %v3746_v47 = vadd.f32 %v1128_v13, %v872_v0  ;;  %v748_v0 = vld [vmem:[%s3114_s27 + $0x360] sm:$0xff] }
  0xde   : > { %4902 = vst [vmem:[#allocation90_spill] sm:$0xff] %v3735_v60  ;;  %v1004_v13 = vld [vmem:[%s3109_s18 + $0x360] sm:$0xff]  ;;  %v3778_v42 = vadd.f32 %v1133_v36, %v877_v10  ;;  %v1009_v10 = vld [vmem:[%s3109_s18 + $0x388] sm:$0xff]  ;;  %v754_v36 = vld [vmem:[%s3114_s27 + $0x390] sm:$0xff] }
  0xdf   : > { %1381 = vst [vmem:[%s3127_s14 + $0x328] sm:$0xff] %v3730_v11  ;;  %v1131_v11 = vmul.f32 0.001, %v1003_v50  ;;  %v1132_v51 = vmul.f32 0.001, %v1004_v13  ;;  %v1006_v50 = vld [vmem:[%s3109_s18 + $0x370] sm:$0xff] }
  0xe0   : > { %4903 = vst [vmem:[#allocation91_spill] sm:$0xff] %v3739_v24  ;;  %v1134_v13 = vmul.f32 0.001, %v1006_v50 }
  0xe1   : > { %1382 = vst [vmem:[%s3127_s14 + $0x330] sm:$0xff] %v3735_v60  ;;  %v3763_v40 = vadd.f32 %v1131_v11, %v875_v27  ;;  %v1007_v27 = vld [vmem:[%s3109_s18 + $0x378] sm:$0xff] }
  0xe2   : > { %1383 = vst [vmem:[%s3127_s14 + $0x338] sm:$0xff] %v3739_v24  ;;  %v876_v24 = vmul.f32 0.999, %v748_v0  ;;  %v751_v0 = vld [vmem:[%s3114_s27 + $0x378] sm:$0xff]  ;;  %v3783_v16 = vadd.f32 %v1134_v13, %v878_v56  ;;  %v1137_v56 = vmul.f32 0.001, %v1009_v10 }
  0xe3   : > { %1384 = vst [vmem:[%s3127_s14 + $0x340] sm:$0xff] %v3746_v47  ;;  %v879_v11 = vmul.f32 0.999, %v751_v0  ;;  %v881_v0 = vmul.f32 0.999, %v753_v15  ;;  %v757_v10 = vld [vmem:[%s3114_s27 + $0x3a8] sm:$0xff] }
  0xe4   : > { %4904 = vst [vmem:[#allocation92_spill] sm:$0xff] %v3754_v14  ;;  %v3770_v19 = vadd.f32 %v1132_v51, %v876_v24  ;;  %v752_v24 = vld [vmem:[%s3114_s27 + $0x380] sm:$0xff]  ;;  %v882_v13 = vmul.f32 0.999, %v754_v36 }
  0xe5   : > { %1385 = vst [vmem:[%s3127_s14 + $0x348] sm:$0xff] %v3754_v14  ;;  %v1135_v14 = vmul.f32 0.001, %v1007_v27  ;;  %v1008_v51 = vld [vmem:[%s3109_s18 + $0x380] sm:$0xff]  ;;  %v1010_v27 = vld [vmem:[%s3109_s18 + $0x390] sm:$0xff]  ;;  %v3802_v15 = vadd.f32 %v1137_v56, %v881_v0  ;;  %v1013_v0 = vld [vmem:[%s3109_s18 + $0x3a8] sm:$0xff] }
  0xe6   : > { %4905 = vst [vmem:[#allocation93_spill] sm:$0xff] %v3763_v40  ;;  %v1136_v50 = vmul.f32 0.001, %v1008_v51  ;;  %v1138_v51 = vmul.f32 0.001, %v1010_v27  ;;  %v758_v56 = vld [vmem:[%s3114_s27 + $0x3b0] sm:$0xff] }
  0xe7   : > { %1386 = vst [vmem:[%s3127_s14 + $0x350] sm:$0xff] %v3759_v22  ;;  %v3787_v17 = vadd.f32 %v1135_v14, %v879_v11  ;;  %v1011_v11 = vld [vmem:[%s3109_s18 + $0x398] sm:$0xff] }
  0xe8   : > { %1387 = vst [vmem:[%s3127_s14 + $0x358] sm:$0xff] %v3763_v40  ;;  %v880_v40 = vmul.f32 0.999, %v752_v24  ;;  %v755_v24 = vld [vmem:[%s3114_s27 + $0x398] sm:$0xff]  ;;  %v3807_v36 = vadd.f32 %v1138_v51, %v882_v13  ;;  %v1141_v13 = vmul.f32 0.001, %v1013_v0 }
  0xe9   : > { %1388 = vst [vmem:[%s3127_s14 + $0x360] sm:$0xff] %v3770_v19  ;;  %v883_v14 = vmul.f32 0.999, %v755_v24  ;;  %v885_v24 = vmul.f32 0.999, %v757_v10  ;;  %v761_v0 = vld [vmem:[%s3114_s27 + $0x3c8] sm:$0xff] }
  0xea   : > { %4906 = vst [vmem:[#allocation94_spill] sm:$0xff] %v3778_v42  ;;  %v3794_v9 = vadd.f32 %v1136_v50, %v880_v40  ;;  %v756_v40 = vld [vmem:[%s3114_s27 + $0x3a0] sm:$0xff]  ;;  %v886_v51 = vmul.f32 0.999, %v758_v56 }
  0xeb   : > { %1389 = vst [vmem:[%s3127_s14 + $0x368] sm:$0xff] %v3778_v42  ;;  %v1139_v42 = vmul.f32 0.001, %v1011_v11  ;;  %v1012_v50 = vld [vmem:[%s3109_s18 + $0x3a0] sm:$0xff]  ;;  %v1014_v11 = vld [vmem:[%s3109_s18 + $0x3b0] sm:$0xff]  ;;  %v3826_v10 = vadd.f32 %v1141_v13, %v885_v24  ;;  %v1017_v24 = vld [vmem:[%s3109_s18 + $0x3c8] sm:$0xff] }
  0xec   : > { %4907 = vst [vmem:[#allocation95_spill] sm:$0xff] %v3787_v17  ;;  %v1140_v27 = vmul.f32 0.001, %v1012_v50  ;;  %v1142_v50 = vmul.f32 0.001, %v1014_v11  ;;  %v762_v13 = vld [vmem:[%s3114_s27 + $0x3d0] sm:$0xff] }
  0xed   : > { %1390 = vst [vmem:[%s3127_s14 + $0x370] sm:$0xff] %v3783_v16  ;;  %v3811_v60 = vadd.f32 %v1139_v42, %v883_v14  ;;  %v1015_v14 = vld [vmem:[%s3109_s18 + $0x3b8] sm:$0xff] }
  0xee   : > { %1391 = vst [vmem:[%s3127_s14 + $0x378] sm:$0xff] %v3787_v17  ;;  %v884_v17 = vmul.f32 0.999, %v756_v40  ;;  %v759_v40 = vld [vmem:[%s3114_s27 + $0x3b8] sm:$0xff]  ;;  %v3831_v56 = vadd.f32 %v1142_v50, %v886_v51  ;;  %v1145_v51 = vmul.f32 0.001, %v1017_v24 }
  0xef   : > { %1392 = vst [vmem:[%s3127_s14 + $0x380] sm:$0xff] %v3794_v9  ;;  %v887_v42 = vmul.f32 0.999, %v759_v40  ;;  %v889_v40 = vmul.f32 0.999, %v761_v0  ;;  %v765_v24 = vld [vmem:[%s3114_s27 + $0x3e8] sm:$0xff] }
  0xf0   : > { %4908 = vst [vmem:[#allocation96_spill] sm:$0xff] %v3802_v15  ;;  %v3818_v59 = vadd.f32 %v1140_v27, %v884_v17  ;;  %v760_v17 = vld [vmem:[%s3114_s27 + $0x3c0] sm:$0xff]  ;;  %v890_v50 = vmul.f32 0.999, %v762_v13 }
  0xf1   : > { %1393 = vst [vmem:[%s3127_s14 + $0x388] sm:$0xff] %v3802_v15  ;;  %v1143_v15 = vmul.f32 0.001, %v1015_v14  ;;  %v1016_v27 = vld [vmem:[%s3109_s18 + $0x3c0] sm:$0xff]  ;;  %v1018_v14 = vld [vmem:[%s3109_s18 + $0x3d0] sm:$0xff]  ;;  %v3850_v0 = vadd.f32 %v1145_v51, %v889_v40 }
  0xf2   : > { %4909 = vst [vmem:[#allocation97_spill] sm:$0xff] %v3811_v60  ;;  %v1144_v11 = vmul.f32 0.001, %v1016_v27  ;;  %v1146_v27 = vmul.f32 0.001, %v1018_v14  ;;  %v766_v40 = vld [vmem:[%s3114_s27 + $0x3f0] sm:$0xff] }
  0xf3   : > { %1394 = vst [vmem:[%s3127_s14 + $0x390] sm:$0xff] %v3807_v36  ;;  %v3835_v23 = vadd.f32 %v1143_v15, %v887_v42  ;;  %v1019_v42 = vld [vmem:[%s3109_s18 + $0x3d8] sm:$0xff]  ;;  %v893_v14 = vmul.f32 0.999, %v765_v24  ;;  %v1022_v51 = vld [vmem:[%s3109_s18 + $0x3f0] sm:$0xff] }
  0xf4   : > { %1395 = vst [vmem:[%s3127_s14 + $0x398] sm:$0xff] %v3811_v60  ;;  %v888_v60 = vmul.f32 0.999, %v760_v17  ;;  %v763_v17 = vld [vmem:[%s3114_s27 + $0x3d8] sm:$0xff]  ;;  %v1274_v13 = vadd.f32 %v1146_v27, %v890_v50  ;;  %v894_v29 = vmul.f32 0.999, %v766_v40 }
  0xf5   : > { %1396 = vst [vmem:[%s3127_s14 + $0x3a0] sm:$0xff] %v3818_v59  ;;  %v891_v15 = vmul.f32 0.999, %v763_v17  ;;  %v767_v50 = vld [vmem:[%s3114_s27 + $0x3f8] sm:$0xff]  ;;  %v1150_v27 = vmul.f32 0.001, %v1022_v51  ;;  %v3868_v24 = vadd.f32 %v1149_v41, %v893_v14 }
  0xf6   : > { %4910 = vst [vmem:[#allocation98_spill] sm:$0xff] %v3826_v10  ;;  %v3842_v53 = vadd.f32 %v1144_v11, %v888_v60  ;;  %v764_v60 = vld [vmem:[%s3114_s27 + $0x3e0] sm:$0xff] }
  0xf7   : > { %1397 = vst [vmem:[%s3127_s14 + $0x3a8] sm:$0xff] %v3826_v10  ;;  %v1147_v10 = vmul.f32 0.001, %v1019_v42  ;;  %v1020_v11 = vld [vmem:[%s3109_s18 + $0x3e0] sm:$0xff]  ;;  %v892_v21 = vmul.f32 0.999, %v764_v60 }
  0xf8   : > { %4911 = vst [vmem:[#allocation99_spill] sm:$0xff] %v3835_v23  ;;  %v895_v60 = vmul.f32 0.999, %v767_v50 }
  0xf9   : > { %1398 = vst [vmem:[%s3127_s14 + $0x3b0] sm:$0xff] %v3831_v56  ;;  %v3857_v17 = vadd.f32 %v1147_v10, %v891_v15  ;;  %v1278_v15 = vadd.f32 %v1150_v27, %v894_v29 }
  0xfa   : > { %1399 = vst [vmem:[%s3127_s14 + $0x3b8] sm:$0xff] %v3835_v23  ;;  %v1148_v23 = vmul.f32 0.001, %v1020_v11  ;;  %v1023_v11 = vld [vmem:[%s3109_s18 + $0x3f8] sm:$0xff] }
  0xfb   : > { %1400 = vst [vmem:[%s3127_s14 + $0x3c0] sm:$0xff] %v3842_v53  ;;  %v1151_v10 = vmul.f32 0.001, %v1023_v11 }
  0xfc   : > { %4912 = vst [vmem:[#allocation100_spill] sm:$0xff] %v3850_v0  ;;  %v1276_v42 = vadd.f32 %v1148_v23, %v892_v21 }
  0xfd   : > { %1401 = vst [vmem:[%s3127_s14 + $0x3c8] sm:$0xff] %v3850_v0  ;;  %v3872_v0 = vadd.f32 %v1151_v10, %v895_v60 }
  0xfe   : > { %1402 = vst [vmem:[%s3127_s14 + $0x3d0] sm:$0xff] %v1274_v13 }
  0xff   : > { %1403 = vst [vmem:[%s3127_s14 + $0x3d8] sm:$0xff] %v3857_v17  ;;  %1411 = sbr.rel (%p2617_p12) target bundleno = 263 (0x107), region = 76 }
 0x100   : > { %1404 = vst [vmem:[%s3127_s14 + $0x3e0] sm:$0xff] %v1276_v42 }
 0x101   : > { %1405 = vst [vmem:[%s3127_s14 + $0x3e8] sm:$0xff] %v3868_v24 }
 0x102   : > { %1406 = vst [vmem:[%s3127_s14 + $0x3f0] sm:$0xff] %v1278_v15 }
 0x103   : > { %1407 = vst [vmem:[%s3127_s14 + $0x3f8] sm:$0xff] %v3872_v0 }
 0x104   : > { %v2936_v57 = vmov 0.0  }
 0x105   : > { %1412 = vst [vmem:[#allocation2] sm:$0xff] %v2936_v57 }
 0x106   : > { %1413 = vst [vmem:[#allocation2 + $0x8] sm:$0xff] %v2936_v57 }
 0x107 PF: > { %v1432_v41 = vpack.c.bf16 %v3303_v3, %v3290_v48  ;;  %v1448_v29 = vpack.c.bf16 %v3495_v46, %v3482_v55  ;;  %v1464_v21 = vpack.c.bf16 %v3687_v1, %v3674_v39  ;;  %v1480_v23 = vpack.c.bf16 %v1278_v15, %v1276_v42  ;;  %v4925_v1 = vld [vmem:[#allocation64_spill] sm:$0xff]  ;;  %v4929_v50 = vld [vmem:[#allocation42_spill] sm:$0xff]  ;;  %v4930_v27 = vld [vmem:[#allocation43_spill] sm:$0xff]  ;;  %p2618_p13 = scmp.ne.s32.totalorder %s3067_s1, 1 }
 0x108   : > { %v1430_v14 = vpack.c.bf16 %v3279_v35, %v3266_v18  ;;  %v1446_v40 = vpack.c.bf16 %v3471_v34, %v3458_v7  ;;  %v1462_v48 = vpack.c.bf16 %v3663_v45, %v3650_v28  ;;  %v1478_v3 = vpack.c.bf16 %v1274_v13, %v3842_v53  ;;  %v4916_v53 = vld [vmem:[#allocation50_spill] sm:$0xff]  ;;  %v4932_v10 = vld [vmem:[#allocation63_spill] sm:$0xff]  ;;  %s4990_s4 = sld [smem:[#allocation105_spill]] (!%p2618_p13) }
 0x109   : > { %1496 = vmatpush.bf16.msra.mxu0 %v1432_v41  ;;  %1509 = vmatpush.bf16.msra.mxu1 %v1448_v29  ;;  %v1428_v55 = vpack.c.bf16 %v3255_v6, %v3242_v54  ;;  %v1444_v39 = vpack.c.bf16 %v3447_v33, %v3434_v32  ;;  %v1460_v18 = vpack.c.bf16 %v3639_v25, %v3626_v8  ;;  %v1416_v8 = vld [vmem:[%s3102_s20] sm:$0xff]  ;;  %v4934_v41 = vld [vmem:[#allocation83_spill] sm:$0xff]  ;;  %s4991_s21 = sld [smem:[#allocation104_spill]] (!%p2618_p13) }
 0x10a   : > { %1522 = vmatpush.bf16.msra.mxu2 %v1464_v21  ;;  %1535 = vmatpush.bf16.msra.mxu3 %v1480_v23  ;;  %v1476_v35 = vpack.c.bf16 %v3831_v56, %v3818_v59  ;;  %v1426_v28 = vpack.c.bf16 %v3231_v44, %v3218_v30  ;;  %v1442_v7 = vpack.c.bf16 %v3423_v12, %v3410_v31  ;;  %v4915_v31 = vld [vmem:[#allocation48_spill] sm:$0xff]  ;;  %v4922_v34 = vld [vmem:[#allocation26_spill] sm:$0xff]  ;;  %v1484_v51 = vunpack.c.l.b16 %v1416_v8 }
 0x10b   : > { %v1458_v54 = vpack.c.bf16 %v3615_v43, %v3602_v63  ;;  %v1474_v6 = vpack.c.bf16 %v3807_v36, %v3794_v9  ;;  %v1424_v59 = vpack.c.bf16 %v3207_v20, %v3194_v5  ;;  %v1440_v32 = vpack.c.bf16 %v3399_v62, %v3386_v26  ;;  %v4914_v26 = vld [vmem:[#allocation30_spill] sm:$0xff]  ;;  %v4927_v36 = vld [vmem:[#allocation84_spill] sm:$0xff] }
 0x10c   : > { %v1456_v30 = vpack.c.bf16 %v3591_v58, %v3578_v4  ;;  %v1472_v44 = vpack.c.bf16 %v3783_v16, %v3770_v19  ;;  %v1422_v9 = vpack.c.bf16 %v3183_v61, %v3170_v49  ;;  %v1438_v5 = vpack.c.bf16 %v3375_v2, %v3362_v37  ;;  %v4913_v19 = vld [vmem:[#allocation28_spill] sm:$0xff]  ;;  %v4918_v61 = vld [vmem:[#allocation70_spill] sm:$0xff] }
 0x10d   : > { %1497 = vmatpush.bf16.msra.mxu0 %v1430_v14  ;;  %1510 = vmatpush.bf16.msra.mxu1 %v1446_v40  ;;  %v1454_v20 = vpack.c.bf16 %v3567_v52, %v3554_v38  ;;  %v1470_v63 = vpack.c.bf16 %v3759_v22, %v3746_v47  ;;  %v1420_v62 = vpack.c.bf16 %v4914_v26, %v4913_v19  ;;  %v4917_v49 = vld [vmem:[#allocation68_spill] sm:$0xff]  ;;  %v4920_v4 = vld [vmem:[#allocation90_spill] sm:$0xff]  ;;  %v1485_v42 = vunpack.c.h.b16 %v1416_v8  ;;  %v4949_v26 = vld [vmem:[#allocation99_spill] sm:$0xff] }
 0x10e   : > { %1523 = vmatpush.bf16.msra.mxu2 %v1462_v48  ;;  %1536 = vmatpush.bf16.msra.mxu3 %v1478_v3  ;;  %v1436_v12 = vpack.c.bf16 %v4916_v53, %v4915_v31  ;;  %v1452_v37 = vpack.c.bf16 %v4918_v61, %v4917_v49  ;;  %v4919_v2 = vld [vmem:[#allocation88_spill] sm:$0xff]  ;;  %v1417_v38 = vld [vmem:[%s3102_s20 + $0x8] sm:$0xff]  ;;  %v1433_v60 = vpack.c.bf16 %v4930_v27, %v4929_v50  ;;  %v4951_v53 = vld [vmem:[#allocation37_spill] sm:$0xff] }
 0x10f   : > { %v1468_v33 = vpack.c.bf16 %v4920_v4, %v4919_v2  ;;  %v4921_v47 = vld [vmem:[#allocation24_spill] sm:$0xff]  ;;  %v4924_v58 = vld [vmem:[#allocation46_spill] sm:$0xff]  ;;  %v1486_v25 = vunpack.c.l.b16 %v1417_v38  ;;  %v1487_v45 = vunpack.c.h.b16 %v1417_v38  ;;  %v1481_v21 = vpack.c.bf16 %v3872_v0, %v3868_v24  ;;  %v4953_v61 = vld [vmem:[#allocation57_spill] sm:$0xff] }
 0x110   : > { %v1418_v46 = vpack.c.bf16 %v4922_v34, %v4921_v47  ;;  %v4923_v52 = vld [vmem:[#allocation44_spill] sm:$0xff]  ;;  %v4926_v22 = vld [vmem:[#allocation66_spill] sm:$0xff]  ;;  %v3953_v40 = vpack.c.b16 %v1484_v51, %v1484_v51  ;;  %v3955_v48 = vpack.c.b16 %v1485_v42, %v1485_v42  ;;  %v4955_v4 = vld [vmem:[#allocation77_spill] sm:$0xff] }
 0x111   : > { %1498 = vmatpush.bf16.msra.mxu0 %v1428_v55  ;;  %1511 = vmatpush.bf16.msra.mxu1 %v1444_v39  ;;  %v1434_v43 = vpack.c.bf16 %v4924_v58, %v4923_v52  ;;  %v1450_v16 = vpack.c.bf16 %v4926_v22, %v4925_v1  ;;  %v4928_v56 = vld [vmem:[#allocation86_spill] sm:$0xff]  ;;  %v3949_v23 = vpack.c.b16 %v1486_v25, %v1486_v25  ;;  %v4935_v3 = vld [vmem:[#allocation40_spill] sm:$0xff]  ;;  %v4936_v55 = vld [vmem:[#allocation41_spill] sm:$0xff] }
 0x112   : > { %1524 = vmatpush.bf16.msra.mxu2 %v1460_v18  ;;  %1537 = vmatpush.bf16.msra.mxu3 %v1476_v35  ;;  %v1466_v13 = vpack.c.bf16 %v4928_v56, %v4927_v36  ;;  %v4931_v11 = vld [vmem:[#allocation62_spill] sm:$0xff]  ;;  %v3951_v14 = vpack.c.b16 %v1487_v45, %v1487_v45  ;;  %v1431_v39 = vpack.c.bf16 %v4936_v55, %v4935_v3  ;;  %v4937_v18 = vld [vmem:[#allocation60_spill] sm:$0xff]  ;;  %v4938_v35 = vld [vmem:[#allocation61_spill] sm:$0xff] }
 0x113   : > { %v1449_v15 = vpack.c.bf16 %v4932_v10, %v4931_v11  ;;  %v4933_v57 = vld [vmem:[#allocation82_spill] sm:$0xff]  ;;  %v1447_v0 = vpack.c.bf16 %v4938_v35, %v4937_v18  ;;  %v4939_v24 = vld [vmem:[#allocation80_spill] sm:$0xff]  ;;  %v4957_v8 = vld [vmem:[#allocation97_spill] sm:$0xff] }
 0x114   : > { %v1465_v29 = vpack.c.bf16 %v4934_v41, %v4933_v57  ;;  %v4948_v19 = vld [vmem:[#allocation98_spill] sm:$0xff]  ;;  %v4950_v31 = vld [vmem:[#allocation36_spill] sm:$0xff]  ;;  %v4963_v1 = vld [vmem:[#allocation75_spill] sm:$0xff] }
 0x115   : > { %1499 = vmatpush.bf16.msra.mxu0 %v1426_v28  ;;  %1512 = vmatpush.bf16.msra.mxu1 %v1442_v7  ;;  %v4940_v28 = vld [vmem:[#allocation81_spill] sm:$0xff]  ;;  %v4952_v49 = vld [vmem:[#allocation56_spill] sm:$0xff]  ;;  %v4958_v34 = vld [vmem:[#allocation34_spill] sm:$0xff] }
 0x116   : > { %1525 = vmatpush.bf16.msra.mxu2 %v1458_v54  ;;  %1538 = vmatpush.bf16.msra.mxu3 %v1474_v6  ;;  %v1463_v7 = vpack.c.bf16 %v4940_v28, %v4939_v24  ;;  %v4941_v54 = vld [vmem:[#allocation100_spill] sm:$0xff]  ;;  %v4960_v58 = vld [vmem:[#allocation54_spill] sm:$0xff]  ;;  %v4965_v36 = vld [vmem:[#allocation95_spill] sm:$0xff] }
 0x117   : > { %v1479_v6 = vpack.c.bf16 %v3857_v17, %v4941_v54  ;;  %v4947_v17 = vld [vmem:[#allocation79_spill] sm:$0xff]  ;;  %v4954_v2 = vld [vmem:[#allocation76_spill] sm:$0xff]  ;;  %v4962_v45 = vld [vmem:[#allocation74_spill] sm:$0xff] }
 0x118   : > { %v4956_v38 = vld [vmem:[#allocation96_spill] sm:$0xff]  ;;  %v1457_v22 = vpack.c.bf16 %v4963_v1, %v4962_v45  ;;  %v4967_v51 = vld [vmem:[#allocation33_spill] sm:$0xff]  ;;  %v4975_v3 = vld [vmem:[#allocation31_spill] sm:$0xff] }
 0x119   : > { %1500 = vmatpush.bf16.msra.mxu0 %v1424_v59  ;;  %1513 = vmatpush.bf16.msra.mxu1 %v1440_v32  ;;  %v4942_v59 = vld [vmem:[#allocation38_spill] sm:$0xff]  ;;  %v4943_v32 = vld [vmem:[#allocation39_spill] sm:$0xff]  ;;  %v1475_v47 = vpack.c.bf16 %v4957_v8, %v4956_v38  ;;  %v4968_v50 = vld [vmem:[#allocation52_spill] sm:$0xff] }
 0x11a   : > { %1526 = vmatpush.bf16.msra.mxu2 %v1456_v30  ;;  %1539 = vmatpush.bf16.msra.mxu3 %v1472_v44  ;;  %v1429_v30 = vpack.c.bf16 %v4943_v32, %v4942_v59  ;;  %v4944_v44 = vld [vmem:[#allocation58_spill] sm:$0xff]  ;;  %v4969_v27 = vld [vmem:[#allocation53_spill] sm:$0xff]  ;;  %v4970_v11 = vld [vmem:[#allocation72_spill] sm:$0xff] }
 0x11b   : > { %v4971_v10 = vld [vmem:[#allocation73_spill] sm:$0xff]  ;;  %v4972_v57 = vld [vmem:[#allocation92_spill] sm:$0xff]  ;;  %v4977_v18 = vld [vmem:[#allocation51_spill] sm:$0xff] }
 0x11c   : > { %v4973_v41 = vld [vmem:[#allocation93_spill] sm:$0xff]  ;;  %v4979_v24 = vld [vmem:[#allocation71_spill] sm:$0xff] }
 0x11d   : > { %1501 = vmatpush.bf16.msra.mxu0 %v1422_v9  ;;  %1514 = vmatpush.bf16.msra.mxu1 %v1438_v5  ;;  %v4945_v9 = vld [vmem:[#allocation59_spill] sm:$0xff]  ;;  %v4982_v59 = vld [vmem:[#allocation25_spill] sm:$0xff] }
 0x11e   : > { %1527 = vmatpush.bf16.msra.mxu2 %v1454_v20  ;;  %1540 = vmatpush.bf16.msra.mxu3 %v1470_v63  ;;  %v1445_v5 = vpack.c.bf16 %v4945_v9, %v4944_v44  ;;  %v4946_v20 = vld [vmem:[#allocation78_spill] sm:$0xff]  ;;  %v4981_v54 = vld [vmem:[#allocation91_spill] sm:$0xff]  ;;  %v4984_v44 = vld [vmem:[#allocation45_spill] sm:$0xff] }
 0x11f   : > { %v1461_v63 = vpack.c.bf16 %v4947_v17, %v4946_v20  ;;  %v4983_v32 = vld [vmem:[#allocation27_spill] sm:$0xff]  ;;  %v4986_v20 = vld [vmem:[#allocation65_spill] sm:$0xff] }
 0x120   : > { %v4985_v9 = vld [vmem:[#allocation47_spill] sm:$0xff] }
 0x121   : > { %1502 = vmatpush.bf16.msra.mxu0 %v1420_v62  ;;  %1515 = vmatpush.bf16.msra.mxu1 %v1436_v12  ;;  %v1477_v62 = vpack.c.bf16 %v4949_v26, %v4948_v19  ;;  %v1427_v12 = vpack.c.bf16 %v4951_v53, %v4950_v31  ;;  %v4987_v17 = vld [vmem:[#allocation67_spill] sm:$0xff]  ;;  %v4988_v19 = vld [vmem:[#allocation85_spill] sm:$0xff] }
 0x122   : > { %1528 = vmatpush.bf16.msra.mxu2 %v1452_v37  ;;  %1541 = vmatpush.bf16.msra.mxu3 %v1468_v33  ;;  %v1443_v37 = vpack.c.bf16 %v4953_v61, %v4952_v49  ;;  %v1459_v33 = vpack.c.bf16 %v4955_v4, %v4954_v2  ;;  %v4989_v26 = vld [vmem:[#allocation87_spill] sm:$0xff]  ;;  %v1414_v2 = vld [vmem:[#allocation2] sm:$0xff] }
 0x125   : > { %1503 = vmatpush.bf16.msra.mxu0 %v1418_v46  ;;  %1516 = vmatpush.bf16.msra.mxu1 %v1434_v43  ;;  %v4959_v46 = vld [vmem:[#allocation35_spill] sm:$0xff] }
 0x126   : > { %1529 = vmatpush.bf16.msra.mxu2 %v1450_v16  ;;  %1542 = vmatpush.bf16.msra.mxu3 %v1466_v13  ;;  %v1425_v52 = vpack.c.bf16 %v4959_v46, %v4958_v34  ;;  %v4961_v43 = vld [vmem:[#allocation55_spill] sm:$0xff]  ;;  %v4964_v16 = vld [vmem:[#allocation94_spill] sm:$0xff]  ;;  %v4966_v13 = vld [vmem:[#allocation32_spill] sm:$0xff] }
 0x127   : > { %v1441_v25 = vpack.c.bf16 %v4961_v43, %v4960_v58  ;;  %v1473_v56 = vpack.c.bf16 %v4965_v36, %v4964_v16  ;;  %v1423_v42 = vpack.c.bf16 %v4967_v51, %v4966_v13 }
 0x128   : > { %1504 = vmatmul.bf16.vlgmr.msra.gmra.mxu0 %v3953_v40  ;;  %1517 = vmatmul.bf16.vlgmr.msra.gmra.mxu1 %v3955_v48 }
 0x129   : > { %1548 = vmatpush.bf16.msrb.mxu0 %v1433_v60  ;;  %1561 = vmatpush.bf16.msrb.mxu1 %v1449_v15  ;;  %v1439_v60 = vpack.c.bf16 %v4969_v27, %v4968_v50  ;;  %v1455_v15 = vpack.c.bf16 %v4971_v10, %v4970_v11 }
 0x12a   : > { %1574 = vmatpush.bf16.msrb.mxu2 %v1465_v29  ;;  %1587 = vmatpush.bf16.msrb.mxu3 %v1481_v21  ;;  %v1471_v29 = vpack.c.bf16 %v4973_v41, %v4972_v57  ;;  %v4974_v21 = vld [vmem:[#allocation29_spill] sm:$0xff] }
 0x12b   : > { %1530 = vmatmul.bf16.vlgmr.msra.gmra.mxu2 %v3949_v23  ;;  %1543 = vmatmul.bf16.vlgmr.msra.gmra.mxu3 %v3951_v14  ;;  %v1421_v55 = vpack.c.bf16 %v4975_v3, %v4974_v21 }
 0x12d   : > { %1549 = vmatpush.bf16.msrb.mxu0 %v1431_v39  ;;  %1562 = vmatpush.bf16.msrb.mxu1 %v1447_v0  ;;  %v4976_v39 = vld [vmem:[#allocation49_spill] sm:$0xff] }
 0x12e   : > { %1575 = vmatpush.bf16.msrb.mxu2 %v1463_v7  ;;  %1588 = vmatpush.bf16.msrb.mxu3 %v1479_v6  ;;  %v1437_v35 = vpack.c.bf16 %v4977_v18, %v4976_v39  ;;  %v4978_v0 = vld [vmem:[#allocation69_spill] sm:$0xff] }
 0x12f   : > { %v1453_v28 = vpack.c.bf16 %v4979_v24, %v4978_v0  ;;  %v4980_v7 = vld [vmem:[#allocation89_spill] sm:$0xff] }
 0x130   : > { %v1469_v6 = vpack.c.bf16 %v4981_v54, %v4980_v7 }
 0x131   : > { %1550 = vmatpush.bf16.msrb.mxu0 %v1429_v30  ;;  %1563 = vmatpush.bf16.msrb.mxu1 %v1445_v5  ;;  %v1419_v30 = vpack.c.bf16 %v4983_v32, %v4982_v59  ;;  %v1435_v5 = vpack.c.bf16 %v4985_v9, %v4984_v44 }
 0x132   : > { %1576 = vmatpush.bf16.msrb.mxu2 %v1461_v63  ;;  %1589 = vmatpush.bf16.msrb.mxu3 %v1477_v62  ;;  %v1451_v63 = vpack.c.bf16 %v4987_v17, %v4986_v20  ;;  %v1467_v62 = vpack.c.bf16 %v4989_v26, %v4988_v19 }
 0x135   : > { %1551 = vmatpush.bf16.msrb.mxu0 %v1427_v12  ;;  %1564 = vmatpush.bf16.msrb.mxu1 %v1443_v37 }
 0x136   : > { %1577 = vmatpush.bf16.msrb.mxu2 %v1459_v33  ;;  %1590 = vmatpush.bf16.msrb.mxu3 %v1475_v47 }
 0x139   : > { %1552 = vmatpush.bf16.msrb.mxu0 %v1425_v52  ;;  %1565 = vmatpush.bf16.msrb.mxu1 %v1441_v25  ;;  %v1415_v25 = vld [vmem:[#allocation2 + $0x8] sm:$0xff] }
 0x13a   : > { %1578 = vmatpush.bf16.msrb.mxu2 %v1457_v22  ;;  %1591 = vmatpush.bf16.msrb.mxu3 %v1473_v56 }
 0x13d   : > { %1553 = vmatpush.bf16.msrb.mxu0 %v1423_v42  ;;  %1566 = vmatpush.bf16.msrb.mxu1 %v1439_v60 }
 0x13e   : > { %1579 = vmatpush.bf16.msrb.mxu2 %v1455_v15  ;;  %1592 = vmatpush.bf16.msrb.mxu3 %v1471_v29 }
 0x141   : > { %1554 = vmatpush.bf16.msrb.mxu0 %v1421_v55  ;;  %1567 = vmatpush.bf16.msrb.mxu1 %v1437_v35 }
 0x142   : > { %1580 = vmatpush.bf16.msrb.mxu2 %v1453_v28  ;;  %1593 = vmatpush.bf16.msrb.mxu3 %v1469_v6 }
 0x145   : > { %1555 = vmatpush.bf16.msrb.mxu0 %v1419_v30  ;;  %1568 = vmatpush.bf16.msrb.mxu1 %v1435_v5 }
 0x146   : > { %1581 = vmatpush.bf16.msrb.mxu2 %v1451_v63  ;;  %1594 = vmatpush.bf16.msrb.mxu3 %v1467_v62 }
 0x148   : > { %1556 = vmatmul.bf16.vlgmr.msrb.gmra.mxu0 %v3953_v40  ;;  %1569 = vmatmul.bf16.vlgmr.msrb.gmra.mxu1 %v3955_v48 }
 0x149   : > { %1582 = vmatmul.bf16.vlgmr.msrb.gmra.mxu2 %v3949_v23  ;;  %1595 = vmatmul.bf16.vlgmr.msrb.gmra.mxu3 %v3951_v14 }
 0x1a5   : > { %v1505_v31 = vpop.f32.mrf.mxu0  ;;  %v1518_v53 = vpop.f32.mrf.mxu1 }
 0x1a6   : > { %v1519_v12 = vadd.f32 %v1518_v53, %v1505_v31 }
 0x1ad   : > { %v1507_v33 = vpop.f32.mrf.mxu0  ;;  %v1520_v38 = vpop.f32.mrf.mxu1 }
 0x1ae   : > { %v1531_v49 = vpop.f32.mrf.mxu2  ;;  %v1544_v61 = vpop.f32.mrf.mxu3 }
 0x1af   : > { %v1532_v37 = vadd.f32 %v1531_v49, %v1519_v12 }
 0x1b1   : > { %v1545_v4 = vadd.f32 %v1544_v61, %v1532_v37 }
 0x1b3   : > { %v1600_v8 = vadd.f32 %v1545_v4, %v1414_v2 }
 0x1b5   : > { %1602 = vst [vmem:[#allocation2] sm:$0xff] %v1600_v8 }
 0x1b6   : > { %v1533_v47 = vpop.f32.mrf.mxu2  ;;  %v1546_v40 = vpop.f32.mrf.mxu3 }
 0x1c5   : > { %v1557_v34 = vpop.f32.mrf.mxu0  ;;  %v1570_v48 = vpop.f32.mrf.mxu1 }
 0x1c6   : > { %v1571_v46 = vadd.f32 %v1570_v48, %v1557_v34 }
 0x1cc   : > { %v1583_v23 = vpop.f32.mrf.mxu2  ;;  %v1596_v52 = vpop.f32.mrf.mxu3 }
 0x1cd   : > { %v1584_v14 = vadd.f32 %v1583_v23, %v1571_v46  ;;  %v1559_v58 = vpop.f32.mrf.mxu0  ;;  %v1572_v43 = vpop.f32.mrf.mxu1 }
 0x1cf   : > { %v1597_v45 = vadd.f32 %v1596_v52, %v1584_v14 }
 0x1d0   : > { %1607 = sbr.rel (%p2618_p13) target bundleno = 967 (0x3c7), region = 80 }
 0x1d1   : > { %v1601_v1 = vadd.f32 %v1597_v45, %v1415_v25 }
 0x1d3   : > { %1603 = vst [vmem:[#allocation2 + $0x8] sm:$0xff] %v1601_v1 }
 0x1d4   : > { %v1585_v22 = vpop.f32.mrf.mxu2  ;;  %v1598_v16 = vpop.f32.mrf.mxu3 }
 0x1d5   : > { %v1641_v36 = vld [vmem:[%s4714_s6 + $0xe0] sm:$0xff]  ;;  %v1643_v56 = vld [vmem:[%s4714_s6 + $0xf0] sm:$0xff]  ;;  %v1642_v21 = vld [vmem:[%s4714_s6 + $0xe8] sm:$0xff] }
 0x1d6   : > { %v1769_v13 = vld [vmem:[%s4713_s5 + $0xe0] sm:$0xff]  ;;  %v1705_v51 = vmul.f32 0.999, %v1641_v36  ;;  %v1707_v42 = vmul.f32 0.999, %v1643_v56  ;;  %v1771_v50 = vld [vmem:[%s4713_s5 + $0xf0] sm:$0xff] }
 0x1d7   : > { %v1673_v27 = vld [vmem:[%s4714_s6 + $0x1e0] sm:$0xff]  ;;  %v1833_v60 = vmul.f32 0.001, %v1769_v13  ;;  %v1835_v11 = vmul.f32 0.001, %v1771_v50  ;;  %v1675_v10 = vld [vmem:[%s4714_s6 + $0x1f0] sm:$0xff] }
 0x1d8   : > { %v1801_v15 = vld [vmem:[%s4713_s5 + $0x1e0] sm:$0xff]  ;;  %v1737_v57 = vmul.f32 0.999, %v1673_v27  ;;  %v1739_v41 = vmul.f32 0.999, %v1675_v10  ;;  %v1803_v29 = vld [vmem:[%s4713_s5 + $0x1f0] sm:$0xff] }
 0x1d9   : > { %v1897_v3 = vadd.f32 %v1833_v60, %v1705_v51  ;;  %v1899_v55 = vadd.f32 %v1835_v11, %v1707_v42  ;;  %v1865_v39 = vmul.f32 0.001, %v1801_v15  ;;  %v1867_v18 = vmul.f32 0.001, %v1803_v29  ;;  %v1644_v35 = vld [vmem:[%s4714_s6 + $0xf8] sm:$0xff]  ;;  %v1770_v0 = vld [vmem:[%s4713_s5 + $0xe8] sm:$0xff] }
 0x1da   : > { %v1706_v24 = vmul.f32 0.999, %v1642_v21  ;;  %v1708_v28 = vmul.f32 0.999, %v1644_v35  ;;  %v1772_v7 = vld [vmem:[%s4713_s5 + $0xf8] sm:$0xff]  ;;  %v1674_v54 = vld [vmem:[%s4714_s6 + $0x1e8] sm:$0xff] }
 0x1db   : > { %2136 = vst [vmem:[#allocation7 + $0xe0] sm:$0xff] %v1897_v3  ;;  %v2233_v6 = vpack.c.bf16 %v1899_v55, %v1897_v3  ;;  %v1929_v59 = vadd.f32 %v1865_v39, %v1737_v57  ;;  %v1931_v32 = vadd.f32 %v1867_v18, %v1739_v41  ;;  %v1834_v30 = vmul.f32 0.001, %v1770_v0  ;;  %v1676_v44 = vld [vmem:[%s4714_s6 + $0x1f8] sm:$0xff]  ;;  %v1802_v9 = vld [vmem:[%s4713_s5 + $0x1e8] sm:$0xff]  ;;  %v1637_v63 = vld [vmem:[%s4714_s6 + $0xc0] sm:$0xff] }
 0x1dc   : > { %v1804_v5 = vld [vmem:[%s4713_s5 + $0x1f8] sm:$0xff]  ;;  %2138 = vst [vmem:[#allocation7 + $0xf0] sm:$0xff] %v1899_v55  ;;  %v1836_v20 = vmul.f32 0.001, %v1772_v7  ;;  %v1738_v17 = vmul.f32 0.999, %v1674_v54 }
 0x1dd   : > { %2256 = vmatpush.bf16.msra.mxu0 %v2233_v6  ;;  %2168 = vst [vmem:[#allocation7 + $0x1e0] sm:$0xff] %v1929_v59  ;;  %v2249_v19 = vpack.c.bf16 %v1931_v32, %v1929_v59  ;;  %v1898_v26 = vadd.f32 %v1834_v30, %v1706_v24  ;;  %v1740_v62 = vmul.f32 0.999, %v1676_v44  ;;  %v1866_v31 = vmul.f32 0.001, %v1802_v9  ;;  %v1639_v53 = vld [vmem:[%s4714_s6 + $0xd0] sm:$0xff] }
 0x1de   : > { %2170 = vst [vmem:[#allocation7 + $0x1f0] sm:$0xff] %v1931_v32  ;;  %v1900_v12 = vadd.f32 %v1836_v20, %v1708_v28  ;;  %v1868_v49 = vmul.f32 0.001, %v1804_v5  ;;  %v1701_v61 = vmul.f32 0.999, %v1637_v63  ;;  %v1765_v37 = vld [vmem:[%s4713_s5 + $0xc0] sm:$0xff] }
 0x1df   : > { %2269 = vmatpush.bf16.msra.mxu1 %v2249_v19  ;;  %2137 = vst [vmem:[#allocation7 + $0xe8] sm:$0xff] %v1898_v26  ;;  %v1930_v2 = vadd.f32 %v1866_v31, %v1738_v17  ;;  %v1703_v4 = vmul.f32 0.999, %v1639_v53  ;;  %v1767_v33 = vld [vmem:[%s4713_s5 + $0xd0] sm:$0xff]  ;;  %v1829_v38 = vmul.f32 0.001, %v1765_v37 }
 0x1e0   : > { %2139 = vst [vmem:[#allocation7 + $0xf8] sm:$0xff] %v1900_v12  ;;  %v2234_v8 = vpack.c.bf16 %v1900_v12, %v1898_v26  ;;  %v1932_v47 = vadd.f32 %v1868_v49, %v1740_v62  ;;  %v1831_v40 = vmul.f32 0.001, %v1767_v33  ;;  %v1669_v34 = vld [vmem:[%s4714_s6 + $0x1c0] sm:$0xff]  ;;  %v1671_v48 = vld [vmem:[%s4714_s6 + $0x1d0] sm:$0xff]  ;;  %v1638_v22 = vld [vmem:[%s4714_s6 + $0xc8] sm:$0xff] }
 0x1e1   : > { %v1797_v46 = vld [vmem:[%s4713_s5 + $0x1c0] sm:$0xff]  ;;  %2169 = vst [vmem:[#allocation7 + $0x1e8] sm:$0xff] %v1930_v2  ;;  %v1893_v23 = vadd.f32 %v1829_v38, %v1701_v61  ;;  %v1733_v52 = vmul.f32 0.999, %v1669_v34  ;;  %v1735_v14 = vmul.f32 0.999, %v1671_v48 }
 0x1e2   : > { %v1799_v58 = vld [vmem:[%s4713_s5 + $0x1d0] sm:$0xff]  ;;  %2282 = vmatpush.bf16.msra.mxu2 %v2234_v8  ;;  %2171 = vst [vmem:[#allocation7 + $0x1f8] sm:$0xff] %v1932_v47  ;;  %v2250_v43 = vpack.c.bf16 %v1932_v47, %v1930_v2  ;;  %v1895_v25 = vadd.f32 %v1831_v40, %v1703_v4  ;;  %v1861_v45 = vmul.f32 0.001, %v1797_v46  ;;  %v1640_v16 = vld [vmem:[%s4714_s6 + $0xd8] sm:$0xff]  ;;  %v1766_v56 = vld [vmem:[%s4713_s5 + $0xc8] sm:$0xff] }
 0x1e3   : > { %v1863_v1 = vmul.f32 0.001, %v1799_v58  ;;  %2132 = vst [vmem:[#allocation7 + $0xc0] sm:$0xff] %v1893_v23  ;;  %v1702_v36 = vmul.f32 0.999, %v1638_v22  ;;  %v1768_v13 = vld [vmem:[%s4713_s5 + $0xd8] sm:$0xff] }
 0x1e4   : > { %2295 = vmatpush.bf16.msra.mxu3 %v2250_v43  ;;  %2134 = vst [vmem:[#allocation7 + $0xd0] sm:$0xff] %v1895_v25  ;;  %v2231_v51 = vpack.c.bf16 %v1895_v25, %v1893_v23  ;;  %v1925_v42 = vadd.f32 %v1861_v45, %v1733_v52  ;;  %v1704_v27 = vmul.f32 0.999, %v1640_v16  ;;  %v1670_v60 = vld [vmem:[%s4714_s6 + $0x1c8] sm:$0xff]  ;;  %v1672_v11 = vld [vmem:[%s4714_s6 + $0x1d8] sm:$0xff]  ;;  %v1633_v0 = vld [vmem:[%s4714_s6 + $0xa0] sm:$0xff] }
 0x1e5   : > { %v1927_v50 = vadd.f32 %v1863_v1, %v1735_v14  ;;  %v1798_v10 = vld [vmem:[%s4713_s5 + $0x1c8] sm:$0xff]  ;;  %v1830_v15 = vmul.f32 0.001, %v1766_v56  ;;  %v1832_v57 = vmul.f32 0.001, %v1768_v13  ;;  %v1800_v3 = vld [vmem:[%s4713_s5 + $0x1d8] sm:$0xff] }
 0x1e6   : > { %v1734_v41 = vmul.f32 0.999, %v1670_v60  ;;  %2257 = vmatpush.bf16.msra.mxu0 %v2231_v51  ;;  %2164 = vst [vmem:[#allocation7 + $0x1c0] sm:$0xff] %v1925_v42  ;;  %v1736_v21 = vmul.f32 0.999, %v1672_v11  ;;  %v1635_v24 = vld [vmem:[%s4714_s6 + $0xb0] sm:$0xff] }
 0x1e7   : > { %v2247_v29 = vpack.c.bf16 %v1927_v50, %v1925_v42  ;;  %v1862_v55 = vmul.f32 0.001, %v1798_v10  ;;  %2166 = vst [vmem:[#allocation7 + $0x1d0] sm:$0xff] %v1927_v50  ;;  %v1894_v39 = vadd.f32 %v1830_v15, %v1702_v36  ;;  %v1896_v18 = vadd.f32 %v1832_v57, %v1704_v27  ;;  %v1761_v28 = vld [vmem:[%s4713_s5 + $0xa0] sm:$0xff]  ;;  %v1763_v59 = vld [vmem:[%s4713_s5 + $0xb0] sm:$0xff]  ;;  %v1634_v49 = vld [vmem:[%s4714_s6 + $0xa8] sm:$0xff] }
 0x1e8   : > { %v1864_v35 = vmul.f32 0.001, %v1800_v3  ;;  %v1697_v54 = vmul.f32 0.999, %v1633_v0  ;;  %v1699_v6 = vmul.f32 0.999, %v1635_v24 }
 0x1e9   : > { %2270 = vmatpush.bf16.msra.mxu1 %v2247_v29  ;;  %v1926_v7 = vadd.f32 %v1862_v55, %v1734_v41  ;;  %v1665_v32 = vld [vmem:[%s4714_s6 + $0x1a0] sm:$0xff]  ;;  %2133 = vst [vmem:[#allocation7 + $0xc8] sm:$0xff] %v1894_v39  ;;  %v2232_v30 = vpack.c.bf16 %v1896_v18, %v1894_v39  ;;  %v1825_v9 = vmul.f32 0.001, %v1761_v28  ;;  %v1827_v5 = vmul.f32 0.001, %v1763_v59 }
 0x1ea   : > { %v1928_v44 = vadd.f32 %v1864_v35, %v1736_v21  ;;  %v1667_v20 = vld [vmem:[%s4714_s6 + $0x1b0] sm:$0xff]  ;;  %2135 = vst [vmem:[#allocation7 + $0xd8] sm:$0xff] %v1896_v18  ;;  %v1729_v17 = vmul.f32 0.999, %v1665_v32  ;;  %v1793_v19 = vld [vmem:[%s4713_s5 + $0x1a0] sm:$0xff]  ;;  %v1636_v61 = vld [vmem:[%s4714_s6 + $0xb8] sm:$0xff] }
 0x1eb   : > { %v1731_v63 = vmul.f32 0.999, %v1667_v20  ;;  %2283 = vmatpush.bf16.msra.mxu2 %v2232_v30  ;;  %2165 = vst [vmem:[#allocation7 + $0x1c8] sm:$0xff] %v1926_v7  ;;  %v1889_v62 = vadd.f32 %v1825_v9, %v1697_v54  ;;  %v1891_v31 = vadd.f32 %v1827_v5, %v1699_v6  ;;  %v1795_v53 = vld [vmem:[%s4713_s5 + $0x1b0] sm:$0xff]  ;;  %v1857_v12 = vmul.f32 0.001, %v1793_v19 }
 0x1ec   : > { %v2248_v26 = vpack.c.bf16 %v1928_v44, %v1926_v7  ;;  %2167 = vst [vmem:[#allocation7 + $0x1d8] sm:$0xff] %v1928_v44  ;;  %v1859_v37 = vmul.f32 0.001, %v1795_v53  ;;  %v1698_v2 = vmul.f32 0.999, %v1634_v49  ;;  %v1762_v4 = vld [vmem:[%s4713_s5 + $0xa8] sm:$0xff] }
 0x1ed   : > { %2128 = vst [vmem:[#allocation7 + $0xa0] sm:$0xff] %v1889_v62  ;;  %v2229_v33 = vpack.c.bf16 %v1891_v31, %v1889_v62  ;;  %v1921_v38 = vadd.f32 %v1857_v12, %v1729_v17  ;;  %v1700_v8 = vmul.f32 0.999, %v1636_v61  ;;  %v1764_v47 = vld [vmem:[%s4713_s5 + $0xb8] sm:$0xff]  ;;  %v1826_v40 = vmul.f32 0.001, %v1762_v4 }
 0x1ee   : > { %2296 = vmatpush.bf16.msra.mxu3 %v2248_v26  ;;  %2130 = vst [vmem:[#allocation7 + $0xb0] sm:$0xff] %v1891_v31  ;;  %v1923_v34 = vadd.f32 %v1859_v37, %v1731_v63  ;;  %v1828_v48 = vmul.f32 0.001, %v1764_v47  ;;  %v1666_v46 = vld [vmem:[%s4714_s6 + $0x1a8] sm:$0xff]  ;;  %v1668_v23 = vld [vmem:[%s4714_s6 + $0x1b8] sm:$0xff]  ;;  %v1629_v36 = vld [vmem:[%s4714_s6 + $0x80] sm:$0xff] }
 0x1ef   : > { %v1794_v52 = vld [vmem:[%s4713_s5 + $0x1a8] sm:$0xff]  ;;  %2258 = vmatpush.bf16.msra.mxu0 %v2229_v33  ;;  %2160 = vst [vmem:[#allocation7 + $0x1a0] sm:$0xff] %v1921_v38  ;;  %v1890_v14 = vadd.f32 %v1826_v40, %v1698_v2  ;;  %v1730_v58 = vmul.f32 0.999, %v1666_v46  ;;  %v1732_v43 = vmul.f32 0.999, %v1668_v23 }
 0x1f0   : > { %v1796_v25 = vld [vmem:[%s4713_s5 + $0x1b8] sm:$0xff]  ;;  %2162 = vst [vmem:[#allocation7 + $0x1b0] sm:$0xff] %v1923_v34  ;;  %v2245_v45 = vpack.c.bf16 %v1923_v34, %v1921_v38  ;;  %v1892_v1 = vadd.f32 %v1828_v48, %v1700_v8  ;;  %v1858_v22 = vmul.f32 0.001, %v1794_v52  ;;  %v1631_v56 = vld [vmem:[%s4714_s6 + $0x90] sm:$0xff]  ;;  %v1757_v51 = vld [vmem:[%s4713_s5 + $0x80] sm:$0xff] }
 0x1f1   : > { %v1860_v16 = vmul.f32 0.001, %v1796_v25  ;;  %2129 = vst [vmem:[#allocation7 + $0xa8] sm:$0xff] %v1890_v14  ;;  %v1693_v13 = vmul.f32 0.999, %v1629_v36  ;;  %v1759_v42 = vld [vmem:[%s4713_s5 + $0x90] sm:$0xff] }
 0x1f2   : > { %2271 = vmatpush.bf16.msra.mxu1 %v2245_v45  ;;  %2131 = vst [vmem:[#allocation7 + $0xb8] sm:$0xff] %v1892_v1  ;;  %v2230_v50 = vpack.c.bf16 %v1892_v1, %v1890_v14  ;;  %v1922_v27 = vadd.f32 %v1858_v22, %v1730_v58  ;;  %v1695_v11 = vmul.f32 0.999, %v1631_v56  ;;  %v1661_v10 = vld [vmem:[%s4714_s6 + $0x180] sm:$0xff]  ;;  %v1663_v15 = vld [vmem:[%s4714_s6 + $0x190] sm:$0xff]  ;;  %v1630_v28 = vld [vmem:[%s4714_s6 + $0x88] sm:$0xff] }
 0x1f3   : > { %v1924_v60 = vadd.f32 %v1860_v16, %v1732_v43  ;;  %v1789_v57 = vld [vmem:[%s4713_s5 + $0x180] sm:$0xff]  ;;  %v1821_v41 = vmul.f32 0.001, %v1757_v51  ;;  %v1823_v29 = vmul.f32 0.001, %v1759_v42  ;;  %v1791_v39 = vld [vmem:[%s4713_s5 + $0x190] sm:$0xff] }
 0x1f4   : > { %v1725_v21 = vmul.f32 0.999, %v1661_v10  ;;  %2284 = vmatpush.bf16.msra.mxu2 %v2230_v50  ;;  %2161 = vst [vmem:[#allocation7 + $0x1a8] sm:$0xff] %v1922_v27  ;;  %v1727_v55 = vmul.f32 0.999, %v1663_v15  ;;  %v1632_v7 = vld [vmem:[%s4714_s6 + $0x98] sm:$0xff] }
 0x1f5   : > { %v2246_v3 = vpack.c.bf16 %v1924_v60, %v1922_v27  ;;  %v1853_v18 = vmul.f32 0.001, %v1789_v57  ;;  %2163 = vst [vmem:[#allocation7 + $0x1b8] sm:$0xff] %v1924_v60  ;;  %v1885_v35 = vadd.f32 %v1821_v41, %v1693_v13  ;;  %v1887_v0 = vadd.f32 %v1823_v29, %v1695_v11  ;;  %v1758_v54 = vld [vmem:[%s4713_s5 + $0x88] sm:$0xff]  ;;  %v1760_v30 = vld [vmem:[%s4713_s5 + $0x98] sm:$0xff]  ;;  %v1625_v37 = vld [vmem:[%s4714_s6 + $0x60] sm:$0xff] }
 0x1f6   : > { %v1855_v24 = vmul.f32 0.001, %v1791_v39  ;;  %v1694_v59 = vmul.f32 0.999, %v1630_v28  ;;  %v1696_v32 = vmul.f32 0.999, %v1632_v7 }
 0x1f7   : > { %2297 = vmatpush.bf16.msra.mxu3 %v2246_v3  ;;  %v1917_v6 = vadd.f32 %v1853_v18, %v1725_v21  ;;  %v1662_v44 = vld [vmem:[%s4714_s6 + $0x188] sm:$0xff]  ;;  %2124 = vst [vmem:[#allocation7 + $0x80] sm:$0xff] %v1885_v35  ;;  %v2227_v9 = vpack.c.bf16 %v1887_v0, %v1885_v35  ;;  %v1822_v20 = vmul.f32 0.001, %v1758_v54  ;;  %v1824_v17 = vmul.f32 0.001, %v1760_v30 }
 0x1f8   : > { %v1919_v5 = vadd.f32 %v1855_v24, %v1727_v55  ;;  %v1664_v63 = vld [vmem:[%s4714_s6 + $0x198] sm:$0xff]  ;;  %2126 = vst [vmem:[#allocation7 + $0x90] sm:$0xff] %v1887_v0  ;;  %v1726_v19 = vmul.f32 0.999, %v1662_v44  ;;  %v1790_v62 = vld [vmem:[%s4713_s5 + $0x188] sm:$0xff]  ;;  %v1627_v2 = vld [vmem:[%s4714_s6 + $0x70] sm:$0xff] }
 0x1f9   : > { %v1728_v26 = vmul.f32 0.999, %v1664_v63  ;;  %2259 = vmatpush.bf16.msra.mxu0 %v2227_v9  ;;  %2156 = vst [vmem:[#allocation7 + $0x180] sm:$0xff] %v1917_v6  ;;  %v1886_v53 = vadd.f32 %v1822_v20, %v1694_v59  ;;  %v1888_v12 = vadd.f32 %v1824_v17, %v1696_v32  ;;  %v1792_v49 = vld [vmem:[%s4713_s5 + $0x198] sm:$0xff]  ;;  %v1854_v61 = vmul.f32 0.001, %v1790_v62 }
 0x1fa   : > { %v2243_v31 = vpack.c.bf16 %v1919_v5, %v1917_v6  ;;  %2158 = vst [vmem:[#allocation7 + $0x190] sm:$0xff] %v1919_v5  ;;  %v1856_v4 = vmul.f32 0.001, %v1792_v49  ;;  %v1689_v33 = vmul.f32 0.999, %v1625_v37  ;;  %v1753_v38 = vld [vmem:[%s4713_s5 + $0x60] sm:$0xff] }
 0x1fb   : > { %2125 = vst [vmem:[#allocation7 + $0x88] sm:$0xff] %v1886_v53  ;;  %v2228_v8 = vpack.c.bf16 %v1888_v12, %v1886_v53  ;;  %v1918_v47 = vadd.f32 %v1854_v61, %v1726_v19  ;;  %v1691_v40 = vmul.f32 0.999, %v1627_v2  ;;  %v1755_v34 = vld [vmem:[%s4713_s5 + $0x70] sm:$0xff]  ;;  %v1817_v48 = vmul.f32 0.001, %v1753_v38 }
 0x1fc   : > { %2272 = vmatpush.bf16.msra.mxu1 %v2243_v31  ;;  %2127 = vst [vmem:[#allocation7 + $0x98] sm:$0xff] %v1888_v12  ;;  %v1920_v46 = vadd.f32 %v1856_v4, %v1728_v26  ;;  %v1819_v23 = vmul.f32 0.001, %v1755_v34  ;;  %v1657_v52 = vld [vmem:[%s4714_s6 + $0x160] sm:$0xff]  ;;  %v1659_v14 = vld [vmem:[%s4714_s6 + $0x170] sm:$0xff]  ;;  %v1626_v13 = vld [vmem:[%s4714_s6 + $0x68] sm:$0xff] }
 0x1fd   : > { %v1785_v58 = vld [vmem:[%s4713_s5 + $0x160] sm:$0xff]  ;;  %2285 = vmatpush.bf16.msra.mxu2 %v2228_v8  ;;  %2157 = vst [vmem:[#allocation7 + $0x188] sm:$0xff] %v1918_v47  ;;  %v1881_v43 = vadd.f32 %v1817_v48, %v1689_v33  ;;  %v1721_v25 = vmul.f32 0.999, %v1657_v52  ;;  %v1723_v45 = vmul.f32 0.999, %v1659_v14 }
 0x1fe   : > { %v1787_v1 = vld [vmem:[%s4713_s5 + $0x170] sm:$0xff]  ;;  %2159 = vst [vmem:[#allocation7 + $0x198] sm:$0xff] %v1920_v46  ;;  %v2244_v22 = vpack.c.bf16 %v1920_v46, %v1918_v47  ;;  %v1883_v16 = vadd.f32 %v1819_v23, %v1691_v40  ;;  %v1849_v36 = vmul.f32 0.001, %v1785_v58  ;;  %v1628_v51 = vld [vmem:[%s4714_s6 + $0x78] sm:$0xff]  ;;  %v1754_v50 = vld [vmem:[%s4713_s5 + $0x68] sm:$0xff] }
 0x1ff   : > { %v1851_v56 = vmul.f32 0.001, %v1787_v1  ;;  %2120 = vst [vmem:[#allocation7 + $0x60] sm:$0xff] %v1881_v43  ;;  %v1690_v42 = vmul.f32 0.999, %v1626_v13  ;;  %v1756_v27 = vld [vmem:[%s4713_s5 + $0x78] sm:$0xff] }
 0x200   : > { %2298 = vmatpush.bf16.msra.mxu3 %v2244_v22  ;;  %2122 = vst [vmem:[#allocation7 + $0x70] sm:$0xff] %v1883_v16  ;;  %v2225_v60 = vpack.c.bf16 %v1883_v16, %v1881_v43  ;;  %v1913_v11 = vadd.f32 %v1849_v36, %v1721_v25  ;;  %v1692_v15 = vmul.f32 0.999, %v1628_v51  ;;  %v1658_v57 = vld [vmem:[%s4714_s6 + $0x168] sm:$0xff]  ;;  %v1660_v41 = vld [vmem:[%s4714_s6 + $0x178] sm:$0xff]  ;;  %v1621_v54 = vld [vmem:[%s4714_s6 + $0x40] sm:$0xff] }
 0x201   : > { %v1915_v10 = vadd.f32 %v1851_v56, %v1723_v45  ;;  %v1786_v29 = vld [vmem:[%s4713_s5 + $0x168] sm:$0xff]  ;;  %v1818_v21 = vmul.f32 0.001, %v1754_v50  ;;  %v1820_v3 = vmul.f32 0.001, %v1756_v27  ;;  %v1788_v35 = vld [vmem:[%s4713_s5 + $0x178] sm:$0xff] }
 0x202   : > { %v1722_v55 = vmul.f32 0.999, %v1658_v57  ;;  %2260 = vmatpush.bf16.msra.mxu0 %v2225_v60  ;;  %2152 = vst [vmem:[#allocation7 + $0x160] sm:$0xff] %v1913_v11  ;;  %v1724_v18 = vmul.f32 0.999, %v1660_v41  ;;  %v1623_v6 = vld [vmem:[%s4714_s6 + $0x50] sm:$0xff] }
 0x203   : > { %v2241_v39 = vpack.c.bf16 %v1915_v10, %v1913_v11  ;;  %v1850_v0 = vmul.f32 0.001, %v1786_v29  ;;  %2154 = vst [vmem:[#allocation7 + $0x170] sm:$0xff] %v1915_v10  ;;  %v1882_v24 = vadd.f32 %v1818_v21, %v1690_v42  ;;  %v1884_v28 = vadd.f32 %v1820_v3, %v1692_v15  ;;  %v1749_v59 = vld [vmem:[%s4713_s5 + $0x40] sm:$0xff]  ;;  %v1751_v9 = vld [vmem:[%s4713_s5 + $0x50] sm:$0xff]  ;;  %v1622_v4 = vld [vmem:[%s4714_s6 + $0x48] sm:$0xff] }
 0x204   : > { %v1852_v7 = vmul.f32 0.001, %v1788_v35  ;;  %v1685_v30 = vmul.f32 0.999, %v1621_v54  ;;  %v1687_v44 = vmul.f32 0.999, %v1623_v6 }
 0x205   : > { %2273 = vmatpush.bf16.msra.mxu1 %v2241_v39  ;;  %v1914_v32 = vadd.f32 %v1850_v0, %v1722_v55  ;;  %v1653_v5 = vld [vmem:[%s4714_s6 + $0x140] sm:$0xff]  ;;  %2121 = vst [vmem:[#allocation7 + $0x68] sm:$0xff] %v1882_v24  ;;  %v2226_v20 = vpack.c.bf16 %v1884_v28, %v1882_v24  ;;  %v1813_v63 = vmul.f32 0.001, %v1749_v59  ;;  %v1815_v19 = vmul.f32 0.001, %v1751_v9 }
 0x206   : > { %v1916_v17 = vadd.f32 %v1852_v7, %v1724_v18  ;;  %v1655_v26 = vld [vmem:[%s4714_s6 + $0x150] sm:$0xff]  ;;  %2123 = vst [vmem:[#allocation7 + $0x78] sm:$0xff] %v1884_v28  ;;  %v1717_v62 = vmul.f32 0.999, %v1653_v5  ;;  %v1781_v53 = vld [vmem:[%s4713_s5 + $0x140] sm:$0xff]  ;;  %v1624_v33 = vld [vmem:[%s4714_s6 + $0x58] sm:$0xff] }
 0x207   : > { %v1719_v31 = vmul.f32 0.999, %v1655_v26  ;;  %2286 = vmatpush.bf16.msra.mxu2 %v2226_v20  ;;  %2153 = vst [vmem:[#allocation7 + $0x168] sm:$0xff] %v1914_v32  ;;  %v1877_v49 = vadd.f32 %v1813_v63, %v1685_v30  ;;  %v1879_v61 = vadd.f32 %v1815_v19, %v1687_v44  ;;  %v1783_v37 = vld [vmem:[%s4713_s5 + $0x150] sm:$0xff]  ;;  %v1845_v2 = vmul.f32 0.001, %v1781_v53 }
 0x208   : > { %v2242_v12 = vpack.c.bf16 %v1916_v17, %v1914_v32  ;;  %2155 = vst [vmem:[#allocation7 + $0x178] sm:$0xff] %v1916_v17  ;;  %v1847_v38 = vmul.f32 0.001, %v1783_v37  ;;  %v1686_v8 = vmul.f32 0.999, %v1622_v4  ;;  %v1750_v47 = vld [vmem:[%s4713_s5 + $0x48] sm:$0xff] }
 0x209   : > { %2116 = vst [vmem:[#allocation7 + $0x40] sm:$0xff] %v1877_v49  ;;  %v2223_v40 = vpack.c.bf16 %v1879_v61, %v1877_v49  ;;  %v1909_v34 = vadd.f32 %v1845_v2, %v1717_v62  ;;  %v1688_v48 = vmul.f32 0.999, %v1624_v33  ;;  %v1752_v46 = vld [vmem:[%s4713_s5 + $0x58] sm:$0xff]  ;;  %v1814_v23 = vmul.f32 0.001, %v1750_v47 }
 0x20a   : > { %2299 = vmatpush.bf16.msra.mxu3 %v2242_v12  ;;  %2118 = vst [vmem:[#allocation7 + $0x50] sm:$0xff] %v1879_v61  ;;  %v1911_v52 = vadd.f32 %v1847_v38, %v1719_v31  ;;  %v1816_v14 = vmul.f32 0.001, %v1752_v46  ;;  %v1654_v58 = vld [vmem:[%s4714_s6 + $0x148] sm:$0xff]  ;;  %v1656_v43 = vld [vmem:[%s4714_s6 + $0x158] sm:$0xff]  ;;  %v1617_v42 = vld [vmem:[%s4714_s6 + $0x20] sm:$0xff] }
 0x20b   : > { %v1782_v25 = vld [vmem:[%s4713_s5 + $0x148] sm:$0xff]  ;;  %2261 = vmatpush.bf16.msra.mxu0 %v2223_v40  ;;  %2148 = vst [vmem:[#allocation7 + $0x140] sm:$0xff] %v1909_v34  ;;  %v1878_v45 = vadd.f32 %v1814_v23, %v1686_v8  ;;  %v1718_v1 = vmul.f32 0.999, %v1654_v58  ;;  %v1720_v22 = vmul.f32 0.999, %v1656_v43 }
 0x20c   : > { %v1784_v16 = vld [vmem:[%s4713_s5 + $0x158] sm:$0xff]  ;;  %2150 = vst [vmem:[#allocation7 + $0x150] sm:$0xff] %v1911_v52  ;;  %v2239_v36 = vpack.c.bf16 %v1911_v52, %v1909_v34  ;;  %v1880_v56 = vadd.f32 %v1816_v14, %v1688_v48  ;;  %v1846_v13 = vmul.f32 0.001, %v1782_v25  ;;  %v1619_v50 = vld [vmem:[%s4714_s6 + $0x30] sm:$0xff]  ;;  %v1745_v60 = vld [vmem:[%s4713_s5 + $0x20] sm:$0xff] }
 0x20d   : > { %v1848_v51 = vmul.f32 0.001, %v1784_v16  ;;  %2117 = vst [vmem:[#allocation7 + $0x48] sm:$0xff] %v1878_v45  ;;  %v1681_v27 = vmul.f32 0.999, %v1617_v42  ;;  %v1747_v11 = vld [vmem:[%s4713_s5 + $0x30] sm:$0xff] }
 0x20e   : > { %2274 = vmatpush.bf16.msra.mxu1 %v2239_v36  ;;  %2119 = vst [vmem:[#allocation7 + $0x58] sm:$0xff] %v1880_v56  ;;  %v2224_v10 = vpack.c.bf16 %v1880_v56, %v1878_v45  ;;  %v1910_v15 = vadd.f32 %v1846_v13, %v1718_v1  ;;  %v1683_v41 = vmul.f32 0.999, %v1619_v50  ;;  %v1649_v29 = vld [vmem:[%s4714_s6 + $0x120] sm:$0xff]  ;;  %v1651_v21 = vld [vmem:[%s4714_s6 + $0x130] sm:$0xff]  ;;  %v1618_v59 = vld [vmem:[%s4714_s6 + $0x28] sm:$0xff] }
 0x20f   : > { %v1912_v57 = vadd.f32 %v1848_v51, %v1720_v22  ;;  %v1777_v3 = vld [vmem:[%s4713_s5 + $0x120] sm:$0xff]  ;;  %v1809_v55 = vmul.f32 0.001, %v1745_v60  ;;  %v1811_v39 = vmul.f32 0.001, %v1747_v11  ;;  %v1779_v24 = vld [vmem:[%s4713_s5 + $0x130] sm:$0xff] }
 0x210   : > { %v1713_v18 = vmul.f32 0.999, %v1649_v29  ;;  %2287 = vmatpush.bf16.msra.mxu2 %v2224_v10  ;;  %2149 = vst [vmem:[#allocation7 + $0x148] sm:$0xff] %v1910_v15  ;;  %v1715_v0 = vmul.f32 0.999, %v1651_v21  ;;  %v1620_v32 = vld [vmem:[%s4714_s6 + $0x38] sm:$0xff] }
 0x211   : > { %v2240_v35 = vpack.c.bf16 %v1912_v57, %v1910_v15  ;;  %v1841_v28 = vmul.f32 0.001, %v1777_v3  ;;  %2151 = vst [vmem:[#allocation7 + $0x158] sm:$0xff] %v1912_v57  ;;  %v1873_v7 = vadd.f32 %v1809_v55, %v1681_v27  ;;  %v1875_v54 = vadd.f32 %v1811_v39, %v1683_v41  ;;  %v1746_v30 = vld [vmem:[%s4713_s5 + $0x28] sm:$0xff]  ;;  %v1748_v20 = vld [vmem:[%s4713_s5 + $0x38] sm:$0xff]  ;;  %v1613_v38 = vld [vmem:[%s4714_s6] sm:$0xff] }
 0x212   : > { %v1843_v6 = vmul.f32 0.001, %v1779_v24  ;;  %v1682_v9 = vmul.f32 0.999, %v1618_v59  ;;  %v1684_v5 = vmul.f32 0.999, %v1620_v32 }
 0x213   : > { %2300 = vmatpush.bf16.msra.mxu3 %v2240_v35  ;;  %v1905_v44 = vadd.f32 %v1841_v28, %v1713_v18  ;;  %v1650_v17 = vld [vmem:[%s4714_s6 + $0x128] sm:$0xff]  ;;  %2112 = vst [vmem:[#allocation7 + $0x20] sm:$0xff] %v1873_v7  ;;  %v2221_v63 = vpack.c.bf16 %v1875_v54, %v1873_v7  ;;  %v1810_v26 = vmul.f32 0.001, %v1746_v30  ;;  %v1812_v62 = vmul.f32 0.001, %v1748_v20 }
 0x214   : > { %v1907_v19 = vadd.f32 %v1843_v6, %v1715_v0  ;;  %v1652_v31 = vld [vmem:[%s4714_s6 + $0x138] sm:$0xff]  ;;  %2114 = vst [vmem:[#allocation7 + $0x30] sm:$0xff] %v1875_v54  ;;  %v1714_v53 = vmul.f32 0.999, %v1650_v17  ;;  %v1778_v49 = vld [vmem:[%s4713_s5 + $0x128] sm:$0xff]  ;;  %v1615_v8 = vld [vmem:[%s4714_s6 + $0x10] sm:$0xff] }
 0x215   : > { %v1716_v12 = vmul.f32 0.999, %v1652_v31  ;;  %2262 = vmatpush.bf16.msra.mxu0 %v2221_v63  ;;  %2144 = vst [vmem:[#allocation7 + $0x120] sm:$0xff] %v1905_v44  ;;  %v1874_v37 = vadd.f32 %v1810_v26, %v1682_v9  ;;  %v1876_v2 = vadd.f32 %v1812_v62, %v1684_v5  ;;  %v1780_v4 = vld [vmem:[%s4713_s5 + $0x138] sm:$0xff]  ;;  %v1842_v33 = vmul.f32 0.001, %v1778_v49 }
 0x216   : > { %v2237_v61 = vpack.c.bf16 %v1907_v19, %v1905_v44  ;;  %2146 = vst [vmem:[#allocation7 + $0x130] sm:$0xff] %v1907_v19  ;;  %v1844_v47 = vmul.f32 0.001, %v1780_v4  ;;  %v1677_v40 = vmul.f32 0.999, %v1613_v38  ;;  %v1741_v34 = vld [vmem:[%s4713_s5] sm:$0xff] }
 0x217   : > { %2113 = vst [vmem:[#allocation7 + $0x28] sm:$0xff] %v1874_v37  ;;  %v2222_v48 = vpack.c.bf16 %v1876_v2, %v1874_v37  ;;  %v1906_v46 = vadd.f32 %v1842_v33, %v1714_v53  ;;  %v1679_v23 = vmul.f32 0.999, %v1615_v8  ;;  %v1743_v52 = vld [vmem:[%s4713_s5 + $0x10] sm:$0xff]  ;;  %v1805_v14 = vmul.f32 0.001, %v1741_v34 }
 0x218   : > { %2275 = vmatpush.bf16.msra.mxu1 %v2237_v61  ;;  %2115 = vst [vmem:[#allocation7 + $0x38] sm:$0xff] %v1876_v2  ;;  %v1908_v58 = vadd.f32 %v1844_v47, %v1716_v12  ;;  %v1807_v43 = vmul.f32 0.001, %v1743_v52  ;;  %v1645_v25 = vld [vmem:[%s4714_s6 + $0x100] sm:$0xff]  ;;  %v1647_v45 = vld [vmem:[%s4714_s6 + $0x110] sm:$0xff]  ;;  %v1614_v27 = vld [vmem:[%s4714_s6 + $0x8] sm:$0xff] }
 0x219   : > { %v1773_v1 = vld [vmem:[%s4713_s5 + $0x100] sm:$0xff]  ;;  %2288 = vmatpush.bf16.msra.mxu2 %v2222_v48  ;;  %2145 = vst [vmem:[#allocation7 + $0x128] sm:$0xff] %v1906_v46  ;;  %v1869_v22 = vadd.f32 %v1805_v14, %v1677_v40  ;;  %v1709_v16 = vmul.f32 0.999, %v1645_v25  ;;  %v1711_v36 = vmul.f32 0.999, %v1647_v45 }
 0x21a   : > { %v1775_v56 = vld [vmem:[%s4713_s5 + $0x110] sm:$0xff]  ;;  %2147 = vst [vmem:[#allocation7 + $0x138] sm:$0xff] %v1908_v58  ;;  %v2238_v13 = vpack.c.bf16 %v1908_v58, %v1906_v46  ;;  %v1871_v51 = vadd.f32 %v1807_v43, %v1679_v23  ;;  %v1837_v42 = vmul.f32 0.001, %v1773_v1  ;;  %v1616_v60 = vld [vmem:[%s4714_s6 + $0x18] sm:$0xff]  ;;  %v1742_v10 = vld [vmem:[%s4713_s5 + $0x8] sm:$0xff] }
 0x21b   : > { %v1839_v50 = vmul.f32 0.001, %v1775_v56  ;;  %2108 = vst [vmem:[#allocation7] sm:$0xff] %v1869_v22  ;;  %v1678_v11 = vmul.f32 0.999, %v1614_v27  ;;  %v1744_v15 = vld [vmem:[%s4713_s5 + $0x18] sm:$0xff] }
 0x21c   : > { %2301 = vmatpush.bf16.msra.mxu3 %v2238_v13  ;;  %2110 = vst [vmem:[#allocation7 + $0x10] sm:$0xff] %v1871_v51  ;;  %v2219_v57 = vpack.c.bf16 %v1871_v51, %v1869_v22  ;;  %v1901_v41 = vadd.f32 %v1837_v42, %v1709_v16  ;;  %v1680_v21 = vmul.f32 0.999, %v1616_v60  ;;  %v1646_v3 = vld [vmem:[%s4714_s6 + $0x108] sm:$0xff]  ;;  %v1648_v55 = vld [vmem:[%s4714_s6 + $0x118] sm:$0xff]  ;;  %v1952_v20 = vld [vmem:[%s4718_s10 + $0x70] sm:$0xff] }
 0x21d   : > { %v1903_v29 = vadd.f32 %v1839_v50, %v1711_v36  ;;  %v1774_v39 = vld [vmem:[%s4713_s5 + $0x108] sm:$0xff]  ;;  %v1806_v18 = vmul.f32 0.001, %v1742_v10  ;;  %v1808_v35 = vmul.f32 0.001, %v1744_v15  ;;  %v1776_v7 = vld [vmem:[%s4713_s5 + $0x118] sm:$0xff] }
 0x21e   : > { %v1710_v0 = vmul.f32 0.999, %v1646_v3  ;;  %2263 = vmatpush.bf16.msra.mxu0 %v2219_v57  ;;  %2140 = vst [vmem:[#allocation7 + $0x100] sm:$0xff] %v1901_v41  ;;  %v1712_v28 = vmul.f32 0.999, %v1648_v55  ;;  %v1953_v26 = vld [vmem:[%s4718_s10 + $0x78] sm:$0xff] }
 0x21f   : > { %v2235_v24 = vpack.c.bf16 %v1903_v29, %v1901_v41  ;;  %v1838_v54 = vmul.f32 0.001, %v1774_v39  ;;  %2142 = vst [vmem:[#allocation7 + $0x110] sm:$0xff] %v1903_v29  ;;  %v1870_v6 = vadd.f32 %v1806_v18, %v1678_v11  ;;  %v1872_v59 = vadd.f32 %v1808_v35, %v1680_v21  ;;  %v1608_v30 = vld [vmem:[%s4990_s4] sm:$0x3]  ;;  %v2207_v53 = vld [vmem:[#allocation2 + $0x8] sm:$0xff] }
 0x220   : > { %v1840_v32 = vmul.f32 0.001, %v1776_v7  ;;  %v1609_v9 = vmul.f32 0.999, %v1608_v30  ;;  %v1610_v5 = vld [vmem:[%s4991_s21] sm:$0x3] }
 0x221   : > { %2276 = vmatpush.bf16.msra.mxu1 %v2235_v24  ;;  %v1902_v44 = vadd.f32 %v1838_v54, %v1710_v0  ;;  %2109 = vst [vmem:[#allocation7 + $0x8] sm:$0xff] %v1870_v6  ;;  %v2220_v17 = vpack.c.bf16 %v1872_v59, %v1870_v6  ;;  %v1611_v19 = vmul.f32 0.001, %v1610_v5  ;;  %v1984_v62 = vmul.f32 0.999, %v1952_v20  ;;  %v2206_v31 = vld [vmem:[#allocation2] sm:$0xff] }
 0x222   : > { %v1904_v63 = vadd.f32 %v1840_v32, %v1712_v28  ;;  %2111 = vst [vmem:[#allocation7 + $0x18] sm:$0xff] %v1872_v59  ;;  %v1985_v12 = vmul.f32 0.999, %v1953_v26  ;;  %v2016_v49 = vld [vmem:[%s4717_s9 + $0x70] sm:$0xff]  ;;  %v2017_v61 = vld [vmem:[%s4717_s9 + $0x78] sm:$0xff]  ;;  %v1950_v37 = vld [vmem:[%s4718_s10 + $0x60] sm:$0xff] }
 0x223   : > { %2289 = vmatpush.bf16.msra.mxu2 %v2220_v17  ;;  %2141 = vst [vmem:[#allocation7 + $0x108] sm:$0xff] %v1902_v44  ;;  %v4427_v4 = vadd.f32 %v1611_v19, %v1609_v9  ;;  %v2048_v33 = vmul.f32 0.001, %v2016_v49  ;;  %v2049_v38 = vmul.f32 0.001, %v2017_v61  ;;  %v1951_v8 = vld [vmem:[%s4718_s10 + $0x68] sm:$0xff] }
 0x224   : > { %v2236_v2 = vpack.c.bf16 %v1904_v63, %v1902_v44  ;;  %2143 = vst [vmem:[#allocation7 + $0x118] sm:$0xff] %v1904_v63  ;;  %v1982_v47 = vmul.f32 0.999, %v1950_v37  ;;  %v1983_v40 = vmul.f32 0.999, %v1951_v8  ;;  %v2014_v34 = vld [vmem:[%s4717_s9 + $0x60] sm:$0xff] }
 0x225   : > { %v2209_v48 = vperm.slane %v4427_v4, 0  ;;  %v2210_v46 = vperm.slane %v4427_v4, 1  ;;  %v2080_v23 = vadd.f32 %v2048_v33, %v1984_v62  ;;  %v2081_v52 = vadd.f32 %v2049_v38, %v1985_v12  ;;  %v2015_v14 = vld [vmem:[%s4717_s9 + $0x68] sm:$0xff]  ;;  %v1968_v58 = vld [vmem:[%s4718_s10 + $0xf0] sm:$0xff]  ;;  %v1969_v43 = vld [vmem:[%s4718_s10 + $0xf8] sm:$0xff] }
 0x226   : > { %2302 = vmatpush.bf16.msra.mxu3 %v2236_v2  ;;  %v2046_v25 = vmul.f32 0.001, %v2014_v34  ;;  %v2047_v45 = vmul.f32 0.001, %v2015_v14  ;;  %v2000_v1 = vmul.f32 0.999, %v1968_v58 }
 0x227   : > { %v2213_v22 = vadd.f32 %v2209_v48, %v2206_v31  ;;  %v2214_v16 = vadd.f32 %v2210_v46, %v2207_v53  ;;  %2187 = vst [vmem:[#allocation10 + $0x70] sm:$0xff] %v2080_v23  ;;  %v2319_v36 = vpack.c.bf16 %v2081_v52, %v2080_v23  ;;  %v2001_v56 = vmul.f32 0.999, %v1969_v43  ;;  %v2032_v13 = vld [vmem:[%s4717_s9 + $0xf0] sm:$0xff]  ;;  %v2033_v51 = vld [vmem:[%s4717_s9 + $0xf8] sm:$0xff]  ;;  %v1966_v35 = vld [vmem:[%s4718_s10 + $0xe0] sm:$0xff] }
 0x228   : > { %v1948_v42 = vld [vmem:[%s4718_s10 + $0x50] sm:$0xff]  ;;  %2188 = vst [vmem:[#allocation10 + $0x78] sm:$0xff] %v2081_v52  ;;  %v2078_v50 = vadd.f32 %v2046_v25, %v1982_v47  ;;  %v2079_v27 = vadd.f32 %v2047_v45, %v1983_v40  ;;  %v2064_v60 = vmul.f32 0.001, %v2032_v13  ;;  %v2065_v11 = vmul.f32 0.001, %v2033_v51 }
 0x229   : > { %v1949_v10 = vld [vmem:[%s4718_s10 + $0x58] sm:$0xff]  ;;  %v2215_v15 = vmax.f32 %v2213_v22, 0.0  ;;  %v2216_v57 = vmax.f32 %v2214_v16, 0.0  ;;  %2331 = vmatpush.bf16.msrb.mxu0 %v2319_v36  ;;  %v1980_v41 = vmul.f32 0.999, %v1948_v42  ;;  %v2012_v39 = vld [vmem:[%s4717_s9 + $0x50] sm:$0xff] }
 0x22a   : > { %v1981_v29 = vmul.f32 0.999, %v1949_v10  ;;  %2185 = vst [vmem:[#allocation10 + $0x60] sm:$0xff] %v2078_v50  ;;  %v2318_v21 = vpack.c.bf16 %v2079_v27, %v2078_v50  ;;  %v2096_v3 = vadd.f32 %v2064_v60, %v2000_v1  ;;  %v2097_v55 = vadd.f32 %v2065_v11, %v2001_v56  ;;  %v2013_v18 = vld [vmem:[%s4717_s9 + $0x58] sm:$0xff]  ;;  %v1967_v54 = vld [vmem:[%s4718_s10 + $0xe8] sm:$0xff]  ;;  %v2030_v30 = vld [vmem:[%s4717_s9 + $0xe0] sm:$0xff] }
 0x22b   : > { %v2217_v0 = vpack.c.bf16 %v2215_v15, %v2215_v15  ;;  %v2218_v24 = vpack.c.bf16 %v2216_v57, %v2216_v57  ;;  %2186 = vst [vmem:[#allocation10 + $0x68] sm:$0xff] %v2079_v27  ;;  %v2044_v28 = vmul.f32 0.001, %v2012_v39  ;;  %v2045_v7 = vmul.f32 0.001, %v2013_v18  ;;  %v2031_v5 = vld [vmem:[%s4717_s9 + $0xe8] sm:$0xff] }
 0x22c   : > { %2203 = vst [vmem:[#allocation10 + $0xf0] sm:$0xff] %v2096_v3  ;;  %v2327_v6 = vpack.c.bf16 %v2097_v55, %v2096_v3  ;;  %v1998_v59 = vmul.f32 0.999, %v1966_v35  ;;  %v1999_v32 = vmul.f32 0.999, %v1967_v54  ;;  %v1946_v17 = vld [vmem:[%s4718_s10 + $0x40] sm:$0xff]  ;;  %v2103_v10 = vlaneseq }
 0x22d   : > { %2264 = vmatmul.bf16.vlgmr.msra.gmra.mxu0 %v2217_v0  ;;  %2277 = vmatmul.bf16.vlgmr.msra.gmra.mxu1 %v2218_v24  ;;  %2204 = vst [vmem:[#allocation10 + $0xf8] sm:$0xff] %v2097_v55  ;;  %v2076_v44 = vadd.f32 %v2044_v28, %v1980_v41  ;;  %v2077_v9 = vadd.f32 %v2045_v7, %v1981_v29  ;;  %v2062_v20 = vmul.f32 0.001, %v2030_v30  ;;  %v1947_v63 = vld [vmem:[%s4718_s10 + $0x48] sm:$0xff]  ;;  %v2063_v19 = vmul.f32 0.001, %v2031_v5 }
 0x22e   : > { %2290 = vmatmul.bf16.vlgmr.msra.gmra.mxu2 %v2217_v0  ;;  %2303 = vmatmul.bf16.vlgmr.msra.gmra.mxu3 %v2218_v24  ;;  %v1978_v26 = vmul.f32 0.999, %v1946_v17  ;;  %v1979_v62 = vmul.f32 0.999, %v1947_v63  ;;  %v2010_v12 = vld [vmem:[%s4717_s9 + $0x40] sm:$0xff]  ;;  %v2011_v49 = vld [vmem:[%s4717_s9 + $0x48] sm:$0xff] }
 0x22f   : > { %2332 = vmatpush.bf16.msrb.mxu0 %v2318_v21  ;;  %2344 = vmatpush.bf16.msrb.mxu1 %v2327_v6  ;;  %2183 = vst [vmem:[#allocation10 + $0x50] sm:$0xff] %v2076_v44  ;;  %v2317_v31 = vpack.c.bf16 %v2077_v9, %v2076_v44  ;;  %v2094_v53 = vadd.f32 %v2062_v20, %v1998_v59  ;;  %v1964_v61 = vld [vmem:[%s4718_s10 + $0xd0] sm:$0xff]  ;;  %v2042_v2 = vmul.f32 0.001, %v2010_v12  ;;  %v2043_v33 = vmul.f32 0.001, %v2011_v49 }
 0x230   : > { %2184 = vst [vmem:[#allocation10 + $0x58] sm:$0xff] %v2077_v9  ;;  %v2095_v37 = vadd.f32 %v2063_v19, %v1999_v32  ;;  %v1965_v38 = vld [vmem:[%s4718_s10 + $0xd8] sm:$0xff]  ;;  %v1996_v8 = vmul.f32 0.999, %v1964_v61  ;;  %v2028_v40 = vld [vmem:[%s4717_s9 + $0xd0] sm:$0xff]  ;;  %v1962_v56 = vld [vmem:[%s4718_s10 + $0xc0] sm:$0xff] }
 0x231   : > { %2201 = vst [vmem:[#allocation10 + $0xe0] sm:$0xff] %v2094_v53  ;;  %v1997_v47 = vmul.f32 0.999, %v1965_v38  ;;  %v2074_v48 = vadd.f32 %v2042_v2, %v1978_v26  ;;  %v2075_v46 = vadd.f32 %v2043_v33, %v1979_v62  ;;  %v2029_v23 = vld [vmem:[%s4717_s9 + $0xd8] sm:$0xff]  ;;  %v2060_v52 = vmul.f32 0.001, %v2028_v40 }
 0x232   : > { %2202 = vst [vmem:[#allocation10 + $0xe8] sm:$0xff] %v2095_v37  ;;  %v2326_v34 = vpack.c.bf16 %v2095_v37, %v2094_v53  ;;  %v1944_v14 = vld [vmem:[%s4718_s10 + $0x30] sm:$0xff]  ;;  %v1945_v58 = vld [vmem:[%s4718_s10 + $0x38] sm:$0xff]  ;;  %v2061_v43 = vmul.f32 0.001, %v2029_v23  ;;  %v1963_v50 = vld [vmem:[%s4718_s10 + $0xc8] sm:$0xff] }
 0x233   : > { %2333 = vmatpush.bf16.msrb.mxu0 %v2317_v31  ;;  %v1976_v25 = vmul.f32 0.999, %v1944_v14  ;;  %v1977_v45 = vmul.f32 0.999, %v1945_v58  ;;  %2181 = vst [vmem:[#allocation10 + $0x40] sm:$0xff] %v2074_v48  ;;  %v2316_v1 = vpack.c.bf16 %v2075_v46, %v2074_v48  ;;  %v2092_v22 = vadd.f32 %v2060_v52, %v1996_v8  ;;  %v2008_v16 = vld [vmem:[%s4717_s9 + $0x30] sm:$0xff] }
 0x234   : > { %2345 = vmatpush.bf16.msrb.mxu1 %v2326_v34  ;;  %v2009_v36 = vld [vmem:[%s4717_s9 + $0x38] sm:$0xff]  ;;  %2182 = vst [vmem:[#allocation10 + $0x48] sm:$0xff] %v2075_v46  ;;  %v2093_v13 = vadd.f32 %v2061_v43, %v1997_v47  ;;  %v2040_v51 = vmul.f32 0.001, %v2008_v16  ;;  %v1994_v27 = vmul.f32 0.999, %v1962_v56 }
 0x235   : > { %v2041_v42 = vmul.f32 0.001, %v2009_v36  ;;  %2199 = vst [vmem:[#allocation10 + $0xd0] sm:$0xff] %v2092_v22  ;;  %v1995_v60 = vmul.f32 0.999, %v1963_v50  ;;  %v2026_v11 = vld [vmem:[%s4717_s9 + $0xc0] sm:$0xff] }
 0x236   : > { %2200 = vst [vmem:[#allocation10 + $0xd8] sm:$0xff] %v2093_v13  ;;  %v2325_v15 = vpack.c.bf16 %v2093_v13, %v2092_v22  ;;  %v2072_v57 = vadd.f32 %v2040_v51, %v1976_v25  ;;  %v2027_v29 = vld [vmem:[%s4717_s9 + $0xc8] sm:$0xff]  ;;  %v2058_v21 = vmul.f32 0.001, %v2026_v11  ;;  %v1942_v3 = vld [vmem:[%s4718_s10 + $0x20] sm:$0xff]  ;;  %vm4539_vm0 = vcmp.lt.s32.totalorder %v2103_v10, 256 }
 0x237   : > { %2334 = vmatpush.bf16.msrb.mxu0 %v2316_v1  ;;  %v2073_v41 = vadd.f32 %v2041_v42, %v1977_v45  ;;  %v1943_v55 = vld [vmem:[%s4718_s10 + $0x28] sm:$0xff]  ;;  %v2059_v39 = vmul.f32 0.001, %v2027_v29  ;;  %v1974_v18 = vmul.f32 0.999, %v1942_v3  ;;  %v2006_v28 = vld [vmem:[%s4717_s9 + $0x20] sm:$0xff] }
 0x238   : > { %v1975_v35 = vmul.f32 0.999, %v1943_v55  ;;  %2346 = vmatpush.bf16.msrb.mxu1 %v2325_v15  ;;  %2179 = vst [vmem:[#allocation10 + $0x30] sm:$0xff] %v2072_v57  ;;  %v2090_v24 = vadd.f32 %v2058_v21, %v1994_v27  ;;  %v2007_v7 = vld [vmem:[%s4717_s9 + $0x28] sm:$0xff]  ;;  %v1933_v54 = vld [vmem:[%s4716_s8] sm:$0x3] }
 0x239   : > { %v2315_v0 = vpack.c.bf16 %v2073_v41, %v2072_v57  ;;  %2180 = vst [vmem:[#allocation10 + $0x38] sm:$0xff] %v2073_v41  ;;  %v2091_v6 = vadd.f32 %v2059_v39, %v1995_v60  ;;  %v2038_v59 = vmul.f32 0.001, %v2006_v28  ;;  %v2039_v32 = vmul.f32 0.001, %v2007_v7  ;;  %v1960_v62 = vld [vmem:[%s4718_s10 + $0xb0] sm:$0xff] }
 0x23a   : > { %2197 = vst [vmem:[#allocation10 + $0xc0] sm:$0xff] %v2090_v24  ;;  %v1934_v44 = vmul.f32 0.999, %v1933_v54  ;;  %v1935_v9 = vld [vmem:[%s4715_s7] sm:$0x3]  ;;  %v1961_v31 = vld [vmem:[%s4718_s10 + $0xb8] sm:$0xff] }
 0x23b   : > { %2335 = vmatpush.bf16.msrb.mxu0 %v2315_v0  ;;  %2198 = vst [vmem:[#allocation10 + $0xc8] sm:$0xff] %v2091_v6  ;;  %v2324_v5 = vpack.c.bf16 %v2091_v6, %v2090_v24  ;;  %v2070_v20 = vadd.f32 %v2038_v59, %v1974_v18  ;;  %v2071_v17 = vadd.f32 %v2039_v32, %v1975_v35  ;;  %v1936_v63 = vmul.f32 0.001, %v1935_v9  ;;  %v2025_v49 = vld [vmem:[%s4717_s9 + $0xb8] sm:$0xff]  ;;  %v1940_v2 = vld [vmem:[%s4718_s10 + $0x10] sm:$0xff]  ;;  %v1958_v52 = vld [vmem:[%s4718_s10 + $0xa0] sm:$0xff] }
 0x23c   : > { %2107 = vst.msk [vmem:[#allocation5] sm:$0x3] %vm4539_vm0, %v4427_v4  ;;  %v2024_v4 = vld [vmem:[%s4717_s9 + $0xb0] sm:$0xff]  ;;  %v1992_v53 = vmul.f32 0.999, %v1960_v62  ;;  %v1941_v33 = vld [vmem:[%s4718_s10 + $0x18] sm:$0xff] }
 0x23d   : > { %2347 = vmatpush.bf16.msrb.mxu1 %v2324_v5  ;;  %2177 = vst [vmem:[#allocation10 + $0x20] sm:$0xff] %v2070_v20  ;;  %v2314_v19 = vpack.c.bf16 %v2071_v17, %v2070_v20  ;;  %v4549_v26 = vadd.f32 %v1936_v63, %v1934_v44  ;;  %v1993_v12 = vmul.f32 0.999, %v1961_v31  ;;  %v2056_v61 = vmul.f32 0.001, %v2024_v4  ;;  %v2004_v47 = vld [vmem:[%s4717_s9 + $0x10] sm:$0xff] }
 0x23e   : > { %2178 = vst [vmem:[#allocation10 + $0x28] sm:$0xff] %v2071_v17  ;;  %v2057_v37 = vmul.f32 0.001, %v2025_v49  ;;  %v1972_v38 = vmul.f32 0.999, %v1940_v2  ;;  %v2005_v40 = vld [vmem:[%s4717_s9 + $0x18] sm:$0xff] }
 0x23f   : > { %2336 = vmatpush.bf16.msrb.mxu0 %v2314_v19  ;;  %2172 = vst.msk [vmem:[#allocation8] sm:$0x3] %vm4539_vm0, %v4549_v26  ;;  %v1973_v8 = vmul.f32 0.999, %v1941_v33  ;;  %v2088_v34 = vadd.f32 %v2056_v61, %v1992_v53  ;;  %v2036_v46 = vmul.f32 0.001, %v2004_v47 }
 0x240   : > { %v2089_v48 = vadd.f32 %v2057_v37, %v1993_v12  ;;  %v2037_v23 = vmul.f32 0.001, %v2005_v40  ;;  %v1959_v14 = vld [vmem:[%s4718_s10 + $0xa8] sm:$0xff]  ;;  %v1990_v58 = vmul.f32 0.999, %v1958_v52  ;;  %v2022_v25 = vld [vmem:[%s4717_s9 + $0xa0] sm:$0xff] }
 0x241   : > { %v1991_v43 = vmul.f32 0.999, %v1959_v14  ;;  %v2023_v45 = vld [vmem:[%s4717_s9 + $0xa8] sm:$0xff]  ;;  %2195 = vst [vmem:[#allocation10 + $0xb0] sm:$0xff] %v2088_v34  ;;  %v2068_v22 = vadd.f32 %v2036_v46, %v1972_v38  ;;  %v2054_v36 = vmul.f32 0.001, %v2022_v25 }
 0x242   : > { %v2323_v1 = vpack.c.bf16 %v2089_v48, %v2088_v34  ;;  %v2069_v16 = vadd.f32 %v2037_v23, %v1973_v8  ;;  %v1938_v56 = vld [vmem:[%s4718_s10] sm:$0xff]  ;;  %v1939_v13 = vld [vmem:[%s4718_s10 + $0x8] sm:$0xff]  ;;  %2196 = vst [vmem:[#allocation10 + $0xb8] sm:$0xff] %v2089_v48  ;;  %v2055_v42 = vmul.f32 0.001, %v2023_v45  ;;  %v1956_v57 = vld [vmem:[%s4718_s10 + $0x90] sm:$0xff] }
 0x243   : > { %v2002_v51 = vld [vmem:[%s4717_s9] sm:$0xff]  ;;  %v1970_v50 = vmul.f32 0.999, %v1938_v56  ;;  %v2003_v27 = vld [vmem:[%s4717_s9 + $0x8] sm:$0xff]  ;;  %2175 = vst [vmem:[#allocation10 + $0x10] sm:$0xff] %v2068_v22  ;;  %v2086_v11 = vadd.f32 %v2054_v36, %v1990_v58  ;;  %v1957_v21 = vld [vmem:[%s4718_s10 + $0x98] sm:$0xff] }
 0x244   : > { %2348 = vmatpush.bf16.msrb.mxu1 %v2323_v1  ;;  %v2313_v60 = vpack.c.bf16 %v2069_v16, %v2068_v22  ;;  %v1971_v10 = vmul.f32 0.999, %v1939_v13  ;;  %v2034_v15 = vmul.f32 0.001, %v2002_v51  ;;  %2176 = vst [vmem:[#allocation10 + $0x18] sm:$0xff] %v2069_v16  ;;  %v2087_v41 = vadd.f32 %v2055_v42, %v1991_v43  ;;  %v2020_v18 = vld [vmem:[%s4717_s9 + $0x90] sm:$0xff] }
 0x245   : > { %v2035_v29 = vmul.f32 0.001, %v2003_v27  ;;  %v1988_v3 = vmul.f32 0.999, %v1956_v57  ;;  %2193 = vst [vmem:[#allocation10 + $0xa0] sm:$0xff] %v2086_v11  ;;  %v2021_v35 = vld [vmem:[%s4717_s9 + $0x98] sm:$0xff] }
 0x246   : > { %2337 = vmatpush.bf16.msrb.mxu0 %v2313_v60  ;;  %v2066_v55 = vadd.f32 %v2034_v15, %v1970_v50  ;;  %v1989_v39 = vmul.f32 0.999, %v1957_v21  ;;  %2194 = vst [vmem:[#allocation10 + $0xa8] sm:$0xff] %v2087_v41  ;;  %v2322_v0 = vpack.c.bf16 %v2087_v41, %v2086_v11  ;;  %v2052_v28 = vmul.f32 0.001, %v2020_v18  ;;  %v1954_v54 = vld [vmem:[%s4718_s10 + $0x80] sm:$0xff] }
 0x247   : > { %v2067_v24 = vadd.f32 %v2035_v29, %v1971_v10  ;;  %v2053_v7 = vmul.f32 0.001, %v2021_v35  ;;  %v1955_v6 = vld [vmem:[%s4718_s10 + $0x88] sm:$0xff]  ;;  %v2018_v59 = vld [vmem:[%s4717_s9 + $0x80] sm:$0xff]  ;;  %v1986_v9 = vmul.f32 0.999, %v1954_v54 }
 0x248   : > { %2173 = vst [vmem:[#allocation10] sm:$0xff] %v2066_v55  ;;  %2349 = vmatpush.bf16.msrb.mxu1 %v2322_v0  ;;  %v2084_v30 = vadd.f32 %v2052_v28, %v1988_v3  ;;  %v2019_v5 = vld [vmem:[%s4717_s9 + $0x88] sm:$0xff]  ;;  %v1987_v20 = vmul.f32 0.999, %v1955_v6  ;;  %v2050_v17 = vmul.f32 0.001, %v2018_v59 }
 0x249   : > { %2174 = vst [vmem:[#allocation10 + $0x8] sm:$0xff] %v2067_v24  ;;  %v2312_v32 = vpack.c.bf16 %v2067_v24, %v2066_v55  ;;  %v2085_v44 = vadd.f32 %v2053_v7, %v1989_v39  ;;  %v2051_v63 = vmul.f32 0.001, %v2019_v5  ;;  %v2098_v53 = vld [vmem:[%s4720_s12] sm:$0x1]  ;;  %v2252_v2 = vperm.slane %v4549_v26, 0 }
 0x24a   : > { %2191 = vst [vmem:[#allocation10 + $0x90] sm:$0xff] %v2084_v30  ;;  %v2082_v62 = vadd.f32 %v2050_v17, %v1986_v9  ;;  %v2100_v12 = vld [vmem:[%s4719_s11] sm:$0x1]  ;;  %v2099_v49 = vmul.f32 0.999, %v2098_v53  ;;  %v2253_v40 = vperm.slane %v4549_v26, 1 }
 0x24b   : > { %2338 = vmatpush.bf16.msrb.mxu0 %v2312_v32  ;;  %v2321_v19 = vpack.c.bf16 %v2085_v44, %v2084_v30  ;;  %2192 = vst [vmem:[#allocation10 + $0x98] sm:$0xff] %v2085_v44  ;;  %v2083_v31 = vadd.f32 %v2051_v63, %v1987_v20  ;;  %v2101_v61 = vmul.f32 0.001, %v2100_v12 }
 0x24c   : > { %2189 = vst [vmem:[#allocation10 + $0x80] sm:$0xff] %v2082_v62 }
 0x24d   : > { %2350 = vmatpush.bf16.msrb.mxu1 %v2321_v19  ;;  %v2320_v4 = vpack.c.bf16 %v2083_v31, %v2082_v62  ;;  %2190 = vst [vmem:[#allocation10 + $0x88] sm:$0xff] %v2083_v31  ;;  %v2102_v37 = vadd.f32 %v2101_v61, %v2099_v49 }
 0x24f   : > { %2205 = vst [vmem:[#allocation11] sm:$0x1] %v2102_v37  ;;  %v2329_v16 = vperm.slane %v2102_v37, 0 }
 0x251   : > { %2351 = vmatpush.bf16.msrb.mxu1 %v2320_v4 }
 0x2aa   : > { %v2265_v33 = vpop.f32.mrf.mxu0  ;;  %v2278_v38 = vpop.f32.mrf.mxu1 }
 0x2ab   : > { %v2266_v8 = vadd.f32 %v2265_v33, %v2252_v2 }
 0x2ad   : > { %v2279_v47 = vadd.f32 %v2278_v38, %v2266_v8 }
 0x2af   : > { %v2308_v34 = vmax.f32 %v2279_v47, 0.0 }
 0x2b1   : > { %v2310_v48 = vpack.c.bf16 %v2308_v34, %v2308_v34  ;;  %v2291_v46 = vpop.f32.mrf.mxu2  ;;  %v2304_v23 = vpop.f32.mrf.mxu3 }
 0x2b2   : > { %v2292_v52 = vadd.f32 %v2291_v46, %v2253_v40  ;;  %v2267_v14 = vpop.f32.mrf.mxu0  ;;  %v2280_v58 = vpop.f32.mrf.mxu1 }
 0x2b3   : > { %2339 = vmatmul.bf16.vlgmr.msrb.gmra.mxu0 %v2310_v48 }
 0x2b4   : > { %v2305_v43 = vadd.f32 %v2304_v23, %v2292_v52 }
 0x2b6   : > { %v2309_v25 = vmax.f32 %v2305_v43, 0.0 }
 0x2b8   : > { %v2311_v45 = vpack.c.bf16 %v2309_v25, %v2309_v25 }
 0x2b9   : > { %v2293_v1 = vpop.f32.mrf.mxu2  ;;  %v2306_v22 = vpop.f32.mrf.mxu3 }
 0x2ba   : > { %2352 = vmatmul.bf16.vlgmr.msrb.gmra.mxu1 %v2311_v45 }
 0x330   : > { %v2340_v36 = vpop.f32.mrf.mxu0 }
 0x331   : > { %v2341_v56 = vadd.f32 %v2340_v36, %v2329_v16 }
 0x337   : > { %v2353_v13 = vpop.f32.mrf.mxu1 }
 0x338   : > { %v2354_v51 = vadd.f32 %v2353_v13, %v2341_v56  ;;  %v2342_v26 = vpop.f32.mrf.mxu0 }
 0x33a   : > { %v2357_v42 = vmul.f32 %v2354_v51, %v2354_v51 }
 0x33c   : > { %2358 = vadd.xlane.f32.xlu0 %v2357_v42 }
 0x33f   : > { %v2355_v50 = vpop.f32.mrf.mxu1 }
 0x3af   : > { %v2359_v27 = vpop.xlane.xlu0 %2358 }
 0x3b0   : > { %v2360_v60 = vmax.f32 %v2359_v27, 1e-24 }
 0x3b2   : > { %2718 = vrsqrt.f32 %v2360_v60  ;;  %vm2367_vm2 = vweird.f32 %v2360_v60 }
 0x3b8   : > { %v2719_v11 = vpop.eup %2718 }
 0x3b9   : > { %v2362_v10 = vmul.f32 %v2719_v11, %v2360_v60  ;;  %vm2368_vm1 = vweird.f32 %v2719_v11 }
 0x3ba   : > { %vm2369_vm3 = vmor %vm2367_vm2, %vm2368_vm1 }
 0x3bb   : > { %v2363_v15 = vmul.f32 %v2719_v11, %v2362_v10 }
 0x3bd   : > { %v2364_v57 = vmul.f32 0.5, %v2363_v15 }
 0x3bf   : > { %v2365_v41 = vsub.f32 1.5, %v2364_v57 }
 0x3c1   : > { %v2366_v29 = vmul.f32 %v2719_v11, %v2365_v41 }
 0x3c3   : > { %v2370_v21 = vsel %vm2369_vm3, %v2719_v11, %v2366_v29 }
 0x3c4   : > { %v2371_v3 = vmul.f32 %v2370_v21, %v2354_v51 }
 0x3c6   : > { %2372 = vst [vmem:[%s4721_s13] sm:$0xff] %v2371_v3 }
 0x3c7 PF: > { %s2407_s29 = sshll.u32 %s4723_s15, 4  ;;  %s2937_s23 = smov [#allocation5]   ;;  %s2408_s29 = int_to_ptr.hbm [resolvable:$true] %s2407_s29 }
 0x3c8   : > { %s2405_s24 = sshll.u32 %s2937_s23, 4  ;;  %s2938_s27 = smov [#allocation8]   ;;  %s2406_s24 = int_to_ptr.vmem [resolvable:$true] %s2405_s24 }
 0x3c9   : > { %2641 = dma.vmem_to_hbm [thread:$0]  (%p363_p2), %s2406_s24, 32, %s2408_s29, [#allocation6]  }
 0x3ca   : > { %s2431_s16 = sshll.u32 %s2938_s27, 4  ;;  %s2433_s20 = sshll.u32 %s4725_s17, 4  ;;  %s2432_s16 = int_to_ptr.vmem [resolvable:$true] %s2431_s16  ;;  %s2434_s20 = int_to_ptr.hbm [resolvable:$true] %s2433_s20 }
 0x3cb   : > { %2645 = dma.vmem_to_hbm [thread:$0]  (%p363_p2), %s2432_s16, 32, %s2434_s20, [#allocation9]  }
 0x3cc   : > { %s2638_s21 = sshll.u32 %s3067_s1, 10  ;;  %s4995_s3 = sld [smem:[#allocation106_spill]] }
 0x3cd   : > { %s2390_s28 = sshll.u32 %s3127_s14, 4  ;;  %s2374_s29 = scalar_lea.sflag [#allocation4], %s606_s22  ;;  %s2391_s28 = int_to_ptr.vmem [resolvable:$true] %s2390_s28 }
 0x3d2   : > { %s2389_s26 = scalar_lea.hbm %s4995_s3, %s2638_s21  ;;  %s2796_s19 = scalar_lea.hbm %s4995_s3, 2048 }
 0x3d3   : > { %s2392_s23 = sshll.u32 %s2389_s26, 4  ;;  %s2393_s23 = int_to_ptr.hbm [resolvable:$true] %s2392_s23 }
 0x3d4   : > { %s2790_s24 = sshra.s32 %s2393_s23, 4  ;;  %s2791_s24 = int_to_ptr.hbm [resolvable:$true] %s2790_s24 }
 0x3d5   : > { %s2792_s27 = scalar_lea.hbm %s2791_s24, 1024  ;;  %p2797_p4 = scmp.lt.s32.totalorder %s2791_s24, %s4995_s3 }
 0x3d6   : > { %p2793_p0 = scmp.ne.s32.totalorder %s2791_s24, %s2792_s27  ;;  %p2798_p7 = scmp.lt.s32.totalorder %s2796_s19, %s2792_s27 }
 0x3d8   : > { %p2794_p1 = pnand %p2793_p0, %p3086_p5  ;;  %p2799_p8 = por %p2798_p7, %p2797_p4 }
 0x3da   : > { %p2795_p3 = pneg %p2794_p1 }
 0x3dc   : > { %p2800_p9 = pnand %p2799_p8, %p2795_p3 }
 0x3de   : > { %2803 = shalt.err (!%p2800_p9)
}
 0x3df   : > { %s2939_s22 = smov 256   ;;  %s2940_s14 = smov 16  }
 0x3e0   : > { %2639 = dma.vmem_to_hbm [thread:$0]  (%p3086_p5), %s2391_s28, 16384, %s2393_s23, %s2374_s29, %s2939_s22, %s2939_s22, %s2940_s14  }
 0x3e1   : > { %s2941_s21 = smov [#allocation7]   ;;  %s4996_s16 = sld [smem:[#allocation107_spill]] }
 0x3e2   : > { %s2416_s25 = sshll.u32 %s2941_s21, 4  ;;  %s4997_s19 = sld [smem:[#allocation108_spill]]  ;;  %s2417_s25 = int_to_ptr.vmem [resolvable:$true] %s2416_s25 }
 0x3e3   : > { %s2942_s2 = smov [#allocation10]   ;;  %s2943_s0 = smov 128  }
 0x3e4   : > { %s2442_s3 = sshll.u32 %s2942_s2, 4  ;;  %s2944_s28 = smov 8   ;;  %s2443_s3 = int_to_ptr.vmem [resolvable:$true] %s2442_s3 }
 0x3e5   : > { %s2945_s23 = smov [#allocation11]   ;;  %s4998_s18 = sld [smem:[#allocation109_spill]] }
 0x3e6   : > { %s2457_s29 = sshll.u32 %s2945_s23, 4  ;;  %s2458_s29 = int_to_ptr.vmem [resolvable:$true] %s2457_s29 }
 0x3e7   : > { %s2418_s4 = sshll.u32 %s4996_s16, 4  ;;  %s2419_s4 = int_to_ptr.hbm [resolvable:$true] %s2418_s4 }
 0x3e8   : > { %2643 = dma.vmem_to_hbm [thread:$0]  (%p363_p2), %s2417_s25, 8192, %s2419_s4, [#allocation6], %s2939_s22, %s2939_s22, %s2940_s14  }
 0x3e9   : > { %s2444_s20 = sshll.u32 %s4997_s19, 4  ;;  %s2445_s20 = int_to_ptr.hbm [resolvable:$true] %s2444_s20 }
 0x3ea   : > { %2647 = dma.vmem_to_hbm [thread:$0]  (%p363_p2), %s2443_s3, 4096, %s2445_s20, [#allocation9], %s2943_s0, %s2943_s0, %s2944_s28  }
 0x3eb   : > { %s2459_s16 = sshll.u32 %s4998_s18, 4  ;;  %s2460_s16 = int_to_ptr.hbm [resolvable:$true] %s2459_s16 }
 0x3ec   : > { %2649 = dma.vmem_to_hbm [thread:$0]  (%p363_p2), %s2458_s29, 16, %s2460_s16, [#allocation12]  }
 0x3ed   : > { %2905 = dma.done.wait (%p363_p2), [#allocation6], 8224  }
 0x3ee   : > { %2907 = vsyncadd (%p363_p2), [#allocation6], 4294959072 }
 0x3ef   : > { %2909 = dma.done.wait (%p363_p2), [#allocation9], 4128  }
 0x3f0   : > { %2911 = vsyncadd (%p363_p2), [#allocation9], 4294963168 }
 0x3f1   : > { %2913 = dma.done.wait (%p363_p2), [#allocation12], 16  }
 0x3f2   : > { %2915 = vsyncadd (%p363_p2), [#allocation12], 4294967280 }
 0x3f3 PF: > { %s4999_s4 = sld [smem:[#allocation19_spill]] }
 0x3f4   : > { %s5000_s3 = sld [smem:[#allocation17_spill]] }
 0x3f9   : > { %p2675_p5 = scmp.ge.s32.totalorder %s4999_s4, 2 }
 0x3fa   : > { %s2499_s14 = sand.u32 1, %s5000_s3  }
 0x3fb   : > { %p2662_p10 = pnand %p2675_p5, %p3090_p6  ;;  %s2500_s25 = scalar_lea.sflag [#allocation4], %s2499_s14 }
 0x3fd   : > { %p2663_p11 = pneg %p2662_p10 }
 0x3ff   : > { %2917 = dma.done.wait (%p2663_p11), %s2500_s25, 16384  }
 0x400   : > { %2919 = vsyncadd (%p2663_p11), %s2500_s25, 4294950912  ;;  %s5002_s21 = sld [smem:[#allocation20_spill]]  ;;  %s5005_s0 = smov %s2926_s30 }
 0x401   : > { %s5003_s24 = sld [smem:[#allocation18_spill]] }
 0x402   : > { %s5004_s20 = sld [smem:[#allocation21_spill]] }
 0x406   : > { %p33_p12 = scmp.ge.s32.totalorder %s5002_s21, 4  }
 0x407   : > { %s5006_s30 = smov %s5003_s24 }
 0x408   :  { %35 = sbr.rel (!%p33_p12) target bundleno = 16 (0x10), region = 169 }
 0x40d   :  { %2506 = vsyncpa [#allocation4], 1 }
 0x40e   :  { %2508 = vsyncpa [#allocation4 + $0x1], 1 }
 0x40f   :  { %2509 = vsyncpa [#allocation6], 1 }
 0x410   :  { %2510 = vsyncpa [#allocation9], 1 }
 0x411   :  { %2511 = vsyncpa [#allocation12], 1 }

</bundles_post_ra>
